<compile_context>
chip_gen: v6e
topology: v6e:2x2x1
jax: 0.10.0
libtpu: 0.0.40
codegen_flags: <defaults>
</compile_context>

<pallas_src>
import jax
import jax.numpy as jnp
from jax.experimental import pallas as pl
from jax.experimental.pallas import tpu as pltpu

VMEM_SPEC = pl.BlockSpec(memory_space=pltpu.MemorySpace.VMEM)
FC_PAD = 128          # lane-dense padded width of the final linear output


# ----------------------------------------------------------------------------
# Fused kernel.
# ----------------------------------------------------------------------------
def atten_lstm_kernel(xpair_ref,                       # (B, L, 2*D)          f32
                      wih1_ref, whh1_ref, b1_ref,      # (2D,8H)/(2H,8H) bf16, (1,8H) f32
                      wih2_ref, whh2_ref, b2_ref,      # (4H,8H)/(2H,8H) bf16, (1,8H) f32
                      att1_ref, att2_ref,              # (1, 2H) f32 each
                      fcw_ref, fcb_ref,                # (4H,128) bf16, (1,128) f32
                      out_ref,                         # (B, 128) f32
                      out1_ref, out1r_ref, out2_ref):  # scratch: (B, L, 2H) f32
    B, L, _ = xpair_ref.shape
    H2 = out1_ref.shape[-1]          # 2H = per-timestep BiLSTM feature width
    H = H2 // 2
    G = 4 * H2                       # 8H = gate width for both directions

    def input_proj(x_pair, wih_ref, b_ref):
        # Hoisted input projection: one matmul for all timesteps & both
        # directions, bias folded in.  x_pair rows are [x[t] | x[L-1-t]].
        din = x_pair.shape[-1]
        xf = x_pair.reshape(B * L, din).astype(jnp.bfloat16)
        xp = jnp.dot(xf, wih_ref[...], preferred_element_type=jnp.float32) + b_ref[...]
        return xp.reshape(B, L, G)

    def bilstm(xp, whh_ref, out_r, rev_r):
        # Interleaved fwd/bwd recurrence.  h = [h_fwd | h_bwd] (B, 2H);
        # whh is block-diagonal (2H, 8H) -> ONE MXU dot per step for both dirs.
        whh = whh_ref[...]
        h = jnp.zeros((B, H2), jnp.float32)
        c = jnp.zeros((B, H2), jnp.float32)
        for s in range(L):                               # L small & static -> unrolled
            gates = xp[:, s, :] + jnp.dot(h.astype(jnp.bfloat16), whh,
                                          preferred_element_type=jnp.float32)
            sg = jax.nn.sigmoid(gates)                   # one sigmoid over all 8H lanes
            i_g = sg[:, 0 * H2:1 * H2]                   # [i_f | i_b]
            f_g = sg[:, 1 * H2:2 * H2]                   # [f_f | f_b]
            o_g = sg[:, 2 * H2:3 * H2]                   # [o_f | o_b]
            g_g = jnp.tanh(gates[:, 3 * H2:4 * H2])      # [g_f | g_b]
            c = f_g * c + i_g * g_g
            h = o_g * jnp.tanh(c)
            # h[:, :H] = fwd output at time s; h[:, H:] = bwd output at time L-1-s.
            out_r[:, s, 0:H] = h[:, 0:H]
            out_r[:, L - 1 - s, H:H2] = h[:, H:H2]
            if rev_r is not None:                        # time-reversed copy for layer 2
                rev_r[:, L - 1 - s, 0:H] = h[:, 0:H]
                rev_r[:, s, H:H2] = h[:, H:H2]

    def attention(seq, w_ref):
        # bmm with (1,2H) weight -> relu -> softmax over seq -> weighted sum.
        # (Redundant ones-mask renormalization of the reference removed: identity.)
        w = w_ref[...]
        scores = jnp.maximum(jnp.sum(seq * w.reshape(1, 1, H2), axis=-1), 0.0)   # (B, L)
        scores = scores - jnp.max(scores, axis=-1, keepdims=True)
        e = jnp.exp(scores)
        attn = e / jnp.sum(e, axis=-1, keepdims=True)
        return jnp.sum(seq * attn[:, :, None], axis=1)                           # (B, 2H)

    # ---- layer 1: BiLSTM + attention ---------------------------------------
    xp1 = input_proj(xpair_ref[...], wih1_ref, b1_ref)
    bilstm(xp1, whh1_ref, out1_ref, out1r_ref)
    out1 = out1_ref[...]
    xa = attention(out1, att1_ref)

    # ---- layer 2: BiLSTM(out1) + attention ----------------------------------
    out1_pair = jnp.concatenate([out1, out1r_ref[...]], axis=-1)   # (B, L, 4H)
    xp2 = input_proj(out1_pair, wih2_ref, b2_ref)
    bilstm(xp2, whh2_ref, out2_ref, None)
    ya = attention(out2_ref[...], att2_ref)

    # ---- concat + final linear (lane-dense padded output) -------------------
    # TODO(synk): nn.Dropout(0.5) treated as eval-mode identity (no RNG mask).
    z = jnp.concatenate([xa, ya], axis=-1).astype(jnp.bfloat16)    # (B, 4H)
    out_ref[...] = (jnp.dot(z, fcw_ref[...], preferred_element_type=jnp.float32)
                    + fcb_ref[...])


# ----------------------------------------------------------------------------
# Wrapper: one pallas_call for the whole forward pass.
# ----------------------------------------------------------------------------
def atten_lstm_forward(x, params):
    B, L, _ = x.shape
    H2 = params["whh1"].shape[0]          # 2H
    # Pair the input with its time-reversed copy so the kernel's hoisted input
    # projection yields fwd(time s) and bwd(time L-1-s) gates from the same row.
    x_pair = jnp.concatenate([x, jnp.flip(x, axis=1)], axis=-1)    # (B, L, 2D)
    out_pad = pl.pallas_call(
        atten_lstm_kernel,
        out_shape=jax.ShapeDtypeStruct((B, FC_PAD), jnp.float32),
        in_specs=[VMEM_SPEC] * 11,
        out_specs=VMEM_SPEC,
        scratch_shapes=[pltpu.VMEM((B, L, H2), jnp.float32),   # out1
                        pltpu.VMEM((B, L, H2), jnp.float32),   # out1 time-reversed
                        pltpu.VMEM((B, L, H2), jnp.float32)],  # out2
    )(x_pair,
      params["wih1"], params["whh1"], params["b1"],
      params["wih2"], params["whh2"], params["b2"],
      params["att1_w"], params["att2_w"],
      params["fc_w"], params["fc_b"])
    return out_pad[:, :2]


# ----------------------------------------------------------------------------
# Parameter construction (PyTorch-style) and packing into the fused layout.
# ----------------------------------------------------------------------------
def _interleave_gate_cols(wf, wb, H):
    """wf/wb: (X, 4H) with PyTorch gate column order [i, f, g, o] for the
    fwd / bwd direction.  Returns (X, 8H) with columns
    [i_f i_b | f_f f_b | o_f o_b | g_f g_b]."""
    def g(w):
        return w[:, 0:H], w[:, H:2 * H], w[:, 2 * H:3 * H], w[:, 3 * H:4 * H]
    i_f, f_f, g_f, o_f = g(wf)
    i_b, f_b, g_b, o_b = g(wb)
    return jnp.concatenate([i_f, i_b, f_f, f_b, o_f, o_b, g_f, g_b], axis=1)


def init_bilstm_params(key, in_dim, H):
    """Raw PyTorch-style bidirectional LSTM params, uniform(-1/sqrt(H), 1/sqrt(H))."""
    stdv = 1.0 / (H ** 0.5)
    ks = jax.random.split(key, 8)
    u = lambda k, shape: jax.random.uniform(k, shape, jnp.float32, -stdv, stdv)
    return {
        "w_ih_f": u(ks[0], (4 * H, in_dim)), "w_hh_f": u(ks[1], (4 * H, H)),
        "b_ih_f": u(ks[2], (4 * H,)),        "b_hh_f": u(ks[3], (4 * H,)),
        "w_ih_b": u(ks[4], (4 * H, in_dim)), "w_hh_b": u(ks[5], (4 * H, H)),
        "b_ih_b": u(ks[6], (4 * H,)),        "b_hh_b": u(ks[7], (4 * H,)),
    }


def pack_bilstm_params(raw, H):
    """Pack raw per-direction weights into the fused-kernel layout:
       wih (2*in_dim, 8H) bf16  -- fwd rows on top, bwd rows on bottom, zeros in
                                   the other direction's gate columns,
       whh (2H, 8H)       bf16  -- block-diagonal (fwd | bwd),
       b   (1, 8H)        f32   -- b_ih + b_hh per direction, interleaved."""
    wf, wb = raw["w_ih_f"].T, raw["w_ih_b"].T           # (in_dim, 4H)
    zi = jnp.zeros_like(wf)
    wih = jnp.concatenate([_interleave_gate_cols(wf, zi, H),
                           _interleave_gate_cols(zi, wb, H)], axis=0)
    hf, hb = raw["w_hh_f"].T, raw["w_hh_b"].T           # (H, 4H)
    zh = jnp.zeros_like(hf)
    whh = jnp.concatenate([_interleave_gate_cols(hf, zh, H),
                           _interleave_gate_cols(zh, hb, H)], axis=0)
    bf = (raw["b_ih_f"] + raw["b_hh_f"]).reshape(1, 4 * H)
    bb = (raw["b_ih_b"] + raw["b_hh_b"]).reshape(1, 4 * H)
    b = _interleave_gate_cols(bf, bb, H)
    return wih.astype(jnp.bfloat16), whh.astype(jnp.bfloat16), b


if __name__ == "__main__":
    B, L, INPUT, H = 2, 8, 32, 16     # small shapes consistent with the module

    key = jax.random.PRNGKey(0)
    kx, k1, k2, ka1, ka2, kf1, kf2 = jax.random.split(key, 7)

    x = jax.random.normal(kx, (B, L, INPUT), jnp.float32)

    raw1 = init_bilstm_params(k1, INPUT, H)
    raw2 = init_bilstm_params(k2, 2 * H, H)
    wih1, whh1, b1 = pack_bilstm_params(raw1, H)
    wih2, whh2, b2 = pack_bilstm_params(raw2, H)

    att_stdv = 1.0 / ((2 * H) ** 0.5)
    fc_stdv = 1.0 / ((4 * H) ** 0.5)
    fc_w_raw = jax.random.uniform(kf1, (2, 4 * H), jnp.float32, -fc_stdv, fc_stdv)
    fc_b_raw = jax.random.uniform(kf2, (2,), jnp.float32, -fc_stdv, fc_stdv)
    fc_w = jnp.zeros((4 * H, FC_PAD), jnp.float32).at[:, :2].set(fc_w_raw.T)
    fc_w = fc_w.astype(jnp.bfloat16)
    fc_b = jnp.zeros((1, FC_PAD), jnp.float32).at[0, :2].set(fc_b_raw)

    params = {
        "wih1": wih1, "whh1": whh1, "b1": b1,
        "wih2": wih2, "whh2": whh2, "b2": b2,
        "att1_w": jax.random.uniform(ka1, (1, 2 * H), jnp.float32, -att_stdv, att_stdv),
        "att2_w": jax.random.uniform(ka2, (1, 2 * H), jnp.float32, -att_stdv, att_stdv),
        "fc_w": fc_w, "fc_b": fc_b,
    }

    out = atten_lstm_forward(x, params)
    jax.block_until_ready(out)
    assert out.shape == (B, 2)
    print("KERNEL_OK")
</pallas_src>

<mosaic_0001>
module attributes {stable_mosaic.version = 11 : i64} {
  func.func @atten_lstm_kernel(%arg0: memref<2x8x64xf32, #tpu.memory_space<vmem>>, %arg1: memref<64x128xbf16, #tpu.memory_space<vmem>>, %arg2: memref<32x128xbf16, #tpu.memory_space<vmem>>, %arg3: memref<1x128xf32, #tpu.memory_space<vmem>>, %arg4: memref<64x128xbf16, #tpu.memory_space<vmem>>, %arg5: memref<32x128xbf16, #tpu.memory_space<vmem>>, %arg6: memref<1x128xf32, #tpu.memory_space<vmem>>, %arg7: memref<1x32xf32, #tpu.memory_space<vmem>>, %arg8: memref<1x32xf32, #tpu.memory_space<vmem>>, %arg9: memref<64x128xbf16, #tpu.memory_space<vmem>>, %arg10: memref<1x128xf32, #tpu.memory_space<vmem>>, %arg11: memref<2x128xf32, #tpu.memory_space<vmem>>, %arg12: memref<2x8x32xf32, #tpu.memory_space<vmem>>, %arg13: memref<2x8x32xf32, #tpu.memory_space<vmem>>, %arg14: memref<2x8x32xf32, #tpu.memory_space<vmem>>) attributes {dimension_semantics = [], scalar_prefetch = 0 : i64, scratch_operands = 3 : i64, tpu.core_type = #tpu.core_type<tc>} {
    %c0 = arith.constant 0 : index
    %c0_0 = arith.constant 0 : index
    %c0_1 = arith.constant 0 : index
    %0 = vector.load %arg0[%c0, %c0_0, %c0_1] : memref<2x8x64xf32, #tpu.memory_space<vmem>>, vector<2x8x64xf32>
    %1 = vector.shape_cast %0 : vector<2x8x64xf32> to vector<16x64xf32>
    %2 = arith.truncf %1 : vector<16x64xf32> to vector<16x64xbf16>
    %c0_2 = arith.constant 0 : index
    %c0_3 = arith.constant 0 : index
    %3 = vector.load %arg1[%c0_2, %c0_3] : memref<64x128xbf16, #tpu.memory_space<vmem>>, vector<64x128xbf16>
    %cst = arith.constant dense<0.000000e+00> : vector<16x128xf32>
    %4 = tpu.matmul %2, %3, %cst {dimension_numbers = #tpu.dot_dimension_numbers<[1], [0], [0], [1], [0, 0, 1, 1], [], []>} : vector<16x64xbf16>, vector<64x128xbf16>, vector<16x128xf32> -> vector<16x128xf32>
    %c0_4 = arith.constant 0 : index
    %c0_5 = arith.constant 0 : index
    %5 = vector.load %arg3[%c0_4, %c0_5] : memref<1x128xf32, #tpu.memory_space<vmem>>, vector<1x128xf32>
    %6 = vector.broadcast %5 : vector<1x128xf32> to vector<16x128xf32>
    %7 = arith.addf %4, %6 : vector<16x128xf32>
    %8 = vector.shape_cast %7 : vector<16x128xf32> to vector<2x8x128xf32>
    %c0_6 = arith.constant 0 : index
    %c0_7 = arith.constant 0 : index
    %9 = vector.load %arg2[%c0_6, %c0_7] : memref<32x128xbf16, #tpu.memory_space<vmem>>, vector<32x128xbf16>
    %cst_8 = arith.constant 0.000000e+00 : f32
    %10 = vector.broadcast %cst_8 : f32 to vector<2x32xf32>
    %cst_9 = arith.constant 0.000000e+00 : f32
    %11 = vector.broadcast %cst_9 : f32 to vector<2x32xf32>
    %12 = vector.extract_strided_slice %8 {offsets = [0, 0, 0], sizes = [2, 1, 128], strides = [1, 1, 1]} : vector<2x8x128xf32> to vector<2x1x128xf32>
    %13 = vector.shape_cast %12 : vector<2x1x128xf32> to vector<2x128xf32>
    %14 = arith.truncf %10 : vector<2x32xf32> to vector<2x32xbf16>
    %cst_10 = arith.constant dense<0.000000e+00> : vector<2x128xf32>
    %15 = tpu.matmul %14, %9, %cst_10 {dimension_numbers = #tpu.dot_dimension_numbers<[1], [0], [0], [1], [0, 0, 1, 1], [], []>} : vector<2x32xbf16>, vector<32x128xbf16>, vector<2x128xf32> -> vector<2x128xf32>
    %16 = arith.addf %13, %15 : vector<2x128xf32>
    %17 = arith.negf %16 : vector<2x128xf32>
    %18 = math.exp %17 : vector<2x128xf32>
    %cst_11 = arith.constant 1.000000e+00 : f32
    %19 = vector.broadcast %cst_11 : f32 to vector<2x128xf32>
    %20 = arith.addf %19, %18 : vector<2x128xf32>
    %21 = arith.divf %19, %20 : vector<2x128xf32>
    %22 = vector.extract_strided_slice %21 {offsets = [0, 0], sizes = [2, 32], strides = [1, 1]} : vector<2x128xf32> to vector<2x32xf32>
    %23 = vector.extract_strided_slice %21 {offsets = [0, 32], sizes = [2, 32], strides = [1, 1]} : vector<2x128xf32> to vector<2x32xf32>
    %24 = vector.extract_strided_slice %21 {offsets = [0, 64], sizes = [2, 32], strides = [1, 1]} : vector<2x128xf32> to vector<2x32xf32>
    %25 = vector.extract_strided_slice %16 {offsets = [0, 96], sizes = [2, 32], strides = [1, 1]} : vector<2x128xf32> to vector<2x32xf32>
    %26 = math.tanh %25 : vector<2x32xf32>
    %27 = arith.mulf %23, %11 : vector<2x32xf32>
    %28 = arith.mulf %22, %26 : vector<2x32xf32>
    %29 = arith.addf %27, %28 : vector<2x32xf32>
    %30 = math.tanh %29 : vector<2x32xf32>
    %31 = arith.mulf %24, %30 : vector<2x32xf32>
    %32 = vector.extract_strided_slice %31 {offsets = [0, 0], sizes = [2, 16], strides = [1, 1]} : vector<2x32xf32> to vector<2x16xf32>
    %c0_12 = arith.constant 0 : index
    %c0_13 = arith.constant 0 : index
    %c0_14 = arith.constant 0 : index
    %33 = vector.load %arg12[%c0_12, %c0_13, %c0_14] : memref<2x8x32xf32, #tpu.memory_space<vmem>>, vector<2x1x16xf32>
    %34 = vector.shape_cast %33 : vector<2x1x16xf32> to vector<2x16xf32>
    %35 = vector.shape_cast %32 : vector<2x16xf32> to vector<2x1x16xf32>
    tpu.vector_store %arg12[%c0_12, %c0_13, %c0_14], %35 {strides = array<i32>} : memref<2x8x32xf32, #tpu.memory_space<vmem>>, vector<2x1x16xf32>,
    %36 = vector.extract_strided_slice %31 {offsets = [0, 16], sizes = [2, 16], strides = [1, 1]} : vector<2x32xf32> to vector<2x16xf32>
    %c0_15 = arith.constant 0 : index
    %c7 = arith.constant 7 : index
    %c16 = arith.constant 16 : index
    %37 = vector.load %arg12[%c0_15, %c7, %c16] : memref<2x8x32xf32, #tpu.memory_space<vmem>>, vector<2x1x16xf32>
    %38 = vector.shape_cast %37 : vector<2x1x16xf32> to vector<2x16xf32>
    %39 = vector.shape_cast %36 : vector<2x16xf32> to vector<2x1x16xf32>
    tpu.vector_store %arg12[%c0_15, %c7, %c16], %39 {strides = array<i32>} : memref<2x8x32xf32, #tpu.memory_space<vmem>>, vector<2x1x16xf32>,
    %40 = vector.extract_strided_slice %31 {offsets = [0, 0], sizes = [2, 16], strides = [1, 1]} : vector<2x32xf32> to vector<2x16xf32>
    %c0_16 = arith.constant 0 : index
    %c7_17 = arith.constant 7 : index
    %c0_18 = arith.constant 0 : index
    %41 = vector.load %arg13[%c0_16, %c7_17, %c0_18] : memref<2x8x32xf32, #tpu.memory_space<vmem>>, vector<2x1x16xf32>
    %42 = vector.shape_cast %41 : vector<2x1x16xf32> to vector<2x16xf32>
    %43 = vector.shape_cast %40 : vector<2x16xf32> to vector<2x1x16xf32>
    tpu.vector_store %arg13[%c0_16, %c7_17, %c0_18], %43 {strides = array<i32>} : memref<2x8x32xf32, #tpu.memory_space<vmem>>, vector<2x1x16xf32>,
    %44 = vector.extract_strided_slice %31 {offsets = [0, 16], sizes = [2, 16], strides = [1, 1]} : vector<2x32xf32> to vector<2x16xf32>
    %c0_19 = arith.constant 0 : index
    %c0_20 = arith.constant 0 : index
    %c16_21 = arith.constant 16 : index
    %45 = vector.load %arg13[%c0_19, %c0_20, %c16_21] : memref<2x8x32xf32, #tpu.memory_space<vmem>>, vector<2x1x16xf32>
    %46 = vector.shape_cast %45 : vector<2x1x16xf32> to vector<2x16xf32>
    %47 = vector.shape_cast %44 : vector<2x16xf32> to vector<2x1x16xf32>
    tpu.vector_store %arg13[%c0_19, %c0_20, %c16_21], %47 {strides = array<i32>} : memref<2x8x32xf32, #tpu.memory_space<vmem>>, vector<2x1x16xf32>,
    %48 = vector.extract_strided_slice %8 {offsets = [0, 1, 0], sizes = [2, 1, 128], strides = [1, 1, 1]} : vector<2x8x128xf32> to vector<2x1x128xf32>
    %49 = vector.shape_cast %48 : vector<2x1x128xf32> to vector<2x128xf32>
    %50 = arith.truncf %31 : vector<2x32xf32> to vector<2x32xbf16>
    %cst_22 = arith.constant dense<0.000000e+00> : vector<2x128xf32>
    %51 = tpu.matmul %50, %9, %cst_22 {dimension_numbers = #tpu.dot_dimension_numbers<[1], [0], [0], [1], [0, 0, 1, 1], [], []>} : vector<2x32xbf16>, vector<32x128xbf16>, vector<2x128xf32> -> vector<2x128xf32>
    %52 = arith.addf %49, %51 : vector<2x128xf32>
    %53 = arith.negf %52 : vector<2x128xf32>
    %54 = math.exp %53 : vector<2x128xf32>
    %cst_23 = arith.constant 1.000000e+00 : f32
    %55 = vector.broadcast %cst_23 : f32 to vector<2x128xf32>
    %56 = arith.addf %55, %54 : vector<2x128xf32>
    %57 = arith.divf %55, %56 : vector<2x128xf32>
    %58 = vector.extract_strided_slice %57 {offsets = [0, 0], sizes = [2, 32], strides = [1, 1]} : vector<2x128xf32> to vector<2x32xf32>
    %59 = vector.extract_strided_slice %57 {offsets = [0, 32], sizes = [2, 32], strides = [1, 1]} : vector<2x128xf32> to vector<2x32xf32>
    %60 = vector.extract_strided_slice %57 {offsets = [0, 64], sizes = [2, 32], strides = [1, 1]} : vector<2x128xf32> to vector<2x32xf32>
    %61 = vector.extract_strided_slice %52 {offsets = [0, 96], sizes = [2, 32], strides = [1, 1]} : vector<2x128xf32> to vector<2x32xf32>
    %62 = math.tanh %61 : vector<2x32xf32>
    %63 = arith.mulf %59, %29 : vector<2x32xf32>
    %64 = arith.mulf %58, %62 : vector<2x32xf32>
    %65 = arith.addf %63, %64 : vector<2x32xf32>
    %66 = math.tanh %65 : vector<2x32xf32>
    %67 = arith.mulf %60, %66 : vector<2x32xf32>
    %68 = vector.extract_strided_slice %67 {offsets = [0, 0], sizes = [2, 16], strides = [1, 1]} : vector<2x32xf32> to vector<2x16xf32>
    %c0_24 = arith.constant 0 : index
    %c1 = arith.constant 1 : index
    %c0_25 = arith.constant 0 : index
    %69 = vector.load %arg12[%c0_24, %c1, %c0_25] : memref<2x8x32xf32, #tpu.memory_space<vmem>>, vector<2x1x16xf32>
    %70 = vector.shape_cast %69 : vector<2x1x16xf32> to vector<2x16xf32>
    %71 = vector.shape_cast %68 : vector<2x16xf32> to vector<2x1x16xf32>
    tpu.vector_store %arg12[%c0_24, %c1, %c0_25], %71 {strides = array<i32>} : memref<2x8x32xf32, #tpu.memory_space<vmem>>, vector<2x1x16xf32>,
    %72 = vector.extract_strided_slice %67 {offsets = [0, 16], sizes = [2, 16], strides = [1, 1]} : vector<2x32xf32> to vector<2x16xf32>
    %c0_26 = arith.constant 0 : index
    %c6 = arith.constant 6 : index
    %c16_27 = arith.constant 16 : index
    %73 = vector.load %arg12[%c0_26, %c6, %c16_27] : memref<2x8x32xf32, #tpu.memory_space<vmem>>, vector<2x1x16xf32>
    %74 = vector.shape_cast %73 : vector<2x1x16xf32> to vector<2x16xf32>
    %75 = vector.shape_cast %72 : vector<2x16xf32> to vector<2x1x16xf32>
    tpu.vector_store %arg12[%c0_26, %c6, %c16_27], %75 {strides = array<i32>} : memref<2x8x32xf32, #tpu.memory_space<vmem>>, vector<2x1x16xf32>,
    %76 = vector.extract_strided_slice %67 {offsets = [0, 0], sizes = [2, 16], strides = [1, 1]} : vector<2x32xf32> to vector<2x16xf32>
    %c0_28 = arith.constant 0 : index
    %c6_29 = arith.constant 6 : index
    %c0_30 = arith.constant 0 : index
    %77 = vector.load %arg13[%c0_28, %c6_29, %c0_30] : memref<2x8x32xf32, #tpu.memory_space<vmem>>, vector<2x1x16xf32>
    %78 = vector.shape_cast %77 : vector<2x1x16xf32> to vector<2x16xf32>
    %79 = vector.shape_cast %76 : vector<2x16xf32> to vector<2x1x16xf32>
    tpu.vector_store %arg13[%c0_28, %c6_29, %c0_30], %79 {strides = array<i32>} : memref<2x8x32xf32, #tpu.memory_space<vmem>>, vector<2x1x16xf32>,
    %80 = vector.extract_strided_slice %67 {offsets = [0, 16], sizes = [2, 16], strides = [1, 1]} : vector<2x32xf32> to vector<2x16xf32>
    %c0_31 = arith.constant 0 : index
    %c1_32 = arith.constant 1 : index
    %c16_33 = arith.constant 16 : index
    %81 = vector.load %arg13[%c0_31, %c1_32, %c16_33] : memref<2x8x32xf32, #tpu.memory_space<vmem>>, vector<2x1x16xf32>
    %82 = vector.shape_cast %81 : vector<2x1x16xf32> to vector<2x16xf32>
    %83 = vector.shape_cast %80 : vector<2x16xf32> to vector<2x1x16xf32>
    tpu.vector_store %arg13[%c0_31, %c1_32, %c16_33], %83 {strides = array<i32>} : memref<2x8x32xf32, #tpu.memory_space<vmem>>, vector<2x1x16xf32>,
    %84 = vector.extract_strided_slice %8 {offsets = [0, 2, 0], sizes = [2, 1, 128], strides = [1, 1, 1]} : vector<2x8x128xf32> to vector<2x1x128xf32>
    %85 = vector.shape_cast %84 : vector<2x1x128xf32> to vector<2x128xf32>
    %86 = arith.truncf %67 : vector<2x32xf32> to vector<2x32xbf16>
    %cst_34 = arith.constant dense<0.000000e+00> : vector<2x128xf32>
    %87 = tpu.matmul %86, %9, %cst_34 {dimension_numbers = #tpu.dot_dimension_numbers<[1], [0], [0], [1], [0, 0, 1, 1], [], []>} : vector<2x32xbf16>, vector<32x128xbf16>, vector<2x128xf32> -> vector<2x128xf32>
    %88 = arith.addf %85, %87 : vector<2x128xf32>
    %89 = arith.negf %88 : vector<2x128xf32>
    %90 = math.exp %89 : vector<2x128xf32>
    %cst_35 = arith.constant 1.000000e+00 : f32
    %91 = vector.broadcast %cst_35 : f32 to vector<2x128xf32>
    %92 = arith.addf %91, %90 : vector<2x128xf32>
    %93 = arith.divf %91, %92 : vector<2x128xf32>
    %94 = vector.extract_strided_slice %93 {offsets = [0, 0], sizes = [2, 32], strides = [1, 1]} : vector<2x128xf32> to vector<2x32xf32>
    %95 = vector.extract_strided_slice %93 {offsets = [0, 32], sizes = [2, 32], strides = [1, 1]} : vector<2x128xf32> to vector<2x32xf32>
    %96 = vector.extract_strided_slice %93 {offsets = [0, 64], sizes = [2, 32], strides = [1, 1]} : vector<2x128xf32> to vector<2x32xf32>
    %97 = vector.extract_strided_slice %88 {offsets = [0, 96], sizes = [2, 32], strides = [1, 1]} : vector<2x128xf32> to vector<2x32xf32>
    %98 = math.tanh %97 : vector<2x32xf32>
    %99 = arith.mulf %95, %65 : vector<2x32xf32>
    %100 = arith.mulf %94, %98 : vector<2x32xf32>
    %101 = arith.addf %99, %100 : vector<2x32xf32>
    %102 = math.tanh %101 : vector<2x32xf32>
    %103 = arith.mulf %96, %102 : vector<2x32xf32>
    %104 = vector.extract_strided_slice %103 {offsets = [0, 0], sizes = [2, 16], strides = [1, 1]} : vector<2x32xf32> to vector<2x16xf32>
    %c0_36 = arith.constant 0 : index
    %c2 = arith.constant 2 : index
    %c0_37 = arith.constant 0 : index
    %105 = vector.load %arg12[%c0_36, %c2, %c0_37] : memref<2x8x32xf32, #tpu.memory_space<vmem>>, vector<2x1x16xf32>
    %106 = vector.shape_cast %105 : vector<2x1x16xf32> to vector<2x16xf32>
    %107 = vector.shape_cast %104 : vector<2x16xf32> to vector<2x1x16xf32>
    tpu.vector_store %arg12[%c0_36, %c2, %c0_37], %107 {strides = array<i32>} : memref<2x8x32xf32, #tpu.memory_space<vmem>>, vector<2x1x16xf32>,
    %108 = vector.extract_strided_slice %103 {offsets = [0, 16], sizes = [2, 16], strides = [1, 1]} : vector<2x32xf32> to vector<2x16xf32>
    %c0_38 = arith.constant 0 : index
    %c5 = arith.constant 5 : index
    %c16_39 = arith.constant 16 : index
    %109 = vector.load %arg12[%c0_38, %c5, %c16_39] : memref<2x8x32xf32, #tpu.memory_space<vmem>>, vector<2x1x16xf32>
    %110 = vector.shape_cast %109 : vector<2x1x16xf32> to vector<2x16xf32>
    %111 = vector.shape_cast %108 : vector<2x16xf32> to vector<2x1x16xf32>
    tpu.vector_store %arg12[%c0_38, %c5, %c16_39], %111 {strides = array<i32>} : memref<2x8x32xf32, #tpu.memory_space<vmem>>, vector<2x1x16xf32>,
    %112 = vector.extract_strided_slice %103 {offsets = [0, 0], sizes = [2, 16], strides = [1, 1]} : vector<2x32xf32> to vector<2x16xf32>
    %c0_40 = arith.constant 0 : index
    %c5_41 = arith.constant 5 : index
    %c0_42 = arith.constant 0 : index
    %113 = vector.load %arg13[%c0_40, %c5_41, %c0_42] : memref<2x8x32xf32, #tpu.memory_space<vmem>>, vector<2x1x16xf32>
    %114 = vector.shape_cast %113 : vector<2x1x16xf32> to vector<2x16xf32>
    %115 = vector.shape_cast %112 : vector<2x16xf32> to vector<2x1x16xf32>
    tpu.vector_store %arg13[%c0_40, %c5_41, %c0_42], %115 {strides = array<i32>} : memref<2x8x32xf32, #tpu.memory_space<vmem>>, vector<2x1x16xf32>,
    %116 = vector.extract_strided_slice %103 {offsets = [0, 16], sizes = [2, 16], strides = [1, 1]} : vector<2x32xf32> to vector<2x16xf32>
    %c0_43 = arith.constant 0 : index
    %c2_44 = arith.constant 2 : index
    %c16_45 = arith.constant 16 : index
    %117 = vector.load %arg13[%c0_43, %c2_44, %c16_45] : memref<2x8x32xf32, #tpu.memory_space<vmem>>, vector<2x1x16xf32>
    %118 = vector.shape_cast %117 : vector<2x1x16xf32> to vector<2x16xf32>
    %119 = vector.shape_cast %116 : vector<2x16xf32> to vector<2x1x16xf32>
    tpu.vector_store %arg13[%c0_43, %c2_44, %c16_45], %119 {strides = array<i32>} : memref<2x8x32xf32, #tpu.memory_space<vmem>>, vector<2x1x16xf32>,
    %120 = vector.extract_strided_slice %8 {offsets = [0, 3, 0], sizes = [2, 1, 128], strides = [1, 1, 1]} : vector<2x8x128xf32> to vector<2x1x128xf32>
    %121 = vector.shape_cast %120 : vector<2x1x128xf32> to vector<2x128xf32>
    %122 = arith.truncf %103 : vector<2x32xf32> to vector<2x32xbf16>
    %cst_46 = arith.constant dense<0.000000e+00> : vector<2x128xf32>
    %123 = tpu.matmul %122, %9, %cst_46 {dimension_numbers = #tpu.dot_dimension_numbers<[1], [0], [0], [1], [0, 0, 1, 1], [], []>} : vector<2x32xbf16>, vector<32x128xbf16>, vector<2x128xf32> -> vector<2x128xf32>
    %124 = arith.addf %121, %123 : vector<2x128xf32>
    %125 = arith.negf %124 : vector<2x128xf32>
    %126 = math.exp %125 : vector<2x128xf32>
    %cst_47 = arith.constant 1.000000e+00 : f32
    %127 = vector.broadcast %cst_47 : f32 to vector<2x128xf32>
    %128 = arith.addf %127, %126 : vector<2x128xf32>
    %129 = arith.divf %127, %128 : vector<2x128xf32>
    %130 = vector.extract_strided_slice %129 {offsets = [0, 0], sizes = [2, 32], strides = [1, 1]} : vector<2x128xf32> to vector<2x32xf32>
    %131 = vector.extract_strided_slice %129 {offsets = [0, 32], sizes = [2, 32], strides = [1, 1]} : vector<2x128xf32> to vector<2x32xf32>
    %132 = vector.extract_strided_slice %129 {offsets = [0, 64], sizes = [2, 32], strides = [1, 1]} : vector<2x128xf32> to vector<2x32xf32>
    %133 = vector.extract_strided_slice %124 {offsets = [0, 96], sizes = [2, 32], strides = [1, 1]} : vector<2x128xf32> to vector<2x32xf32>
    %134 = math.tanh %133 : vector<2x32xf32>
    %135 = arith.mulf %131, %101 : vector<2x32xf32>
    %136 = arith.mulf %130, %134 : vector<2x32xf32>
    %137 = arith.addf %135, %136 : vector<2x32xf32>
    %138 = math.tanh %137 : vector<2x32xf32>
    %139 = arith.mulf %132, %138 : vector<2x32xf32>
    %140 = vector.extract_strided_slice %139 {offsets = [0, 0], sizes = [2, 16], strides = [1, 1]} : vector<2x32xf32> to vector<2x16xf32>
    %c0_48 = arith.constant 0 : index
    %c3 = arith.constant 3 : index
    %c0_49 = arith.constant 0 : index
    %141 = vector.load %arg12[%c0_48, %c3, %c0_49] : memref<2x8x32xf32, #tpu.memory_space<vmem>>, vector<2x1x16xf32>
    %142 = vector.shape_cast %141 : vector<2x1x16xf32> to vector<2x16xf32>
    %143 = vector.shape_cast %140 : vector<2x16xf32> to vector<2x1x16xf32>
    tpu.vector_store %arg12[%c0_48, %c3, %c0_49], %143 {strides = array<i32>} : memref<2x8x32xf32, #tpu.memory_space<vmem>>, vector<2x1x16xf32>,
    %144 = vector.extract_strided_slice %139 {offsets = [0, 16], sizes = [2, 16], strides = [1, 1]} : vector<2x32xf32> to vector<2x16xf32>
    %c0_50 = arith.constant 0 : index
    %c4 = arith.constant 4 : index
    %c16_51 = arith.constant 16 : index
    %145 = vector.load %arg12[%c0_50, %c4, %c16_51] : memref<2x8x32xf32, #tpu.memory_space<vmem>>, vector<2x1x16xf32>
    %146 = vector.shape_cast %145 : vector<2x1x16xf32> to vector<2x16xf32>
    %147 = vector.shape_cast %144 : vector<2x16xf32> to vector<2x1x16xf32>
    tpu.vector_store %arg12[%c0_50, %c4, %c16_51], %147 {strides = array<i32>} : memref<2x8x32xf32, #tpu.memory_space<vmem>>, vector<2x1x16xf32>,
    %148 = vector.extract_strided_slice %139 {offsets = [0, 0], sizes = [2, 16], strides = [1, 1]} : vector<2x32xf32> to vector<2x16xf32>
    %c0_52 = arith.constant 0 : index
    %c4_53 = arith.constant 4 : index
    %c0_54 = arith.constant 0 : index
    %149 = vector.load %arg13[%c0_52, %c4_53, %c0_54] : memref<2x8x32xf32, #tpu.memory_space<vmem>>, vector<2x1x16xf32>
    %150 = vector.shape_cast %149 : vector<2x1x16xf32> to vector<2x16xf32>
    %151 = vector.shape_cast %148 : vector<2x16xf32> to vector<2x1x16xf32>
    tpu.vector_store %arg13[%c0_52, %c4_53, %c0_54], %151 {strides = array<i32>} : memref<2x8x32xf32, #tpu.memory_space<vmem>>, vector<2x1x16xf32>,
    %152 = vector.extract_strided_slice %139 {offsets = [0, 16], sizes = [2, 16], strides = [1, 1]} : vector<2x32xf32> to vector<2x16xf32>
    %c0_55 = arith.constant 0 : index
    %c3_56 = arith.constant 3 : index
    %c16_57 = arith.constant 16 : index
    %153 = vector.load %arg13[%c0_55, %c3_56, %c16_57] : memref<2x8x32xf32, #tpu.memory_space<vmem>>, vector<2x1x16xf32>
    %154 = vector.shape_cast %153 : vector<2x1x16xf32> to vector<2x16xf32>
    %155 = vector.shape_cast %152 : vector<2x16xf32> to vector<2x1x16xf32>
    tpu.vector_store %arg13[%c0_55, %c3_56, %c16_57], %155 {strides = array<i32>} : memref<2x8x32xf32, #tpu.memory_space<vmem>>, vector<2x1x16xf32>,
    %156 = vector.extract_strided_slice %8 {offsets = [0, 4, 0], sizes = [2, 1, 128], strides = [1, 1, 1]} : vector<2x8x128xf32> to vector<2x1x128xf32>
    %157 = vector.shape_cast %156 : vector<2x1x128xf32> to vector<2x128xf32>
    %158 = arith.truncf %139 : vector<2x32xf32> to vector<2x32xbf16>
    %cst_58 = arith.constant dense<0.000000e+00> : vector<2x128xf32>
    %159 = tpu.matmul %158, %9, %cst_58 {dimension_numbers = #tpu.dot_dimension_numbers<[1], [0], [0], [1], [0, 0, 1, 1], [], []>} : vector<2x32xbf16>, vector<32x128xbf16>, vector<2x128xf32> -> vector<2x128xf32>
    %160 = arith.addf %157, %159 : vector<2x128xf32>
    %161 = arith.negf %160 : vector<2x128xf32>
    %162 = math.exp %161 : vector<2x128xf32>
    %cst_59 = arith.constant 1.000000e+00 : f32
    %163 = vector.broadcast %cst_59 : f32 to vector<2x128xf32>
    %164 = arith.addf %163, %162 : vector<2x128xf32>
    %165 = arith.divf %163, %164 : vector<2x128xf32>
    %166 = vector.extract_strided_slice %165 {offsets = [0, 0], sizes = [2, 32], strides = [1, 1]} : vector<2x128xf32> to vector<2x32xf32>
    %167 = vector.extract_strided_slice %165 {offsets = [0, 32], sizes = [2, 32], strides = [1, 1]} : vector<2x128xf32> to vector<2x32xf32>
    %168 = vector.extract_strided_slice %165 {offsets = [0, 64], sizes = [2, 32], strides = [1, 1]} : vector<2x128xf32> to vector<2x32xf32>
    %169 = vector.extract_strided_slice %160 {offsets = [0, 96], sizes = [2, 32], strides = [1, 1]} : vector<2x128xf32> to vector<2x32xf32>
    %170 = math.tanh %169 : vector<2x32xf32>
    %171 = arith.mulf %167, %137 : vector<2x32xf32>
    %172 = arith.mulf %166, %170 : vector<2x32xf32>
    %173 = arith.addf %171, %172 : vector<2x32xf32>
    %174 = math.tanh %173 : vector<2x32xf32>
    %175 = arith.mulf %168, %174 : vector<2x32xf32>
    %176 = vector.extract_strided_slice %175 {offsets = [0, 0], sizes = [2, 16], strides = [1, 1]} : vector<2x32xf32> to vector<2x16xf32>
    %c0_60 = arith.constant 0 : index
    %c4_61 = arith.constant 4 : index
    %c0_62 = arith.constant 0 : index
    %177 = vector.load %arg12[%c0_60, %c4_61, %c0_62] : memref<2x8x32xf32, #tpu.memory_space<vmem>>, vector<2x1x16xf32>
    %178 = vector.shape_cast %177 : vector<2x1x16xf32> to vector<2x16xf32>
    %179 = vector.shape_cast %176 : vector<2x16xf32> to vector<2x1x16xf32>
    tpu.vector_store %arg12[%c0_60, %c4_61, %c0_62], %179 {strides = array<i32>} : memref<2x8x32xf32, #tpu.memory_space<vmem>>, vector<2x1x16xf32>,
    %180 = vector.extract_strided_slice %175 {offsets = [0, 16], sizes = [2, 16], strides = [1, 1]} : vector<2x32xf32> to vector<2x16xf32>
    %c0_63 = arith.constant 0 : index
    %c3_64 = arith.constant 3 : index
    %c16_65 = arith.constant 16 : index
    %181 = vector.load %arg12[%c0_63, %c3_64, %c16_65] : memref<2x8x32xf32, #tpu.memory_space<vmem>>, vector<2x1x16xf32>
    %182 = vector.shape_cast %181 : vector<2x1x16xf32> to vector<2x16xf32>
    %183 = vector.shape_cast %180 : vector<2x16xf32> to vector<2x1x16xf32>
    tpu.vector_store %arg12[%c0_63, %c3_64, %c16_65], %183 {strides = array<i32>} : memref<2x8x32xf32, #tpu.memory_space<vmem>>, vector<2x1x16xf32>,
    %184 = vector.extract_strided_slice %175 {offsets = [0, 0], sizes = [2, 16], strides = [1, 1]} : vector<2x32xf32> to vector<2x16xf32>
    %c0_66 = arith.constant 0 : index
    %c3_67 = arith.constant 3 : index
    %c0_68 = arith.constant 0 : index
    %185 = vector.load %arg13[%c0_66, %c3_67, %c0_68] : memref<2x8x32xf32, #tpu.memory_space<vmem>>, vector<2x1x16xf32>
    %186 = vector.shape_cast %185 : vector<2x1x16xf32> to vector<2x16xf32>
    %187 = vector.shape_cast %184 : vector<2x16xf32> to vector<2x1x16xf32>
    tpu.vector_store %arg13[%c0_66, %c3_67, %c0_68], %187 {strides = array<i32>} : memref<2x8x32xf32, #tpu.memory_space<vmem>>, vector<2x1x16xf32>,
    %188 = vector.extract_strided_slice %175 {offsets = [0, 16], sizes = [2, 16], strides = [1, 1]} : vector<2x32xf32> to vector<2x16xf32>
    %c0_69 = arith.constant 0 : index
    %c4_70 = arith.constant 4 : index
    %c16_71 = arith.constant 16 : index
    %189 = vector.load %arg13[%c0_69, %c4_70, %c16_71] : memref<2x8x32xf32, #tpu.memory_space<vmem>>, vector<2x1x16xf32>
    %190 = vector.shape_cast %189 : vector<2x1x16xf32> to vector<2x16xf32>
    %191 = vector.shape_cast %188 : vector<2x16xf32> to vector<2x1x16xf32>
    tpu.vector_store %arg13[%c0_69, %c4_70, %c16_71], %191 {strides = array<i32>} : memref<2x8x32xf32, #tpu.memory_space<vmem>>, vector<2x1x16xf32>,
    %192 = vector.extract_strided_slice %8 {offsets = [0, 5, 0], sizes = [2, 1, 128], strides = [1, 1, 1]} : vector<2x8x128xf32> to vector<2x1x128xf32>
    %193 = vector.shape_cast %192 : vector<2x1x128xf32> to vector<2x128xf32>
    %194 = arith.truncf %175 : vector<2x32xf32> to vector<2x32xbf16>
    %cst_72 = arith.constant dense<0.000000e+00> : vector<2x128xf32>
    %195 = tpu.matmul %194, %9, %cst_72 {dimension_numbers = #tpu.dot_dimension_numbers<[1], [0], [0], [1], [0, 0, 1, 1], [], []>} : vector<2x32xbf16>, vector<32x128xbf16>, vector<2x128xf32> -> vector<2x128xf32>
    %196 = arith.addf %193, %195 : vector<2x128xf32>
    %197 = arith.negf %196 : vector<2x128xf32>
    %198 = math.exp %197 : vector<2x128xf32>
    %cst_73 = arith.constant 1.000000e+00 : f32
    %199 = vector.broadcast %cst_73 : f32 to vector<2x128xf32>
    %200 = arith.addf %199, %198 : vector<2x128xf32>
    %201 = arith.divf %199, %200 : vector<2x128xf32>
    %202 = vector.extract_strided_slice %201 {offsets = [0, 0], sizes = [2, 32], strides = [1, 1]} : vector<2x128xf32> to vector<2x32xf32>
    %203 = vector.extract_strided_slice %201 {offsets = [0, 32], sizes = [2, 32], strides = [1, 1]} : vector<2x128xf32> to vector<2x32xf32>
    %204 = vector.extract_strided_slice %201 {offsets = [0, 64], sizes = [2, 32], strides = [1, 1]} : vector<2x128xf32> to vector<2x32xf32>
    %205 = vector.extract_strided_slice %196 {offsets = [0, 96], sizes = [2, 32], strides = [1, 1]} : vector<2x128xf32> to vector<2x32xf32>
    %206 = math.tanh %205 : vector<2x32xf32>
    %207 = arith.mulf %203, %173 : vector<2x32xf32>
    %208 = arith.mulf %202, %206 : vector<2x32xf32>
    %209 = arith.addf %207, %208 : vector<2x32xf32>
    %210 = math.tanh %209 : vector<2x32xf32>
    %211 = arith.mulf %204, %210 : vector<2x32xf32>
    %212 = vector.extract_strided_slice %211 {offsets = [0, 0], sizes = [2, 16], strides = [1, 1]} : vector<2x32xf32> to vector<2x16xf32>
    %c0_74 = arith.constant 0 : index
    %c5_75 = arith.constant 5 : index
    %c0_76 = arith.constant 0 : index
    %213 = vector.load %arg12[%c0_74, %c5_75, %c0_76] : memref<2x8x32xf32, #tpu.memory_space<vmem>>, vector<2x1x16xf32>
    %214 = vector.shape_cast %213 : vector<2x1x16xf32> to vector<2x16xf32>
    %215 = vector.shape_cast %212 : vector<2x16xf32> to vector<2x1x16xf32>
    tpu.vector_store %arg12[%c0_74, %c5_75, %c0_76], %215 {strides = array<i32>} : memref<2x8x32xf32, #tpu.memory_space<vmem>>, vector<2x1x16xf32>,
    %216 = vector.extract_strided_slice %211 {offsets = [0, 16], sizes = [2, 16], strides = [1, 1]} : vector<2x32xf32> to vector<2x16xf32>
    %c0_77 = arith.constant 0 : index
    %c2_78 = arith.constant 2 : index
    %c16_79 = arith.constant 16 : index
    %217 = vector.load %arg12[%c0_77, %c2_78, %c16_79] : memref<2x8x32xf32, #tpu.memory_space<vmem>>, vector<2x1x16xf32>
    %218 = vector.shape_cast %217 : vector<2x1x16xf32> to vector<2x16xf32>
    %219 = vector.shape_cast %216 : vector<2x16xf32> to vector<2x1x16xf32>
    tpu.vector_store %arg12[%c0_77, %c2_78, %c16_79], %219 {strides = array<i32>} : memref<2x8x32xf32, #tpu.memory_space<vmem>>, vector<2x1x16xf32>,
    %220 = vector.extract_strided_slice %211 {offsets = [0, 0], sizes = [2, 16], strides = [1, 1]} : vector<2x32xf32> to vector<2x16xf32>
    %c0_80 = arith.constant 0 : index
    %c2_81 = arith.constant 2 : index
    %c0_82 = arith.constant 0 : index
    %221 = vector.load %arg13[%c0_80, %c2_81, %c0_82] : memref<2x8x32xf32, #tpu.memory_space<vmem>>, vector<2x1x16xf32>
    %222 = vector.shape_cast %221 : vector<2x1x16xf32> to vector<2x16xf32>
    %223 = vector.shape_cast %220 : vector<2x16xf32> to vector<2x1x16xf32>
    tpu.vector_store %arg13[%c0_80, %c2_81, %c0_82], %223 {strides = array<i32>} : memref<2x8x32xf32, #tpu.memory_space<vmem>>, vector<2x1x16xf32>,
    %224 = vector.extract_strided_slice %211 {offsets = [0, 16], sizes = [2, 16], strides = [1, 1]} : vector<2x32xf32> to vector<2x16xf32>
    %c0_83 = arith.constant 0 : index
    %c5_84 = arith.constant 5 : index
    %c16_85 = arith.constant 16 : index
    %225 = vector.load %arg13[%c0_83, %c5_84, %c16_85] : memref<2x8x32xf32, #tpu.memory_space<vmem>>, vector<2x1x16xf32>
    %226 = vector.shape_cast %225 : vector<2x1x16xf32> to vector<2x16xf32>
    %227 = vector.shape_cast %224 : vector<2x16xf32> to vector<2x1x16xf32>
    tpu.vector_store %arg13[%c0_83, %c5_84, %c16_85], %227 {strides = array<i32>} : memref<2x8x32xf32, #tpu.memory_space<vmem>>, vector<2x1x16xf32>,
    %228 = vector.extract_strided_slice %8 {offsets = [0, 6, 0], sizes = [2, 1, 128], strides = [1, 1, 1]} : vector<2x8x128xf32> to vector<2x1x128xf32>
    %229 = vector.shape_cast %228 : vector<2x1x128xf32> to vector<2x128xf32>
    %230 = arith.truncf %211 : vector<2x32xf32> to vector<2x32xbf16>
    %cst_86 = arith.constant dense<0.000000e+00> : vector<2x128xf32>
    %231 = tpu.matmul %230, %9, %cst_86 {dimension_numbers = #tpu.dot_dimension_numbers<[1], [0], [0], [1], [0, 0, 1, 1], [], []>} : vector<2x32xbf16>, vector<32x128xbf16>, vector<2x128xf32> -> vector<2x128xf32>
    %232 = arith.addf %229, %231 : vector<2x128xf32>
    %233 = arith.negf %232 : vector<2x128xf32>
    %234 = math.exp %233 : vector<2x128xf32>
    %cst_87 = arith.constant 1.000000e+00 : f32
    %235 = vector.broadcast %cst_87 : f32 to vector<2x128xf32>
    %236 = arith.addf %235, %234 : vector<2x128xf32>
    %237 = arith.divf %235, %236 : vector<2x128xf32>
    %238 = vector.extract_strided_slice %237 {offsets = [0, 0], sizes = [2, 32], strides = [1, 1]} : vector<2x128xf32> to vector<2x32xf32>
    %239 = vector.extract_strided_slice %237 {offsets = [0, 32], sizes = [2, 32], strides = [1, 1]} : vector<2x128xf32> to vector<2x32xf32>
    %240 = vector.extract_strided_slice %237 {offsets = [0, 64], sizes = [2, 32], strides = [1, 1]} : vector<2x128xf32> to vector<2x32xf32>
    %241 = vector.extract_strided_slice %232 {offsets = [0, 96], sizes = [2, 32], strides = [1, 1]} : vector<2x128xf32> to vector<2x32xf32>
    %242 = math.tanh %241 : vector<2x32xf32>
    %243 = arith.mulf %239, %209 : vector<2x32xf32>
    %244 = arith.mulf %238, %242 : vector<2x32xf32>
    %245 = arith.addf %243, %244 : vector<2x32xf32>
    %246 = math.tanh %245 : vector<2x32xf32>
    %247 = arith.mulf %240, %246 : vector<2x32xf32>
    %248 = vector.extract_strided_slice %247 {offsets = [0, 0], sizes = [2, 16], strides = [1, 1]} : vector<2x32xf32> to vector<2x16xf32>
    %c0_88 = arith.constant 0 : index
    %c6_89 = arith.constant 6 : index
    %c0_90 = arith.constant 0 : index
    %249 = vector.load %arg12[%c0_88, %c6_89, %c0_90] : memref<2x8x32xf32, #tpu.memory_space<vmem>>, vector<2x1x16xf32>
    %250 = vector.shape_cast %249 : vector<2x1x16xf32> to vector<2x16xf32>
    %251 = vector.shape_cast %248 : vector<2x16xf32> to vector<2x1x16xf32>
    tpu.vector_store %arg12[%c0_88, %c6_89, %c0_90], %251 {strides = array<i32>} : memref<2x8x32xf32, #tpu.memory_space<vmem>>, vector<2x1x16xf32>,
    %252 = vector.extract_strided_slice %247 {offsets = [0, 16], sizes = [2, 16], strides = [1, 1]} : vector<2x32xf32> to vector<2x16xf32>
    %c0_91 = arith.constant 0 : index
    %c1_92 = arith.constant 1 : index
    %c16_93 = arith.constant 16 : index
    %253 = vector.load %arg12[%c0_91, %c1_92, %c16_93] : memref<2x8x32xf32, #tpu.memory_space<vmem>>, vector<2x1x16xf32>
    %254 = vector.shape_cast %253 : vector<2x1x16xf32> to vector<2x16xf32>
    %255 = vector.shape_cast %252 : vector<2x16xf32> to vector<2x1x16xf32>
    tpu.vector_store %arg12[%c0_91, %c1_92, %c16_93], %255 {strides = array<i32>} : memref<2x8x32xf32, #tpu.memory_space<vmem>>, vector<2x1x16xf32>,
    %256 = vector.extract_strided_slice %247 {offsets = [0, 0], sizes = [2, 16], strides = [1, 1]} : vector<2x32xf32> to vector<2x16xf32>
    %c0_94 = arith.constant 0 : index
    %c1_95 = arith.constant 1 : index
    %c0_96 = arith.constant 0 : index
    %257 = vector.load %arg13[%c0_94, %c1_95, %c0_96] : memref<2x8x32xf32, #tpu.memory_space<vmem>>, vector<2x1x16xf32>
    %258 = vector.shape_cast %257 : vector<2x1x16xf32> to vector<2x16xf32>
    %259 = vector.shape_cast %256 : vector<2x16xf32> to vector<2x1x16xf32>
    tpu.vector_store %arg13[%c0_94, %c1_95, %c0_96], %259 {strides = array<i32>} : memref<2x8x32xf32, #tpu.memory_space<vmem>>, vector<2x1x16xf32>,
    %260 = vector.extract_strided_slice %247 {offsets = [0, 16], sizes = [2, 16], strides = [1, 1]} : vector<2x32xf32> to vector<2x16xf32>
    %c0_97 = arith.constant 0 : index
    %c6_98 = arith.constant 6 : index
    %c16_99 = arith.constant 16 : index
    %261 = vector.load %arg13[%c0_97, %c6_98, %c16_99] : memref<2x8x32xf32, #tpu.memory_space<vmem>>, vector<2x1x16xf32>
    %262 = vector.shape_cast %261 : vector<2x1x16xf32> to vector<2x16xf32>
    %263 = vector.shape_cast %260 : vector<2x16xf32> to vector<2x1x16xf32>
    tpu.vector_store %arg13[%c0_97, %c6_98, %c16_99], %263 {strides = array<i32>} : memref<2x8x32xf32, #tpu.memory_space<vmem>>, vector<2x1x16xf32>,
    %264 = vector.extract_strided_slice %8 {offsets = [0, 7, 0], sizes = [2, 1, 128], strides = [1, 1, 1]} : vector<2x8x128xf32> to vector<2x1x128xf32>
    %265 = vector.shape_cast %264 : vector<2x1x128xf32> to vector<2x128xf32>
    %266 = arith.truncf %247 : vector<2x32xf32> to vector<2x32xbf16>
    %cst_100 = arith.constant dense<0.000000e+00> : vector<2x128xf32>
    %267 = tpu.matmul %266, %9, %cst_100 {dimension_numbers = #tpu.dot_dimension_numbers<[1], [0], [0], [1], [0, 0, 1, 1], [], []>} : vector<2x32xbf16>, vector<32x128xbf16>, vector<2x128xf32> -> vector<2x128xf32>
    %268 = arith.addf %265, %267 : vector<2x128xf32>
    %269 = arith.negf %268 : vector<2x128xf32>
    %270 = math.exp %269 : vector<2x128xf32>
    %cst_101 = arith.constant 1.000000e+00 : f32
    %271 = vector.broadcast %cst_101 : f32 to vector<2x128xf32>
    %272 = arith.addf %271, %270 : vector<2x128xf32>
    %273 = arith.divf %271, %272 : vector<2x128xf32>
    %274 = vector.extract_strided_slice %273 {offsets = [0, 0], sizes = [2, 32], strides = [1, 1]} : vector<2x128xf32> to vector<2x32xf32>
    %275 = vector.extract_strided_slice %273 {offsets = [0, 32], sizes = [2, 32], strides = [1, 1]} : vector<2x128xf32> to vector<2x32xf32>
    %276 = vector.extract_strided_slice %273 {offsets = [0, 64], sizes = [2, 32], strides = [1, 1]} : vector<2x128xf32> to vector<2x32xf32>
    %277 = vector.extract_strided_slice %268 {offsets = [0, 96], sizes = [2, 32], strides = [1, 1]} : vector<2x128xf32> to vector<2x32xf32>
    %278 = math.tanh %277 : vector<2x32xf32>
    %279 = arith.mulf %275, %245 : vector<2x32xf32>
    %280 = arith.mulf %274, %278 : vector<2x32xf32>
    %281 = arith.addf %279, %280 : vector<2x32xf32>
    %282 = math.tanh %281 : vector<2x32xf32>
    %283 = arith.mulf %276, %282 : vector<2x32xf32>
    %284 = vector.extract_strided_slice %283 {offsets = [0, 0], sizes = [2, 16], strides = [1, 1]} : vector<2x32xf32> to vector<2x16xf32>
    %c0_102 = arith.constant 0 : index
    %c7_103 = arith.constant 7 : index
    %c0_104 = arith.constant 0 : index
    %285 = vector.load %arg12[%c0_102, %c7_103, %c0_104] : memref<2x8x32xf32, #tpu.memory_space<vmem>>, vector<2x1x16xf32>
    %286 = vector.shape_cast %285 : vector<2x1x16xf32> to vector<2x16xf32>
    %287 = vector.shape_cast %284 : vector<2x16xf32> to vector<2x1x16xf32>
    tpu.vector_store %arg12[%c0_102, %c7_103, %c0_104], %287 {strides = array<i32>} : memref<2x8x32xf32, #tpu.memory_space<vmem>>, vector<2x1x16xf32>,
    %288 = vector.extract_strided_slice %283 {offsets = [0, 16], sizes = [2, 16], strides = [1, 1]} : vector<2x32xf32> to vector<2x16xf32>
    %c0_105 = arith.constant 0 : index
    %c0_106 = arith.constant 0 : index
    %c16_107 = arith.constant 16 : index
    %289 = vector.load %arg12[%c0_105, %c0_106, %c16_107] : memref<2x8x32xf32, #tpu.memory_space<vmem>>, vector<2x1x16xf32>
    %290 = vector.shape_cast %289 : vector<2x1x16xf32> to vector<2x16xf32>
    %291 = vector.shape_cast %288 : vector<2x16xf32> to vector<2x1x16xf32>
    tpu.vector_store %arg12[%c0_105, %c0_106, %c16_107], %291 {strides = array<i32>} : memref<2x8x32xf32, #tpu.memory_space<vmem>>, vector<2x1x16xf32>,
    %292 = vector.extract_strided_slice %283 {offsets = [0, 0], sizes = [2, 16], strides = [1, 1]} : vector<2x32xf32> to vector<2x16xf32>
    %c0_108 = arith.constant 0 : index
    %c0_109 = arith.constant 0 : index
    %c0_110 = arith.constant 0 : index
    %293 = vector.load %arg13[%c0_108, %c0_109, %c0_110] : memref<2x8x32xf32, #tpu.memory_space<vmem>>, vector<2x1x16xf32>
    %294 = vector.shape_cast %293 : vector<2x1x16xf32> to vector<2x16xf32>
    %295 = vector.shape_cast %292 : vector<2x16xf32> to vector<2x1x16xf32>
    tpu.vector_store %arg13[%c0_108, %c0_109, %c0_110], %295 {strides = array<i32>} : memref<2x8x32xf32, #tpu.memory_space<vmem>>, vector<2x1x16xf32>,
    %296 = vector.extract_strided_slice %283 {offsets = [0, 16], sizes = [2, 16], strides = [1, 1]} : vector<2x32xf32> to vector<2x16xf32>
    %c0_111 = arith.constant 0 : index
    %c7_112 = arith.constant 7 : index
    %c16_113 = arith.constant 16 : index
    %297 = vector.load %arg13[%c0_111, %c7_112, %c16_113] : memref<2x8x32xf32, #tpu.memory_space<vmem>>, vector<2x1x16xf32>
    %298 = vector.shape_cast %297 : vector<2x1x16xf32> to vector<2x16xf32>
    %299 = vector.shape_cast %296 : vector<2x16xf32> to vector<2x1x16xf32>
    tpu.vector_store %arg13[%c0_111, %c7_112, %c16_113], %299 {strides = array<i32>} : memref<2x8x32xf32, #tpu.memory_space<vmem>>, vector<2x1x16xf32>,
    %c0_114 = arith.constant 0 : index
    %c0_115 = arith.constant 0 : index
    %c0_116 = arith.constant 0 : index
    %300 = vector.load %arg12[%c0_114, %c0_115, %c0_116] : memref<2x8x32xf32, #tpu.memory_space<vmem>>, vector<2x8x32xf32>
    %c0_117 = arith.constant 0 : index
    %c0_118 = arith.constant 0 : index
    %301 = vector.load %arg7[%c0_117, %c0_118] : memref<1x32xf32, #tpu.memory_space<vmem>>, vector<1x32xf32>
    %302 = vector.shape_cast %301 : vector<1x32xf32> to vector<1x1x32xf32>
    %303 = vector.broadcast %302 : vector<1x1x32xf32> to vector<2x8x32xf32>
    %304 = arith.mulf %300, %303 : vector<2x8x32xf32>
    %cst_119 = arith.constant dense<0.000000e+00> : vector<2x8xf32>
    %305 = vector.multi_reduction <add>, %304, %cst_119 [2] : vector<2x8x32xf32> to vector<2x8xf32>
    %cst_120 = arith.constant 0.000000e+00 : f32
    %306 = vector.broadcast %cst_120 : f32 to vector<2x8xf32>
    %307 = arith.maximumf %305, %306 : vector<2x8xf32>
    %cst_121 = arith.constant dense<0xFF800000> : vector<2xf32>
    %308 = vector.multi_reduction <maximumf>, %307, %cst_121 [1] : vector<2x8xf32> to vector<2xf32>
    %309 = vector.shape_cast %308 : vector<2xf32> to vector<2x1xf32>
    %310 = vector.broadcast %309 : vector<2x1xf32> to vector<2x8xf32>
    %311 = arith.subf %307, %310 : vector<2x8xf32>
    %312 = math.exp %311 : vector<2x8xf32>
    %cst_122 = arith.constant dense<0.000000e+00> : vector<2xf32>
    %313 = vector.multi_reduction <add>, %312, %cst_122 [1] : vector<2x8xf32> to vector<2xf32>
    %314 = vector.shape_cast %313 : vector<2xf32> to vector<2x1xf32>
    %315 = vector.broadcast %314 : vector<2x1xf32> to vector<2x8xf32>
    %316 = arith.divf %312, %315 : vector<2x8xf32>
    %317 = vector.shape_cast %316 : vector<2x8xf32> to vector<2x8x1xf32>
    %318 = vector.broadcast %317 : vector<2x8x1xf32> to vector<2x8x32xf32>
    %319 = arith.mulf %300, %318 : vector<2x8x32xf32>
    %cst_123 = arith.constant dense<0.000000e+00> : vector<2x32xf32>
    %320 = vector.multi_reduction <add>, %319, %cst_123 [1] : vector<2x8x32xf32> to vector<2x32xf32>
    %c0_124 = arith.constant 0 : index
    %c0_125 = arith.constant 0 : index
    %c0_126 = arith.constant 0 : index
    %321 = vector.load %arg13[%c0_124, %c0_125, %c0_126] : memref<2x8x32xf32, #tpu.memory_space<vmem>>, vector<2x8x32xf32>
    %322 = tpu.concatenate %300, %321 in 2 : vector<2x8x32xf32>, vector<2x8x32xf32> -> vector<2x8x64xf32>
    %323 = vector.shape_cast %322 : vector<2x8x64xf32> to vector<16x64xf32>
    %324 = arith.truncf %323 : vector<16x64xf32> to vector<16x64xbf16>
    %c0_127 = arith.constant 0 : index
    %c0_128 = arith.constant 0 : index
    %325 = vector.load %arg4[%c0_127, %c0_128] : memref<64x128xbf16, #tpu.memory_space<vmem>>, vector<64x128xbf16>
    %cst_129 = arith.constant dense<0.000000e+00> : vector<16x128xf32>
    %326 = tpu.matmul %324, %325, %cst_129 {dimension_numbers = #tpu.dot_dimension_numbers<[1], [0], [0], [1], [0, 0, 1, 1], [], []>} : vector<16x64xbf16>, vector<64x128xbf16>, vector<16x128xf32> -> vector<16x128xf32>
    %c0_130 = arith.constant 0 : index
    %c0_131 = arith.constant 0 : index
    %327 = vector.load %arg6[%c0_130, %c0_131] : memref<1x128xf32, #tpu.memory_space<vmem>>, vector<1x128xf32>
    %328 = vector.broadcast %327 : vector<1x128xf32> to vector<16x128xf32>
    %329 = arith.addf %326, %328 : vector<16x128xf32>
    %330 = vector.shape_cast %329 : vector<16x128xf32> to vector<2x8x128xf32>
    %c0_132 = arith.constant 0 : index
    %c0_133 = arith.constant 0 : index
    %331 = vector.load %arg5[%c0_132, %c0_133] : memref<32x128xbf16, #tpu.memory_space<vmem>>, vector<32x128xbf16>
    %cst_134 = arith.constant 0.000000e+00 : f32
    %332 = vector.broadcast %cst_134 : f32 to vector<2x32xf32>
    %cst_135 = arith.constant 0.000000e+00 : f32
    %333 = vector.broadcast %cst_135 : f32 to vector<2x32xf32>
    %334 = vector.extract_strided_slice %330 {offsets = [0, 0, 0], sizes = [2, 1, 128], strides = [1, 1, 1]} : vector<2x8x128xf32> to vector<2x1x128xf32>
    %335 = vector.shape_cast %334 : vector<2x1x128xf32> to vector<2x128xf32>
    %336 = arith.truncf %332 : vector<2x32xf32> to vector<2x32xbf16>
    %cst_136 = arith.constant dense<0.000000e+00> : vector<2x128xf32>
    %337 = tpu.matmul %336, %331, %cst_136 {dimension_numbers = #tpu.dot_dimension_numbers<[1], [0], [0], [1], [0, 0, 1, 1], [], []>} : vector<2x32xbf16>, vector<32x128xbf16>, vector<2x128xf32> -> vector<2x128xf32>
    %338 = arith.addf %335, %337 : vector<2x128xf32>
    %339 = arith.negf %338 : vector<2x128xf32>
    %340 = math.exp %339 : vector<2x128xf32>
    %cst_137 = arith.constant 1.000000e+00 : f32
    %341 = vector.broadcast %cst_137 : f32 to vector<2x128xf32>
    %342 = arith.addf %341, %340 : vector<2x128xf32>
    %343 = arith.divf %341, %342 : vector<2x128xf32>
    %344 = vector.extract_strided_slice %343 {offsets = [0, 0], sizes = [2, 32], strides = [1, 1]} : vector<2x128xf32> to vector<2x32xf32>
    %345 = vector.extract_strided_slice %343 {offsets = [0, 32], sizes = [2, 32], strides = [1, 1]} : vector<2x128xf32> to vector<2x32xf32>
    %346 = vector.extract_strided_slice %343 {offsets = [0, 64], sizes = [2, 32], strides = [1, 1]} : vector<2x128xf32> to vector<2x32xf32>
    %347 = vector.extract_strided_slice %338 {offsets = [0, 96], sizes = [2, 32], strides = [1, 1]} : vector<2x128xf32> to vector<2x32xf32>
    %348 = math.tanh %347 : vector<2x32xf32>
    %349 = arith.mulf %345, %333 : vector<2x32xf32>
    %350 = arith.mulf %344, %348 : vector<2x32xf32>
    %351 = arith.addf %349, %350 : vector<2x32xf32>
    %352 = math.tanh %351 : vector<2x32xf32>
    %353 = arith.mulf %346, %352 : vector<2x32xf32>
    %354 = vector.extract_strided_slice %353 {offsets = [0, 0], sizes = [2, 16], strides = [1, 1]} : vector<2x32xf32> to vector<2x16xf32>
    %c0_138 = arith.constant 0 : index
    %c0_139 = arith.constant 0 : index
    %c0_140 = arith.constant 0 : index
    %355 = vector.load %arg14[%c0_138, %c0_139, %c0_140] : memref<2x8x32xf32, #tpu.memory_space<vmem>>, vector<2x1x16xf32>
    %356 = vector.shape_cast %355 : vector<2x1x16xf32> to vector<2x16xf32>
    %357 = vector.shape_cast %354 : vector<2x16xf32> to vector<2x1x16xf32>
    tpu.vector_store %arg14[%c0_138, %c0_139, %c0_140], %357 {strides = array<i32>} : memref<2x8x32xf32, #tpu.memory_space<vmem>>, vector<2x1x16xf32>,
    %358 = vector.extract_strided_slice %353 {offsets = [0, 16], sizes = [2, 16], strides = [1, 1]} : vector<2x32xf32> to vector<2x16xf32>
    %c0_141 = arith.constant 0 : index
    %c7_142 = arith.constant 7 : index
    %c16_143 = arith.constant 16 : index
    %359 = vector.load %arg14[%c0_141, %c7_142, %c16_143] : memref<2x8x32xf32, #tpu.memory_space<vmem>>, vector<2x1x16xf32>
    %360 = vector.shape_cast %359 : vector<2x1x16xf32> to vector<2x16xf32>
    %361 = vector.shape_cast %358 : vector<2x16xf32> to vector<2x1x16xf32>
    tpu.vector_store %arg14[%c0_141, %c7_142, %c16_143], %361 {strides = array<i32>} : memref<2x8x32xf32, #tpu.memory_space<vmem>>, vector<2x1x16xf32>,
    %362 = vector.extract_strided_slice %330 {offsets = [0, 1, 0], sizes = [2, 1, 128], strides = [1, 1, 1]} : vector<2x8x128xf32> to vector<2x1x128xf32>
    %363 = vector.shape_cast %362 : vector<2x1x128xf32> to vector<2x128xf32>
    %364 = arith.truncf %353 : vector<2x32xf32> to vector<2x32xbf16>
    %cst_144 = arith.constant dense<0.000000e+00> : vector<2x128xf32>
    %365 = tpu.matmul %364, %331, %cst_144 {dimension_numbers = #tpu.dot_dimension_numbers<[1], [0], [0], [1], [0, 0, 1, 1], [], []>} : vector<2x32xbf16>, vector<32x128xbf16>, vector<2x128xf32> -> vector<2x128xf32>
    %366 = arith.addf %363, %365 : vector<2x128xf32>
    %367 = arith.negf %366 : vector<2x128xf32>
    %368 = math.exp %367 : vector<2x128xf32>
    %cst_145 = arith.constant 1.000000e+00 : f32
    %369 = vector.broadcast %cst_145 : f32 to vector<2x128xf32>
    %370 = arith.addf %369, %368 : vector<2x128xf32>
    %371 = arith.divf %369, %370 : vector<2x128xf32>
    %372 = vector.extract_strided_slice %371 {offsets = [0, 0], sizes = [2, 32], strides = [1, 1]} : vector<2x128xf32> to vector<2x32xf32>
    %373 = vector.extract_strided_slice %371 {offsets = [0, 32], sizes = [2, 32], strides = [1, 1]} : vector<2x128xf32> to vector<2x32xf32>
    %374 = vector.extract_strided_slice %371 {offsets = [0, 64], sizes = [2, 32], strides = [1, 1]} : vector<2x128xf32> to vector<2x32xf32>
    %375 = vector.extract_strided_slice %366 {offsets = [0, 96], sizes = [2, 32], strides = [1, 1]} : vector<2x128xf32> to vector<2x32xf32>
    %376 = math.tanh %375 : vector<2x32xf32>
    %377 = arith.mulf %373, %351 : vector<2x32xf32>
    %378 = arith.mulf %372, %376 : vector<2x32xf32>
    %379 = arith.addf %377, %378 : vector<2x32xf32>
    %380 = math.tanh %379 : vector<2x32xf32>
    %381 = arith.mulf %374, %380 : vector<2x32xf32>
    %382 = vector.extract_strided_slice %381 {offsets = [0, 0], sizes = [2, 16], strides = [1, 1]} : vector<2x32xf32> to vector<2x16xf32>
    %c0_146 = arith.constant 0 : index
    %c1_147 = arith.constant 1 : index
    %c0_148 = arith.constant 0 : index
    %383 = vector.load %arg14[%c0_146, %c1_147, %c0_148] : memref<2x8x32xf32, #tpu.memory_space<vmem>>, vector<2x1x16xf32>
    %384 = vector.shape_cast %383 : vector<2x1x16xf32> to vector<2x16xf32>
    %385 = vector.shape_cast %382 : vector<2x16xf32> to vector<2x1x16xf32>
    tpu.vector_store %arg14[%c0_146, %c1_147, %c0_148], %385 {strides = array<i32>} : memref<2x8x32xf32, #tpu.memory_space<vmem>>, vector<2x1x16xf32>,
    %386 = vector.extract_strided_slice %381 {offsets = [0, 16], sizes = [2, 16], strides = [1, 1]} : vector<2x32xf32> to vector<2x16xf32>
    %c0_149 = arith.constant 0 : index
    %c6_150 = arith.constant 6 : index
    %c16_151 = arith.constant 16 : index
    %387 = vector.load %arg14[%c0_149, %c6_150, %c16_151] : memref<2x8x32xf32, #tpu.memory_space<vmem>>, vector<2x1x16xf32>
    %388 = vector.shape_cast %387 : vector<2x1x16xf32> to vector<2x16xf32>
    %389 = vector.shape_cast %386 : vector<2x16xf32> to vector<2x1x16xf32>
    tpu.vector_store %arg14[%c0_149, %c6_150, %c16_151], %389 {strides = array<i32>} : memref<2x8x32xf32, #tpu.memory_space<vmem>>, vector<2x1x16xf32>,
    %390 = vector.extract_strided_slice %330 {offsets = [0, 2, 0], sizes = [2, 1, 128], strides = [1, 1, 1]} : vector<2x8x128xf32> to vector<2x1x128xf32>
    %391 = vector.shape_cast %390 : vector<2x1x128xf32> to vector<2x128xf32>
    %392 = arith.truncf %381 : vector<2x32xf32> to vector<2x32xbf16>
    %cst_152 = arith.constant dense<0.000000e+00> : vector<2x128xf32>
    %393 = tpu.matmul %392, %331, %cst_152 {dimension_numbers = #tpu.dot_dimension_numbers<[1], [0], [0], [1], [0, 0, 1, 1], [], []>} : vector<2x32xbf16>, vector<32x128xbf16>, vector<2x128xf32> -> vector<2x128xf32>
    %394 = arith.addf %391, %393 : vector<2x128xf32>
    %395 = arith.negf %394 : vector<2x128xf32>
    %396 = math.exp %395 : vector<2x128xf32>
    %cst_153 = arith.constant 1.000000e+00 : f32
    %397 = vector.broadcast %cst_153 : f32 to vector<2x128xf32>
    %398 = arith.addf %397, %396 : vector<2x128xf32>
    %399 = arith.divf %397, %398 : vector<2x128xf32>
    %400 = vector.extract_strided_slice %399 {offsets = [0, 0], sizes = [2, 32], strides = [1, 1]} : vector<2x128xf32> to vector<2x32xf32>
    %401 = vector.extract_strided_slice %399 {offsets = [0, 32], sizes = [2, 32], strides = [1, 1]} : vector<2x128xf32> to vector<2x32xf32>
    %402 = vector.extract_strided_slice %399 {offsets = [0, 64], sizes = [2, 32], strides = [1, 1]} : vector<2x128xf32> to vector<2x32xf32>
    %403 = vector.extract_strided_slice %394 {offsets = [0, 96], sizes = [2, 32], strides = [1, 1]} : vector<2x128xf32> to vector<2x32xf32>
    %404 = math.tanh %403 : vector<2x32xf32>
    %405 = arith.mulf %401, %379 : vector<2x32xf32>
    %406 = arith.mulf %400, %404 : vector<2x32xf32>
    %407 = arith.addf %405, %406 : vector<2x32xf32>
    %408 = math.tanh %407 : vector<2x32xf32>
    %409 = arith.mulf %402, %408 : vector<2x32xf32>
    %410 = vector.extract_strided_slice %409 {offsets = [0, 0], sizes = [2, 16], strides = [1, 1]} : vector<2x32xf32> to vector<2x16xf32>
    %c0_154 = arith.constant 0 : index
    %c2_155 = arith.constant 2 : index
    %c0_156 = arith.constant 0 : index
    %411 = vector.load %arg14[%c0_154, %c2_155, %c0_156] : memref<2x8x32xf32, #tpu.memory_space<vmem>>, vector<2x1x16xf32>
    %412 = vector.shape_cast %411 : vector<2x1x16xf32> to vector<2x16xf32>
    %413 = vector.shape_cast %410 : vector<2x16xf32> to vector<2x1x16xf32>
    tpu.vector_store %arg14[%c0_154, %c2_155, %c0_156], %413 {strides = array<i32>} : memref<2x8x32xf32, #tpu.memory_space<vmem>>, vector<2x1x16xf32>,
    %414 = vector.extract_strided_slice %409 {offsets = [0, 16], sizes = [2, 16], strides = [1, 1]} : vector<2x32xf32> to vector<2x16xf32>
    %c0_157 = arith.constant 0 : index
    %c5_158 = arith.constant 5 : index
    %c16_159 = arith.constant 16 : index
    %415 = vector.load %arg14[%c0_157, %c5_158, %c16_159] : memref<2x8x32xf32, #tpu.memory_space<vmem>>, vector<2x1x16xf32>
    %416 = vector.shape_cast %415 : vector<2x1x16xf32> to vector<2x16xf32>
    %417 = vector.shape_cast %414 : vector<2x16xf32> to vector<2x1x16xf32>
    tpu.vector_store %arg14[%c0_157, %c5_158, %c16_159], %417 {strides = array<i32>} : memref<2x8x32xf32, #tpu.memory_space<vmem>>, vector<2x1x16xf32>,
    %418 = vector.extract_strided_slice %330 {offsets = [0, 3, 0], sizes = [2, 1, 128], strides = [1, 1, 1]} : vector<2x8x128xf32> to vector<2x1x128xf32>
    %419 = vector.shape_cast %418 : vector<2x1x128xf32> to vector<2x128xf32>
    %420 = arith.truncf %409 : vector<2x32xf32> to vector<2x32xbf16>
    %cst_160 = arith.constant dense<0.000000e+00> : vector<2x128xf32>
    %421 = tpu.matmul %420, %331, %cst_160 {dimension_numbers = #tpu.dot_dimension_numbers<[1], [0], [0], [1], [0, 0, 1, 1], [], []>} : vector<2x32xbf16>, vector<32x128xbf16>, vector<2x128xf32> -> vector<2x128xf32>
    %422 = arith.addf %419, %421 : vector<2x128xf32>
    %423 = arith.negf %422 : vector<2x128xf32>
    %424 = math.exp %423 : vector<2x128xf32>
    %cst_161 = arith.constant 1.000000e+00 : f32
    %425 = vector.broadcast %cst_161 : f32 to vector<2x128xf32>
    %426 = arith.addf %425, %424 : vector<2x128xf32>
    %427 = arith.divf %425, %426 : vector<2x128xf32>
    %428 = vector.extract_strided_slice %427 {offsets = [0, 0], sizes = [2, 32], strides = [1, 1]} : vector<2x128xf32> to vector<2x32xf32>
    %429 = vector.extract_strided_slice %427 {offsets = [0, 32], sizes = [2, 32], strides = [1, 1]} : vector<2x128xf32> to vector<2x32xf32>
    %430 = vector.extract_strided_slice %427 {offsets = [0, 64], sizes = [2, 32], strides = [1, 1]} : vector<2x128xf32> to vector<2x32xf32>
    %431 = vector.extract_strided_slice %422 {offsets = [0, 96], sizes = [2, 32], strides = [1, 1]} : vector<2x128xf32> to vector<2x32xf32>
    %432 = math.tanh %431 : vector<2x32xf32>
    %433 = arith.mulf %429, %407 : vector<2x32xf32>
    %434 = arith.mulf %428, %432 : vector<2x32xf32>
    %435 = arith.addf %433, %434 : vector<2x32xf32>
    %436 = math.tanh %435 : vector<2x32xf32>
    %437 = arith.mulf %430, %436 : vector<2x32xf32>
    %438 = vector.extract_strided_slice %437 {offsets = [0, 0], sizes = [2, 16], strides = [1, 1]} : vector<2x32xf32> to vector<2x16xf32>
    %c0_162 = arith.constant 0 : index
    %c3_163 = arith.constant 3 : index
    %c0_164 = arith.constant 0 : index
    %439 = vector.load %arg14[%c0_162, %c3_163, %c0_164] : memref<2x8x32xf32, #tpu.memory_space<vmem>>, vector<2x1x16xf32>
    %440 = vector.shape_cast %439 : vector<2x1x16xf32> to vector<2x16xf32>
    %441 = vector.shape_cast %438 : vector<2x16xf32> to vector<2x1x16xf32>
    tpu.vector_store %arg14[%c0_162, %c3_163, %c0_164], %441 {strides = array<i32>} : memref<2x8x32xf32, #tpu.memory_space<vmem>>, vector<2x1x16xf32>,
    %442 = vector.extract_strided_slice %437 {offsets = [0, 16], sizes = [2, 16], strides = [1, 1]} : vector<2x32xf32> to vector<2x16xf32>
    %c0_165 = arith.constant 0 : index
    %c4_166 = arith.constant 4 : index
    %c16_167 = arith.constant 16 : index
    %443 = vector.load %arg14[%c0_165, %c4_166, %c16_167] : memref<2x8x32xf32, #tpu.memory_space<vmem>>, vector<2x1x16xf32>
    %444 = vector.shape_cast %443 : vector<2x1x16xf32> to vector<2x16xf32>
    %445 = vector.shape_cast %442 : vector<2x16xf32> to vector<2x1x16xf32>
    tpu.vector_store %arg14[%c0_165, %c4_166, %c16_167], %445 {strides = array<i32>} : memref<2x8x32xf32, #tpu.memory_space<vmem>>, vector<2x1x16xf32>,
    %446 = vector.extract_strided_slice %330 {offsets = [0, 4, 0], sizes = [2, 1, 128], strides = [1, 1, 1]} : vector<2x8x128xf32> to vector<2x1x128xf32>
    %447 = vector.shape_cast %446 : vector<2x1x128xf32> to vector<2x128xf32>
    %448 = arith.truncf %437 : vector<2x32xf32> to vector<2x32xbf16>
    %cst_168 = arith.constant dense<0.000000e+00> : vector<2x128xf32>
    %449 = tpu.matmul %448, %331, %cst_168 {dimension_numbers = #tpu.dot_dimension_numbers<[1], [0], [0], [1], [0, 0, 1, 1], [], []>} : vector<2x32xbf16>, vector<32x128xbf16>, vector<2x128xf32> -> vector<2x128xf32>
    %450 = arith.addf %447, %449 : vector<2x128xf32>
    %451 = arith.negf %450 : vector<2x128xf32>
    %452 = math.exp %451 : vector<2x128xf32>
    %cst_169 = arith.constant 1.000000e+00 : f32
    %453 = vector.broadcast %cst_169 : f32 to vector<2x128xf32>
    %454 = arith.addf %453, %452 : vector<2x128xf32>
    %455 = arith.divf %453, %454 : vector<2x128xf32>
    %456 = vector.extract_strided_slice %455 {offsets = [0, 0], sizes = [2, 32], strides = [1, 1]} : vector<2x128xf32> to vector<2x32xf32>
    %457 = vector.extract_strided_slice %455 {offsets = [0, 32], sizes = [2, 32], strides = [1, 1]} : vector<2x128xf32> to vector<2x32xf32>
    %458 = vector.extract_strided_slice %455 {offsets = [0, 64], sizes = [2, 32], strides = [1, 1]} : vector<2x128xf32> to vector<2x32xf32>
    %459 = vector.extract_strided_slice %450 {offsets = [0, 96], sizes = [2, 32], strides = [1, 1]} : vector<2x128xf32> to vector<2x32xf32>
    %460 = math.tanh %459 : vector<2x32xf32>
    %461 = arith.mulf %457, %435 : vector<2x32xf32>
    %462 = arith.mulf %456, %460 : vector<2x32xf32>
    %463 = arith.addf %461, %462 : vector<2x32xf32>
    %464 = math.tanh %463 : vector<2x32xf32>
    %465 = arith.mulf %458, %464 : vector<2x32xf32>
    %466 = vector.extract_strided_slice %465 {offsets = [0, 0], sizes = [2, 16], strides = [1, 1]} : vector<2x32xf32> to vector<2x16xf32>
    %c0_170 = arith.constant 0 : index
    %c4_171 = arith.constant 4 : index
    %c0_172 = arith.constant 0 : index
    %467 = vector.load %arg14[%c0_170, %c4_171, %c0_172] : memref<2x8x32xf32, #tpu.memory_space<vmem>>, vector<2x1x16xf32>
    %468 = vector.shape_cast %467 : vector<2x1x16xf32> to vector<2x16xf32>
    %469 = vector.shape_cast %466 : vector<2x16xf32> to vector<2x1x16xf32>
    tpu.vector_store %arg14[%c0_170, %c4_171, %c0_172], %469 {strides = array<i32>} : memref<2x8x32xf32, #tpu.memory_space<vmem>>, vector<2x1x16xf32>,
    %470 = vector.extract_strided_slice %465 {offsets = [0, 16], sizes = [2, 16], strides = [1, 1]} : vector<2x32xf32> to vector<2x16xf32>
    %c0_173 = arith.constant 0 : index
    %c3_174 = arith.constant 3 : index
    %c16_175 = arith.constant 16 : index
    %471 = vector.load %arg14[%c0_173, %c3_174, %c16_175] : memref<2x8x32xf32, #tpu.memory_space<vmem>>, vector<2x1x16xf32>
    %472 = vector.shape_cast %471 : vector<2x1x16xf32> to vector<2x16xf32>
    %473 = vector.shape_cast %470 : vector<2x16xf32> to vector<2x1x16xf32>
    tpu.vector_store %arg14[%c0_173, %c3_174, %c16_175], %473 {strides = array<i32>} : memref<2x8x32xf32, #tpu.memory_space<vmem>>, vector<2x1x16xf32>,
    %474 = vector.extract_strided_slice %330 {offsets = [0, 5, 0], sizes = [2, 1, 128], strides = [1, 1, 1]} : vector<2x8x128xf32> to vector<2x1x128xf32>
    %475 = vector.shape_cast %474 : vector<2x1x128xf32> to vector<2x128xf32>
    %476 = arith.truncf %465 : vector<2x32xf32> to vector<2x32xbf16>
    %cst_176 = arith.constant dense<0.000000e+00> : vector<2x128xf32>
    %477 = tpu.matmul %476, %331, %cst_176 {dimension_numbers = #tpu.dot_dimension_numbers<[1], [0], [0], [1], [0, 0, 1, 1], [], []>} : vector<2x32xbf16>, vector<32x128xbf16>, vector<2x128xf32> -> vector<2x128xf32>
    %478 = arith.addf %475, %477 : vector<2x128xf32>
    %479 = arith.negf %478 : vector<2x128xf32>
    %480 = math.exp %479 : vector<2x128xf32>
    %cst_177 = arith.constant 1.000000e+00 : f32
    %481 = vector.broadcast %cst_177 : f32 to vector<2x128xf32>
    %482 = arith.addf %481, %480 : vector<2x128xf32>
    %483 = arith.divf %481, %482 : vector<2x128xf32>
    %484 = vector.extract_strided_slice %483 {offsets = [0, 0], sizes = [2, 32], strides = [1, 1]} : vector<2x128xf32> to vector<2x32xf32>
    %485 = vector.extract_strided_slice %483 {offsets = [0, 32], sizes = [2, 32], strides = [1, 1]} : vector<2x128xf32> to vector<2x32xf32>
    %486 = vector.extract_strided_slice %483 {offsets = [0, 64], sizes = [2, 32], strides = [1, 1]} : vector<2x128xf32> to vector<2x32xf32>
    %487 = vector.extract_strided_slice %478 {offsets = [0, 96], sizes = [2, 32], strides = [1, 1]} : vector<2x128xf32> to vector<2x32xf32>
    %488 = math.tanh %487 : vector<2x32xf32>
    %489 = arith.mulf %485, %463 : vector<2x32xf32>
    %490 = arith.mulf %484, %488 : vector<2x32xf32>
    %491 = arith.addf %489, %490 : vector<2x32xf32>
    %492 = math.tanh %491 : vector<2x32xf32>
    %493 = arith.mulf %486, %492 : vector<2x32xf32>
    %494 = vector.extract_strided_slice %493 {offsets = [0, 0], sizes = [2, 16], strides = [1, 1]} : vector<2x32xf32> to vector<2x16xf32>
    %c0_178 = arith.constant 0 : index
    %c5_179 = arith.constant 5 : index
    %c0_180 = arith.constant 0 : index
    %495 = vector.load %arg14[%c0_178, %c5_179, %c0_180] : memref<2x8x32xf32, #tpu.memory_space<vmem>>, vector<2x1x16xf32>
    %496 = vector.shape_cast %495 : vector<2x1x16xf32> to vector<2x16xf32>
    %497 = vector.shape_cast %494 : vector<2x16xf32> to vector<2x1x16xf32>
    tpu.vector_store %arg14[%c0_178, %c5_179, %c0_180], %497 {strides = array<i32>} : memref<2x8x32xf32, #tpu.memory_space<vmem>>, vector<2x1x16xf32>,
    %498 = vector.extract_strided_slice %493 {offsets = [0, 16], sizes = [2, 16], strides = [1, 1]} : vector<2x32xf32> to vector<2x16xf32>
    %c0_181 = arith.constant 0 : index
    %c2_182 = arith.constant 2 : index
    %c16_183 = arith.constant 16 : index
    %499 = vector.load %arg14[%c0_181, %c2_182, %c16_183] : memref<2x8x32xf32, #tpu.memory_space<vmem>>, vector<2x1x16xf32>
    %500 = vector.shape_cast %499 : vector<2x1x16xf32> to vector<2x16xf32>
    %501 = vector.shape_cast %498 : vector<2x16xf32> to vector<2x1x16xf32>
    tpu.vector_store %arg14[%c0_181, %c2_182, %c16_183], %501 {strides = array<i32>} : memref<2x8x32xf32, #tpu.memory_space<vmem>>, vector<2x1x16xf32>,
    %502 = vector.extract_strided_slice %330 {offsets = [0, 6, 0], sizes = [2, 1, 128], strides = [1, 1, 1]} : vector<2x8x128xf32> to vector<2x1x128xf32>
    %503 = vector.shape_cast %502 : vector<2x1x128xf32> to vector<2x128xf32>
    %504 = arith.truncf %493 : vector<2x32xf32> to vector<2x32xbf16>
    %cst_184 = arith.constant dense<0.000000e+00> : vector<2x128xf32>
    %505 = tpu.matmul %504, %331, %cst_184 {dimension_numbers = #tpu.dot_dimension_numbers<[1], [0], [0], [1], [0, 0, 1, 1], [], []>} : vector<2x32xbf16>, vector<32x128xbf16>, vector<2x128xf32> -> vector<2x128xf32>
    %506 = arith.addf %503, %505 : vector<2x128xf32>
    %507 = arith.negf %506 : vector<2x128xf32>
    %508 = math.exp %507 : vector<2x128xf32>
    %cst_185 = arith.constant 1.000000e+00 : f32
    %509 = vector.broadcast %cst_185 : f32 to vector<2x128xf32>
    %510 = arith.addf %509, %508 : vector<2x128xf32>
    %511 = arith.divf %509, %510 : vector<2x128xf32>
    %512 = vector.extract_strided_slice %511 {offsets = [0, 0], sizes = [2, 32], strides = [1, 1]} : vector<2x128xf32> to vector<2x32xf32>
    %513 = vector.extract_strided_slice %511 {offsets = [0, 32], sizes = [2, 32], strides = [1, 1]} : vector<2x128xf32> to vector<2x32xf32>
    %514 = vector.extract_strided_slice %511 {offsets = [0, 64], sizes = [2, 32], strides = [1, 1]} : vector<2x128xf32> to vector<2x32xf32>
    %515 = vector.extract_strided_slice %506 {offsets = [0, 96], sizes = [2, 32], strides = [1, 1]} : vector<2x128xf32> to vector<2x32xf32>
    %516 = math.tanh %515 : vector<2x32xf32>
    %517 = arith.mulf %513, %491 : vector<2x32xf32>
    %518 = arith.mulf %512, %516 : vector<2x32xf32>
    %519 = arith.addf %517, %518 : vector<2x32xf32>
    %520 = math.tanh %519 : vector<2x32xf32>
    %521 = arith.mulf %514, %520 : vector<2x32xf32>
    %522 = vector.extract_strided_slice %521 {offsets = [0, 0], sizes = [2, 16], strides = [1, 1]} : vector<2x32xf32> to vector<2x16xf32>
    %c0_186 = arith.constant 0 : index
    %c6_187 = arith.constant 6 : index
    %c0_188 = arith.constant 0 : index
    %523 = vector.load %arg14[%c0_186, %c6_187, %c0_188] : memref<2x8x32xf32, #tpu.memory_space<vmem>>, vector<2x1x16xf32>
    %524 = vector.shape_cast %523 : vector<2x1x16xf32> to vector<2x16xf32>
    %525 = vector.shape_cast %522 : vector<2x16xf32> to vector<2x1x16xf32>
    tpu.vector_store %arg14[%c0_186, %c6_187, %c0_188], %525 {strides = array<i32>} : memref<2x8x32xf32, #tpu.memory_space<vmem>>, vector<2x1x16xf32>,
    %526 = vector.extract_strided_slice %521 {offsets = [0, 16], sizes = [2, 16], strides = [1, 1]} : vector<2x32xf32> to vector<2x16xf32>
    %c0_189 = arith.constant 0 : index
    %c1_190 = arith.constant 1 : index
    %c16_191 = arith.constant 16 : index
    %527 = vector.load %arg14[%c0_189, %c1_190, %c16_191] : memref<2x8x32xf32, #tpu.memory_space<vmem>>, vector<2x1x16xf32>
    %528 = vector.shape_cast %527 : vector<2x1x16xf32> to vector<2x16xf32>
    %529 = vector.shape_cast %526 : vector<2x16xf32> to vector<2x1x16xf32>
    tpu.vector_store %arg14[%c0_189, %c1_190, %c16_191], %529 {strides = array<i32>} : memref<2x8x32xf32, #tpu.memory_space<vmem>>, vector<2x1x16xf32>,
    %530 = vector.extract_strided_slice %330 {offsets = [0, 7, 0], sizes = [2, 1, 128], strides = [1, 1, 1]} : vector<2x8x128xf32> to vector<2x1x128xf32>
    %531 = vector.shape_cast %530 : vector<2x1x128xf32> to vector<2x128xf32>
    %532 = arith.truncf %521 : vector<2x32xf32> to vector<2x32xbf16>
    %cst_192 = arith.constant dense<0.000000e+00> : vector<2x128xf32>
    %533 = tpu.matmul %532, %331, %cst_192 {dimension_numbers = #tpu.dot_dimension_numbers<[1], [0], [0], [1], [0, 0, 1, 1], [], []>} : vector<2x32xbf16>, vector<32x128xbf16>, vector<2x128xf32> -> vector<2x128xf32>
    %534 = arith.addf %531, %533 : vector<2x128xf32>
    %535 = arith.negf %534 : vector<2x128xf32>
    %536 = math.exp %535 : vector<2x128xf32>
    %cst_193 = arith.constant 1.000000e+00 : f32
    %537 = vector.broadcast %cst_193 : f32 to vector<2x128xf32>
    %538 = arith.addf %537, %536 : vector<2x128xf32>
    %539 = arith.divf %537, %538 : vector<2x128xf32>
    %540 = vector.extract_strided_slice %539 {offsets = [0, 0], sizes = [2, 32], strides = [1, 1]} : vector<2x128xf32> to vector<2x32xf32>
    %541 = vector.extract_strided_slice %539 {offsets = [0, 32], sizes = [2, 32], strides = [1, 1]} : vector<2x128xf32> to vector<2x32xf32>
    %542 = vector.extract_strided_slice %539 {offsets = [0, 64], sizes = [2, 32], strides = [1, 1]} : vector<2x128xf32> to vector<2x32xf32>
    %543 = vector.extract_strided_slice %534 {offsets = [0, 96], sizes = [2, 32], strides = [1, 1]} : vector<2x128xf32> to vector<2x32xf32>
    %544 = math.tanh %543 : vector<2x32xf32>
    %545 = arith.mulf %541, %519 : vector<2x32xf32>
    %546 = arith.mulf %540, %544 : vector<2x32xf32>
    %547 = arith.addf %545, %546 : vector<2x32xf32>
    %548 = math.tanh %547 : vector<2x32xf32>
    %549 = arith.mulf %542, %548 : vector<2x32xf32>
    %550 = vector.extract_strided_slice %549 {offsets = [0, 0], sizes = [2, 16], strides = [1, 1]} : vector<2x32xf32> to vector<2x16xf32>
    %c0_194 = arith.constant 0 : index
    %c7_195 = arith.constant 7 : index
    %c0_196 = arith.constant 0 : index
    %551 = vector.load %arg14[%c0_194, %c7_195, %c0_196] : memref<2x8x32xf32, #tpu.memory_space<vmem>>, vector<2x1x16xf32>
    %552 = vector.shape_cast %551 : vector<2x1x16xf32> to vector<2x16xf32>
    %553 = vector.shape_cast %550 : vector<2x16xf32> to vector<2x1x16xf32>
    tpu.vector_store %arg14[%c0_194, %c7_195, %c0_196], %553 {strides = array<i32>} : memref<2x8x32xf32, #tpu.memory_space<vmem>>, vector<2x1x16xf32>,
    %554 = vector.extract_strided_slice %549 {offsets = [0, 16], sizes = [2, 16], strides = [1, 1]} : vector<2x32xf32> to vector<2x16xf32>
    %c0_197 = arith.constant 0 : index
    %c0_198 = arith.constant 0 : index
    %c16_199 = arith.constant 16 : index
    %555 = vector.load %arg14[%c0_197, %c0_198, %c16_199] : memref<2x8x32xf32, #tpu.memory_space<vmem>>, vector<2x1x16xf32>
    %556 = vector.shape_cast %555 : vector<2x1x16xf32> to vector<2x16xf32>
    %557 = vector.shape_cast %554 : vector<2x16xf32> to vector<2x1x16xf32>
    tpu.vector_store %arg14[%c0_197, %c0_198, %c16_199], %557 {strides = array<i32>} : memref<2x8x32xf32, #tpu.memory_space<vmem>>, vector<2x1x16xf32>,
    %c0_200 = arith.constant 0 : index
    %c0_201 = arith.constant 0 : index
    %c0_202 = arith.constant 0 : index
    %558 = vector.load %arg14[%c0_200, %c0_201, %c0_202] : memref<2x8x32xf32, #tpu.memory_space<vmem>>, vector<2x8x32xf32>
    %c0_203 = arith.constant 0 : index
    %c0_204 = arith.constant 0 : index
    %559 = vector.load %arg8[%c0_203, %c0_204] : memref<1x32xf32, #tpu.memory_space<vmem>>, vector<1x32xf32>
    %560 = vector.shape_cast %559 : vector<1x32xf32> to vector<1x1x32xf32>
    %561 = vector.broadcast %560 : vector<1x1x32xf32> to vector<2x8x32xf32>
    %562 = arith.mulf %558, %561 : vector<2x8x32xf32>
    %cst_205 = arith.constant dense<0.000000e+00> : vector<2x8xf32>
    %563 = vector.multi_reduction <add>, %562, %cst_205 [2] : vector<2x8x32xf32> to vector<2x8xf32>
    %cst_206 = arith.constant 0.000000e+00 : f32
    %564 = vector.broadcast %cst_206 : f32 to vector<2x8xf32>
    %565 = arith.maximumf %563, %564 : vector<2x8xf32>
    %cst_207 = arith.constant dense<0xFF800000> : vector<2xf32>
    %566 = vector.multi_reduction <maximumf>, %565, %cst_207 [1] : vector<2x8xf32> to vector<2xf32>
    %567 = vector.shape_cast %566 : vector<2xf32> to vector<2x1xf32>
    %568 = vector.broadcast %567 : vector<2x1xf32> to vector<2x8xf32>
    %569 = arith.subf %565, %568 : vector<2x8xf32>
    %570 = math.exp %569 : vector<2x8xf32>
    %cst_208 = arith.constant dense<0.000000e+00> : vector<2xf32>
    %571 = vector.multi_reduction <add>, %570, %cst_208 [1] : vector<2x8xf32> to vector<2xf32>
    %572 = vector.shape_cast %571 : vector<2xf32> to vector<2x1xf32>
    %573 = vector.broadcast %572 : vector<2x1xf32> to vector<2x8xf32>
    %574 = arith.divf %570, %573 : vector<2x8xf32>
    %575 = vector.shape_cast %574 : vector<2x8xf32> to vector<2x8x1xf32>
    %576 = vector.broadcast %575 : vector<2x8x1xf32> to vector<2x8x32xf32>
    %577 = arith.mulf %558, %576 : vector<2x8x32xf32>
    %cst_209 = arith.constant dense<0.000000e+00> : vector<2x32xf32>
    %578 = vector.multi_reduction <add>, %577, %cst_209 [1] : vector<2x8x32xf32> to vector<2x32xf32>
    %579 = tpu.concatenate %320, %578 in 1 : vector<2x32xf32>, vector<2x32xf32> -> vector<2x64xf32>
    %580 = arith.truncf %579 : vector<2x64xf32> to vector<2x64xbf16>
    %c0_210 = arith.constant 0 : index
    %c0_211 = arith.constant 0 : index
    %581 = vector.load %arg9[%c0_210, %c0_211] : memref<64x128xbf16, #tpu.memory_space<vmem>>, vector<64x128xbf16>
    %cst_212 = arith.constant dense<0.000000e+00> : vector<2x128xf32>
    %582 = tpu.matmul %580, %581, %cst_212 {dimension_numbers = #tpu.dot_dimension_numbers<[1], [0], [0], [1], [0, 0, 1, 1], [], []>} : vector<2x64xbf16>, vector<64x128xbf16>, vector<2x128xf32> -> vector<2x128xf32>
    %c0_213 = arith.constant 0 : index
    %c0_214 = arith.constant 0 : index
    %583 = vector.load %arg10[%c0_213, %c0_214] : memref<1x128xf32, #tpu.memory_space<vmem>>, vector<1x128xf32>
    %584 = vector.broadcast %583 : vector<1x128xf32> to vector<2x128xf32>
    %585 = arith.addf %582, %584 : vector<2x128xf32>
    %c0_215 = arith.constant 0 : index
    %c0_216 = arith.constant 0 : index
    %586 = vector.load %arg11[%c0_215, %c0_216] : memref<2x128xf32, #tpu.memory_space<vmem>>, vector<2x128xf32>
    tpu.vector_store %arg11[%c0_215, %c0_216], %585 {strides = array<i32>} : memref<2x128xf32, #tpu.memory_space<vmem>>, vector<2x128xf32>,
    return
  }
}

</mosaic_0001>

<bundles_post_ra>
// kernel: tpu_custom_call.1
= control target key start
LH: loop header
LB: loop body
LE: loop exit
PB: predicated region body
PF: predicated region fallthrough
CT: control target
= control target key end

     0   :  { %16 = vsyncpa [#allocation6], 0  ;;  %s4289_s0 = inlined_call_operand.hbm [shape: f32[2,8,64], index: 0, kind: input, shape index: {}]   ;;  %s4290_s1 = inlined_call_operand.hbm [shape: bf16[64,128], index: 1, kind: input, shape index: {}]   ;;  %s4291_s2 = inlined_call_operand.hbm [shape: bf16[32,128], index: 2, kind: input, shape index: {}]   ;;  %s4292_s3 = inlined_call_operand.vmem [shape: f32[1,128], index: 3, kind: input, shape index: {}]   ;;  %s4293_s4 = inlined_call_operand.hbm [shape: bf16[64,128], index: 4, kind: input, shape index: {}]   ;;  %s4294_s5 = inlined_call_operand.hbm [shape: bf16[32,128], index: 5, kind: input, shape index: {}]   ;;  %s4295_s6 = inlined_call_operand.vmem [shape: f32[1,128], index: 6, kind: input, shape index: {}]   ;;  %s4296_s7 = inlined_call_operand.vmem [shape: f32[1,32], index: 7, kind: input, shape index: {}]   ;;  %s4297_s8 = inlined_call_operand.vmem [shape: f32[1,32], index: 8, kind: input, shape index: {}]   ;;  %s4298_s9 = inlined_call_operand.hbm [shape: bf16[64,128], index: 9, kind: input, shape index: {}]   ;;  %s4299_s10 = inlined_call_operand.vmem [shape: f32[1,128], index: 10, kind: input, shape index: {}]   ;;  %s4300_s11 = inlined_call_operand.hbm [shape: f32[2,128], index: 11, kind: output, shape index: {}]  }
   0x1   :  { %17 = vsyncpa [#allocation9], 0 }
   0x2   :  { %18 = vsyncpa [#allocation12], 0 }
   0x3   :  { %19 = vsyncpa [#allocation15], 0 }
   0x4   :  { %20 = vsyncpa [#allocation7], 0  ;;  %s3489_s17 = smov [#allocation8]  }
   0x5   :  { %s38_s18 = sshll.u32 %s3489_s17, 4  ;;  %s39_s18 = int_to_ptr.vmem [resolvable:$true] %s38_s18 }
   0x6   :  { %s3347_s19 = scalar_lea.vmem %s39_s18, 512  ;;  %p3352_p1 = scmp.lt.s32.totalorder %s39_s18, %s39_s18 }
   0x7   :  { %p3348_p0 = scmp.ne.s32.totalorder %s39_s18, %s3347_s19  ;;  %p3353_p2 = scmp.lt.s32.totalorder %s3347_s19, %s3347_s19 }
   0x9   :  { %p3354_p3 = por %p3353_p2, %p3352_p1 }
   0xb   :  { %p3355_p4 = pnand %p3354_p3, %p3348_p0 }
   0xd   :  { %3358 = shalt.err (!%p3355_p4)
}
   0xe   :  { %s3490_s20 = smov 64   ;;  %s3491_s21 = smov 4  }
   0xf   :  { %44 = dma.hbm_to_vmem [thread:$0]  %s4290_s1, 512, %s39_s18, [#allocation9], %s3490_s20, %s3490_s20, %s3491_s21  }
  0x10   :  { %s3492_s24 = smov [#allocation11]   ;;  %s3493_s26 = smov [#allocation5]  }
  0x11   :  { %s64_s25 = sshll.u32 %s3492_s24, 4  ;;  %s26_s27 = sshll.u32 %s3493_s26, 4  ;;  %s65_s25 = int_to_ptr.vmem [resolvable:$true] %s64_s25  ;;  %s27_s27 = int_to_ptr.vmem [resolvable:$true] %s26_s27 }
  0x12   :  { %s3367_s28 = scalar_lea.vmem %s65_s25, 512  ;;  %p3372_p6 = scmp.lt.s32.totalorder %s65_s25, %s65_s25 }
  0x13   :  { %p3368_p5 = scmp.ne.s32.totalorder %s65_s25, %s3367_s28  ;;  %p3373_p7 = scmp.lt.s32.totalorder %s3367_s28, %s3367_s28 }
  0x15   :  { %p3374_p8 = por %p3373_p7, %p3372_p6 }
  0x17   :  { %p3375_p9 = pnand %p3374_p8, %p3368_p5 }
  0x19   :  { %3378 = shalt.err (!%p3375_p9)
}
  0x1a   :  { %70 = dma.hbm_to_vmem [thread:$0]  %s4293_s4, 512, %s65_s25, [#allocation12], %s3490_s20, %s3490_s20, %s3491_s21  }
  0x1b   :  { %s3387_s1 = scalar_lea.vmem %s27_s27, 256  ;;  %p3392_p11 = scmp.lt.s32.totalorder %s27_s27, %s27_s27 }
  0x1c   :  { %p3388_p10 = scmp.ne.s32.totalorder %s27_s27, %s3387_s1  ;;  %p3393_p12 = scmp.lt.s32.totalorder %s3387_s1, %s3387_s1 }
  0x1e   :  { %p3394_p13 = por %p3393_p12, %p3392_p11 }
  0x20   :  { %p3395_p0 = pnand %p3394_p13, %p3388_p10 }
  0x22   :  { %3398 = shalt.err (!%p3395_p0)
}
  0x23   :  { %s3494_s12 = smov 128   ;;  %s3495_s13 = smov 8  }
  0x24   :  { %32 = dma.hbm_to_vmem [thread:$0]  %s4289_s0, 256, %s27_s27, [#allocation6], %s3494_s12, %s3494_s12, %s3495_s13  }
  0x25   :  { %s3496_s16 = smov [#allocation10]   ;;  %s3497_s18 = smov [#allocation13]  }
  0x26   :  { %s50_s17 = sshll.u32 %s3496_s16, 4  ;;  %s76_s19 = sshll.u32 %s3497_s18, 4  ;;  %s51_s17 = int_to_ptr.vmem [resolvable:$true] %s50_s17  ;;  %s77_s19 = int_to_ptr.vmem [resolvable:$true] %s76_s19 }
  0x27   :  { %s3407_s4 = scalar_lea.vmem %s51_s17, 256  ;;  %p3412_p2 = scmp.lt.s32.totalorder %s51_s17, %s51_s17 }
  0x28   :  { %p3408_p1 = scmp.ne.s32.totalorder %s51_s17, %s3407_s4  ;;  %p3413_p3 = scmp.lt.s32.totalorder %s3407_s4, %s3407_s4 }
  0x2a   :  { %p3414_p4 = por %p3413_p3, %p3412_p2 }
  0x2c   :  { %p3415_p5 = pnand %p3414_p4, %p3408_p1 }
  0x2e   :  { %3418 = shalt.err (!%p3415_p5)
}
  0x2f   :  { %56 = dma.hbm_to_vmem [thread:$0]  %s4291_s2, 256, %s51_s17, [#allocation9], %s3490_s20, %s3490_s20, %s3491_s21  }
  0x30   :  { %s3427_s0 = scalar_lea.vmem %s77_s19, 256  ;;  %p3432_p7 = scmp.lt.s32.totalorder %s77_s19, %s77_s19 }
  0x31   :  { %p3428_p6 = scmp.ne.s32.totalorder %s77_s19, %s3427_s0  ;;  %p3433_p8 = scmp.lt.s32.totalorder %s3427_s0, %s3427_s0 }
  0x33   :  { %p3434_p9 = por %p3433_p8, %p3432_p7 }
  0x35   :  { %p3435_p10 = pnand %p3434_p9, %p3428_p6 }
  0x37   :  { %3438 = shalt.err (!%p3435_p10)
}
  0x38   :  { %82 = dma.hbm_to_vmem [thread:$0]  %s4294_s5, 256, %s77_s19, [#allocation12], %s3490_s20, %s3490_s20, %s3491_s21  }
  0x39   :  { %s3498_s26 = smov [#allocation14]  }
  0x3a   :  { %s94_s27 = sshll.u32 %s3498_s26, 4  ;;  %s95_s27 = int_to_ptr.vmem [resolvable:$true] %s94_s27 }
  0x3b   :  { %s3447_s28 = scalar_lea.vmem %s95_s27, 512  ;;  %p3452_p12 = scmp.lt.s32.totalorder %s95_s27, %s95_s27 }
  0x3c   :  { %p3448_p11 = scmp.ne.s32.totalorder %s95_s27, %s3447_s28  ;;  %p3453_p13 = scmp.lt.s32.totalorder %s3447_s28, %s3447_s28 }
  0x3e   :  { %p3454_p0 = por %p3453_p13, %p3452_p12 }
  0x40   :  { %p3455_p1 = pnand %p3454_p0, %p3448_p11 }
  0x42   :  { %3458 = shalt.err (!%p3455_p1)
}
  0x43   :  { %100 = dma.hbm_to_vmem [thread:$0]  %s4298_s9, 512, %s95_s27, [#allocation15], %s3490_s20, %s3490_s20, %s3491_s21  }
  0x44   :  { %3479 = dma.done.wait [#allocation6], 256  }
  0x45   :  { %3480 = vsyncadd [#allocation6], 4294967040 }
  0x46   :  { %3481 = dma.done.wait [#allocation9], 768  }
  0x47   :  { %3482 = vsyncadd [#allocation9], 4294966528 }
  0x48   :  { %3483 = dma.done.wait [#allocation12], 768  }
  0x49   :  { %3484 = vsyncadd [#allocation12], 4294966528 }
  0x4a   :  { %3485 = dma.done.wait [#allocation15], 512  }
  0x4b   :  { %3486 = vsyncadd [#allocation15], 4294966784  ;;  %v3499_v0 = vmov 0.0   ;;  %vm3500_vm0 = vmmov 0   ;;  %v3501_v1 = vmov 0   ;;  %v3049_v2 = vld [vmem:[#allocation8 + $0x18] sm:$0xff]  }
  0x4c   :  { %2863 = vmatprep.subr.bf16.mxu0 %v3499_v0  ;;  %2875 = vmatprep.subr.bf16.mxu1 %v3499_v0  ;;  %v3050_v3 = vld [vmem:[#allocation8 + $0x10] sm:$0xff]   ;;  %v3605_v4 = vld [vmem:[#allocation10 + $0x8] sm:$0xff]   ;;  %v3609_v5 = vld [vmem:[#allocation10] sm:$0xff]   ;;  %vm164_vm1 = vcmask 523264   ;;  %s3502_s21 = smov 32   ;;  %vm348_vm2 = vcmask 1041409  }
  0x4d   :  { %2879 = vmatprep.mubr.msk.bf16.mxu1 %vm3500_vm0, %v3499_v0  ;;  %2871 = vmatprep.mubr.msk.bf16.mxu0 %vm3500_vm0, %v3499_v0  ;;  %v3052_v6 = vld [vmem:[#allocation8 + $0x8] sm:$0xff]   ;;  %v3054_v7 = vld [vmem:[#allocation8] sm:$0xff]   ;;  %v122_v8 = vld [vmem:[#allocation5] sm:$0xff]  ;;  %vm225_vm3 = vcmask 261120   ;;  %vm331_vm4 = vcmask 122880   ;;  %vm334_vm5 = vcmask 254080  }
  0x4e   :  { %3048 = vset.pattern.permute.xlu1 %v3501_v1  ;;  %3047 = vset.pattern.permute.xlu0 %v3501_v1  ;;  %v123_v9 = vld [vmem:[#allocation5 + $0x8] sm:$0xff]  ;;  %v2730_v16 = vld [vmem:[%s4292_s3] ss:$0 sm:$0xff]  ;;  %vm464_vm6 = vcmask 123905   ;;  %vm467_vm7 = vcmask 255105   ;;  %vm597_vm8 = vcmask 124930  }
  0x4f   :  { %2864 = vmatpush3.bf16.msra.mxu0 %v3049_v2  ;;  %2876 = vmatpush3.bf16.msra.mxu1 %v3605_v4  ;;  %v124_v10 = vpack.c.bf16 %v123_v9, %v122_v8  ;;  %vm600_vm9 = vcmask 256130   ;;  %vm731_vm10 = vcmask 125955   ;;  %vm734_vm11 = vcmask 257155   ;;  %s3503_s13 = smov [#allocation16]  }
  0x50   :  { %2865 = vmatprep.subr.bf16.mxu0 %v3499_v0  ;;  %2877 = vmatprep.subr.bf16.mxu1 %v3499_v0  ;;  %vm4302_vm12 = vcmask 126980   ;;  %vm4301_vm13 = vcmask 258180   ;;  %vm4304_vm14 = vcmask 128005   ;;  %vm4303_vm15 = vcmask 259205   ;;  %s2718_s14 = sshll.u32 %s3503_s13, 4  ;;  %s2719_s14 = int_to_ptr.vmem [resolvable:$true] %s2718_s14 }
  0x51   :  { %s3459_s15 = scalar_lea.vmem %s2719_s14, 32  ;;  %p3464_p3 = scmp.lt.s32.totalorder %s2719_s14, %s2719_s14 }
  0x52   :  { %p3460_p2 = scmp.ne.s32.totalorder %s2719_s14, %s3459_s15  ;;  %p3465_p4 = scmp.lt.s32.totalorder %s3459_s15, %s3459_s15 }
  0x53   :  { %2866 = vmatpush3.bf16.msra.mxu0 %v3050_v3  ;;  %2878 = vmatpush3.bf16.msra.mxu1 %v3609_v5 }
  0x54   :  { %2867 = vmatprep.subr.bf16.mxu0 %v3499_v0  ;;  %2883 = vmatprep.subr.bf16.mxu1 %v3499_v0  ;;  %p3466_p5 = por %p3465_p4, %p3464_p3 }
  0x56   :  { %2880 = vmatmul.mubr.bf16.vlgmr.msra.gmra.mxu1 %v3501_v1  ;;  %p3467_p6 = pnand %p3466_p5, %p3460_p2 }
  0x57   :  { %2868 = vmatpush3.bf16.msra.mxu0 %v3052_v6  ;;  %2884 = vmatpush3.bf16.msra.mxu1 %v3605_v4 }
  0x58   :  { %2869 = vmatprep.subr.bf16.mxu0 %v3499_v0  ;;  %2887 = vmatprep.mubr.msk.bf16.mxu1 %vm3500_vm0, %v3499_v0 }
  0x59   :  { %2885 = vmatprep.subr.bf16.mxu1 %v3499_v0 }
  0x5b   :  { %2870 = vmatpush3.bf16.msra.mxu0 %v3054_v7  ;;  %2886 = vmatpush3.bf16.msra.mxu1 %v3609_v5 }
  0x5c   :  { %2907 = vmatprep.subr.bf16.mxu0 %v3499_v0  ;;  %2891 = vmatprep.subr.bf16.mxu1 %v3499_v0 }
  0x5e   :  { %2872 = vmatmul.mubr.msk.bf16.vlgmr.msra.gmra.mxu0 %vm164_vm1, %v124_v10 }
  0x5f   :  { %2908 = vmatpush3.bf16.msra.mxu0 %v3605_v4  ;;  %2911 = vmatprep.mubr.msk.bf16.mxu0 %vm3500_vm0, %v3499_v0 }
  0x60   :  { %2909 = vmatprep.subr.bf16.mxu0 %v3499_v0 }
  0x63   :  { %2910 = vmatpush3.bf16.msra.mxu0 %v3609_v5 }
  0x64   :  { %2923 = vmatprep.subr.bf16.mxu0 %v3499_v0 }
 0x116   :  { %v263_v11 = vpop.f32.mrf.mxu1 }
 0x117   :  { %v270_v18 = vrot.slane %v263_v11, 1 }
 0x118   :  { %v2881_v12 = vpop.f32.mrf.mxu1 }
 0x11a   :  { %v266_v13 = vpop.f32.mrf.mxu1 }
 0x11c   :  { %v2882_v15 = vpop.f32.mrf.mxu1 }
 0x11e   :  { %v202_v14 = vpop.f32.mrf.mxu0 }
 0x11f   :  { %v3634_v20 = vadd.f32 %v2730_v16, %v202_v14 }
 0x120   :  { %v2873_v17 = vpop.f32.mrf.mxu0 }
 0x121   :  { %v273_v24 = vadd.f32 %v263_v11, %v3634_v20 }
 0x122   :  { %v205_v19 = vpop.f32.mrf.mxu0 }
 0x123   :  { %v3636_v21 = vadd.f32 %v2730_v16, %v205_v19  ;;  %v2738_v28 = vmul.f32 -1.442695, %v273_v24 }
 0x124   :  { %v2874_v22 = vpop.f32.mrf.mxu0 }
 0x125   :  { %v274_v23 = vadd.f32 %v270_v18, %v3636_v21 }
 0x127   :  { %3065 = vtanh.f32 %v274_v23  ;;  %v2739_v27 = vmul.f32 -1.442695, %v274_v23 }
 0x128   :  { %3067 = vtanh.f32 %v273_v24 }
 0x129   :  { %3069 = vpow2.f32 %v2739_v27 }
 0x12a   :  { %3071 = vpow2.f32 %v2738_v28 }
 0x134   :  { %v3066_v25 = vpop.eup %3065 }
 0x135   :  { %295 = vrot.lane.b32.xlu0 %v3066_v25, %s3502_s21  ;;  %v3068_v26 = vpop.eup %3067 }
 0x136   :  { %v3070_v29 = vpop.eup %3069 }
 0x137   :  { %v282_v30 = vadd.f32 1.0, %v3070_v29  ;;  %v3072_v31 = vpop.eup %3071 }
 0x138   :  { %v281_v32 = vadd.f32 1.0, %v3072_v31 }
 0x139   :  { %293 = vrot.lane.b32.xlu0 %v3068_v26, %s3502_s21  ;;  %3073 = vrcp.f32 %v282_v30 }
 0x13a   :  { %3075 = vrcp.f32 %v281_v32 }
 0x146   :  { %v3074_v33 = vpop.eup %3073 }
 0x147   :  { %v3076_v36 = vpop.eup %3075  ;;  %v290_v39 = vmul.f32 0.0, %v3074_v33 }
 0x148   :  { %v289_v42 = vmul.f32 0.0, %v3076_v36 }
 0x1a7   :  { %v296_v34 = vpop.permute.xlu0 %295 }
 0x1a8   :  { %v300_v35 = vmul.f32 %v3074_v33, %v296_v34 }
 0x1aa   :  { %305 = vrot.lane.b32.xlu1 %v300_v35, %s3502_s21 }
 0x1ab   :  { %v294_v37 = vpop.permute.xlu0 %293 }
 0x1ac   :  { %v299_v38 = vmul.f32 %v3076_v36, %v294_v37 }
 0x1ae   :  { %303 = vrot.lane.b32.xlu1 %v299_v38, %s3502_s21 }
 0x21c   :  { %v306_v40 = vpop.permute.xlu1 %305 }
 0x21d   :  { %v3644_v41 = vadd.f32 %v306_v40, %v290_v39 }
 0x21f   :  { %3077 = vtanh.f32 %v3644_v41  ;;  %v419_v22 = vrot.slane %v3644_v41, 7 }
 0x220   :  { %v304_v43 = vpop.permute.xlu1 %303 }
 0x221   :  { %v3647_v44 = vadd.f32 %v304_v43, %v289_v42 }
 0x223   :  { %3079 = vtanh.f32 %v3647_v44  ;;  %v418_v24 = vrot.slane %v3647_v44, 7 }
 0x22c   :  { %v3078_v45 = vpop.eup %3077 }
 0x22d   :  { %317 = vrot.lane.b32.xlu0 %v3078_v45, %s3502_s21 }
 0x230   :  { %v3080_v46 = vpop.eup %3079 }
 0x231   :  { %315 = vrot.lane.b32.xlu1 %v3080_v46, %s3502_s21 }
 0x29f   :  { %v318_v47 = vpop.permute.xlu0 %317 }
 0x2a0   :  { %v3652_v48 = vmul.f32 %v3074_v33, %v318_v47 }
 0x2a2   :  { %v342_v49 = vpack.c.bf16 %v3652_v48, %v3652_v48 }
 0x2a3   :  { %v316_v50 = vpop.permute.xlu1 %315 }
 0x2a4   :  { %v346_v51 = vunpack.c.l.b16 %v342_v49  ;;  %v3656_v52 = vmul.f32 %v3076_v36, %v316_v50 }
 0x2a6   :  { %v341_v53 = vpack.c.bf16 %v3656_v52, %v3656_v52  ;;  %v347_v54 = vrot.slane %v346_v51, 7 }
 0x2a8   :  { %v345_v55 = vunpack.c.l.b16 %v341_v53 }
 0x2aa   :  { %v349_v56 = vsel %vm348_vm2, %v347_v54, %v345_v55 }
 0x2ab   :  { %v350_v57 = vpack.c.b16 %v349_v56, %v349_v56 }
 0x2ad   :  { %351 = vrot.lane.b32.xlu0 %v350_v57, %s3490_s20 }
 0x31f   :  { %v352_v58 = vpop.permute.xlu0 %351 }
 0x320   :  { %2888 = vmatmul.mubr.msk.bf16.vlgmr.msra.gmra.mxu1 %vm225_vm3, %v352_v58 }
 0x321   :  { %2892 = vmatpush3.bf16.msra.mxu1 %v3605_v4  ;;  %2895 = vmatprep.mubr.msk.bf16.mxu1 %vm3500_vm0, %v3499_v0 }
 0x322   :  { %2893 = vmatprep.subr.bf16.mxu1 %v3499_v0 }
 0x325   :  { %2894 = vmatpush3.bf16.msra.mxu1 %v3609_v5 }
 0x326   :  { %2899 = vmatprep.subr.bf16.mxu1 %v3499_v0 }
 0x3e0   :  { %v390_v59 = vpop.f32.mrf.mxu1 }
 0x3e1   :  { %v397_v60 = vrot.slane %v390_v59, 7  ;;  %v401_v61 = vadd.f32 %v390_v59, %v3636_v21 }
 0x3e2   :  { %v2889_v62 = vpop.f32.mrf.mxu1 }
 0x3e3   :  { %v400_v63 = vadd.f32 %v397_v60, %v3634_v20  ;;  %3081 = vtanh.f32 %v401_v61  ;;  %v2742_v8 = vmul.f32 -1.442695, %v401_v61 }
 0x3e4   :  { %v393_v2 = vpop.f32.mrf.mxu1 }
 0x3e5   :  { %3083 = vtanh.f32 %v400_v63  ;;  %v2741_v9 = vmul.f32 -1.442695, %v400_v63 }
 0x3e6   :  { %v2890_v3 = vpop.f32.mrf.mxu1  ;;  %3085 = vpow2.f32 %v2742_v8 }
 0x3e7   :  { %3087 = vpow2.f32 %v2741_v9 }
 0x3f0   :  { %v3082_v6 = vpop.eup %3081 }
 0x3f1   :  { %428 = vrot.lane.b32.xlu0 %v3082_v6, %s3502_s21 }
 0x3f2   :  { %v3084_v7 = vpop.eup %3083 }
 0x3f3   :  { %426 = vrot.lane.b32.xlu1 %v3084_v7, %s3502_s21  ;;  %v3086_v10 = vpop.eup %3085 }
 0x3f4   :  { %v3088_v11 = vpop.eup %3087  ;;  %v409_v12 = vadd.f32 1.0, %v3086_v10 }
 0x3f5   :  { %v408_v13 = vadd.f32 1.0, %v3088_v11 }
 0x3f6   :  { %3089 = vrcp.f32 %v409_v12 }
 0x3f7   :  { %3091 = vrcp.f32 %v408_v13 }
 0x403   :  { %v3090_v14 = vpop.eup %3089 }
 0x404   :  { %v3092_v17 = vpop.eup %3091  ;;  %v423_v23 = vmul.f32 %v3090_v14, %v419_v22 }
 0x405   :  { %v422_v27 = vmul.f32 %v3092_v17, %v418_v24 }
 0x463   :  { %v429_v15 = vpop.permute.xlu0 %428 }
 0x464   :  { %v433_v16 = vmul.f32 %v3090_v14, %v429_v15 }
 0x465   :  { %v427_v18 = vpop.permute.xlu1 %426 }
 0x466   :  { %438 = vrot.lane.b32.xlu0 %v433_v16, %s3502_s21  ;;  %v432_v19 = vmul.f32 %v3092_v17, %v427_v18 }
 0x468   :  { %436 = vrot.lane.b32.xlu1 %v432_v19, %s3502_s21 }
 0x4d8   :  { %v439_v25 = vpop.permute.xlu0 %438 }
 0x4d9   :  { %v3677_v26 = vadd.f32 %v439_v25, %v423_v23 }
 0x4da   :  { %v437_v28 = vpop.permute.xlu1 %436 }
 0x4db   :  { %3093 = vtanh.f32 %v3677_v26  ;;  %v442_v29 = vadd.f32 %v437_v28, %v422_v27  ;;  %v552_v9 = vrot.slane %v3677_v26, 7 }
 0x4dd   :  { %3095 = vtanh.f32 %v442_v29  ;;  %v551_v8 = vrot.slane %v442_v29, 7 }
 0x4e8   :  { %v3094_v30 = vpop.eup %3093 }
 0x4e9   :  { %450 = vrot.lane.b32.xlu0 %v3094_v30, %s3502_s21 }
 0x4ea   :  { %v3096_v31 = vpop.eup %3095 }
 0x4eb   :  { %448 = vrot.lane.b32.xlu1 %v3096_v31, %s3502_s21 }
 0x55b   :  { %v451_v32 = vpop.permute.xlu0 %450 }
 0x55c   :  { %v3682_v33 = vmul.f32 %v3090_v14, %v451_v32 }
 0x55d   :  { %v449_v34 = vpop.permute.xlu1 %448 }
 0x55e   :  { %v3684_v35 = vmul.f32 %v3092_v17, %v449_v34  ;;  %v475_v36 = vpack.c.bf16 %v3682_v33, %v3682_v33 }
 0x560   :  { %v474_v37 = vpack.c.bf16 %v3684_v35, %v3684_v35  ;;  %v479_v39 = vunpack.c.l.b16 %v475_v36 }
 0x562   :  { %v478_v38 = vunpack.c.l.b16 %v474_v37 }
 0x564   :  { %v480_v40 = vrot.slane %v478_v38, 1 }
 0x566   :  { %v481_v41 = vsel %vm348_vm2, %v479_v39, %v480_v40 }
 0x567   :  { %v482_v42 = vpack.c.b16 %v481_v41, %v481_v41 }
 0x569   :  { %483 = vrot.lane.b32.xlu1 %v482_v42, %s3490_s20 }
 0x5db   :  { %v484_v43 = vpop.permute.xlu1 %483 }
 0x5dc   :  { %2896 = vmatmul.mubr.msk.bf16.vlgmr.msra.gmra.mxu1 %vm225_vm3, %v484_v43 }
 0x5dd   :  { %2900 = vmatpush3.bf16.msra.mxu1 %v3605_v4  ;;  %2903 = vmatprep.mubr.msk.bf16.mxu1 %vm3500_vm0, %v3499_v0 }
 0x5de   :  { %2901 = vmatprep.subr.bf16.mxu1 %v3499_v0 }
 0x5e1   :  { %2902 = vmatpush3.bf16.msra.mxu1 %v3609_v5 }
 0x5e2   :  { %2915 = vmatprep.subr.bf16.mxu1 %v3499_v0 }
 0x69c   :  { %v522_v44 = vpop.f32.mrf.mxu1 }
 0x69d   :  { %v529_v45 = vrot.slane %v522_v44, 6  ;;  %v530_v46 = vrot.slane %v522_v44, 7 }
 0x69e   :  { %v2897_v47 = vpop.f32.mrf.mxu1 }
 0x69f   :  { %v533_v49 = vadd.f32 %v529_v45, %v3634_v20  ;;  %v534_v50 = vadd.f32 %v530_v46, %v3636_v21 }
 0x6a0   :  { %v525_v51 = vpop.f32.mrf.mxu1 }
 0x6a1   :  { %3097 = vtanh.f32 %v533_v49  ;;  %v2744_v56 = vmul.f32 -1.442695, %v533_v49  ;;  %v2745_v57 = vmul.f32 -1.442695, %v534_v50 }
 0x6a2   :  { %3099 = vtanh.f32 %v534_v50  ;;  %v2898_v53 = vpop.f32.mrf.mxu1 }
 0x6a3   :  { %3101 = vpow2.f32 %v2744_v56 }
 0x6a4   :  { %3103 = vpow2.f32 %v2745_v57 }
 0x6ae   :  { %v3098_v54 = vpop.eup %3097 }
 0x6af   :  { %v3100_v55 = vpop.eup %3099  ;;  %559 = vrot.lane.b32.xlu0 %v3098_v54, %s3502_s21 }
 0x6b0   :  { %561 = vrot.lane.b32.xlu1 %v3100_v55, %s3502_s21  ;;  %v3102_v58 = vpop.eup %3101 }
 0x6b1   :  { %v3104_v59 = vpop.eup %3103  ;;  %v541_v60 = vadd.f32 1.0, %v3102_v58 }
 0x6b2   :  { %v542_v61 = vadd.f32 1.0, %v3104_v59 }
 0x6b3   :  { %3105 = vrcp.f32 %v541_v60 }
 0x6b4   :  { %3107 = vrcp.f32 %v542_v61 }
 0x6c0   :  { %v3106_v62 = vpop.eup %3105 }
 0x6c1   :  { %v3108_v2 = vpop.eup %3107  ;;  %v555_v10 = vmul.f32 %v3106_v62, %v551_v8 }
 0x6c2   :  { %v556_v11 = vmul.f32 %v3108_v2, %v552_v9 }
 0x721   :  { %v560_v63 = vpop.permute.xlu0 %559 }
 0x722   :  { %v562_v3 = vpop.permute.xlu1 %561  ;;  %v565_v6 = vmul.f32 %v3106_v62, %v560_v63 }
 0x723   :  { %v566_v7 = vmul.f32 %v3108_v2, %v562_v3 }
 0x724   :  { %569 = vrot.lane.b32.xlu0 %v565_v6, %s3502_s21 }
 0x725   :  { %571 = vrot.lane.b32.xlu1 %v566_v7, %s3502_s21 }
 0x796   :  { %v570_v12 = vpop.permute.xlu0 %569 }
 0x797   :  { %v572_v13 = vpop.permute.xlu1 %571  ;;  %v3706_v14 = vadd.f32 %v570_v12, %v555_v10 }
 0x798   :  { %v3708_v15 = vadd.f32 %v572_v13, %v556_v11 }
 0x799   :  { %3109 = vtanh.f32 %v3706_v14  ;;  %v685_v59 = vrot.slane %v3706_v14, 7 }
 0x79a   :  { %3111 = vtanh.f32 %v3708_v15  ;;  %v686_v60 = vrot.slane %v3708_v15, 7 }
 0x7a6   :  { %v3110_v16 = vpop.eup %3109 }
 0x7a7   :  { %v3112_v17 = vpop.eup %3111  ;;  %581 = vrot.lane.b32.xlu0 %v3110_v16, %s3502_s21 }
 0x7a8   :  { %583 = vrot.lane.b32.xlu1 %v3112_v17, %s3502_s21 }
 0x819   :  { %v582_v18 = vpop.permute.xlu0 %581 }
 0x81a   :  { %v584_v19 = vpop.permute.xlu1 %583  ;;  %v3714_v22 = vmul.f32 %v3106_v62, %v582_v18 }
 0x81b   :  { %v3716_v23 = vmul.f32 %v3108_v2, %v584_v19 }
 0x81c   :  { %v607_v24 = vpack.c.bf16 %v3714_v22, %v3714_v22 }
 0x81d   :  { %v608_v25 = vpack.c.bf16 %v3716_v23, %v3716_v23 }
 0x81e   :  { %v611_v26 = vunpack.c.l.b16 %v607_v24 }
 0x81f   :  { %v612_v27 = vunpack.c.l.b16 %v608_v25 }
 0x820   :  { %v613_v28 = vrot.slane %v611_v26, 2 }
 0x821   :  { %v614_v29 = vrot.slane %v612_v27, 1 }
 0x823   :  { %v615_v30 = vsel %vm348_vm2, %v614_v29, %v613_v28 }
 0x824   :  { %v616_v31 = vpack.c.b16 %v615_v30, %v615_v30 }
 0x826   :  { %617 = vrot.lane.b32.xlu0 %v616_v31, %s3490_s20 }
 0x898   :  { %v618_v32 = vpop.permute.xlu0 %617 }
 0x899   :  { %2904 = vmatmul.mubr.msk.bf16.vlgmr.msra.gmra.mxu1 %vm225_vm3, %v618_v32 }
 0x89a   :  { %2916 = vmatpush3.bf16.msra.mxu1 %v3605_v4  ;;  %2919 = vmatprep.mubr.msk.bf16.mxu1 %vm3500_vm0, %v3499_v0 }
 0x89b   :  { %2917 = vmatprep.subr.bf16.mxu1 %v3499_v0 }
 0x89e   :  { %2918 = vmatpush3.bf16.msra.mxu1 %v3609_v5 }
 0x89f   :  { %2931 = vmatprep.subr.bf16.mxu1 %v3499_v0 }
 0x959   :  { %v656_v34 = vpop.f32.mrf.mxu1 }
 0x95a   :  { %v663_v36 = vrot.slane %v656_v34, 5  ;;  %v664_v37 = vrot.slane %v656_v34, 6 }
 0x95b   :  { %v2905_v38 = vpop.f32.mrf.mxu1 }
 0x95c   :  { %v667_v39 = vadd.f32 %v663_v36, %v3634_v20  ;;  %v668_v40 = vadd.f32 %v664_v37, %v3636_v21 }
 0x95d   :  { %v659_v41 = vpop.f32.mrf.mxu1 }
 0x95e   :  { %3113 = vtanh.f32 %v667_v39  ;;  %v2747_v45 = vmul.f32 -1.442695, %v667_v39  ;;  %v2748_v46 = vmul.f32 -1.442695, %v668_v40 }
 0x95f   :  { %3115 = vtanh.f32 %v668_v40  ;;  %v2906_v42 = vpop.f32.mrf.mxu1 }
 0x960   :  { %3117 = vpow2.f32 %v2747_v45 }
 0x961   :  { %3119 = vpow2.f32 %v2748_v46 }
 0x96b   :  { %v3114_v43 = vpop.eup %3113 }
 0x96c   :  { %v3116_v44 = vpop.eup %3115  ;;  %693 = vrot.lane.b32.xlu1 %v3114_v43, %s3502_s21 }
 0x96d   :  { %695 = vrot.lane.b32.xlu0 %v3116_v44, %s3502_s21  ;;  %v3118_v47 = vpop.eup %3117 }
 0x96e   :  { %v3120_v49 = vpop.eup %3119  ;;  %v675_v50 = vadd.f32 1.0, %v3118_v47 }
 0x96f   :  { %v676_v51 = vadd.f32 1.0, %v3120_v49 }
 0x970   :  { %3121 = vrcp.f32 %v675_v50 }
 0x971   :  { %3123 = vrcp.f32 %v676_v51 }
 0x97d   :  { %v3122_v53 = vpop.eup %3121 }
 0x97e   :  { %v3124_v55 = vpop.eup %3123  ;;  %v689_v61 = vmul.f32 %v3122_v53, %v685_v59 }
 0x97f   :  { %v690_v62 = vmul.f32 %v3124_v55, %v686_v60 }
 0x9de   :  { %v694_v54 = vpop.permute.xlu1 %693 }
 0x9df   :  { %v696_v56 = vpop.permute.xlu0 %695  ;;  %v699_v57 = vmul.f32 %v3122_v53, %v694_v54 }
 0x9e0   :  { %v700_v58 = vmul.f32 %v3124_v55, %v696_v56 }
 0x9e1   :  { %703 = vrot.lane.b32.xlu1 %v699_v57, %s3502_s21 }
 0x9e2   :  { %705 = vrot.lane.b32.xlu0 %v700_v58, %s3502_s21 }
 0xa53   :  { %v704_v63 = vpop.permute.xlu1 %703 }
 0xa54   :  { %v706_v2 = vpop.permute.xlu0 %705  ;;  %v3739_v3 = vadd.f32 %v704_v63, %v689_v61 }
 0xa55   :  { %v3741_v6 = vadd.f32 %v706_v2, %v690_v62 }
 0xa56   :  { %3125 = vtanh.f32 %v3739_v3  ;;  %v819_v51 = vrot.slane %v3739_v3, 7 }
 0xa57   :  { %3127 = vtanh.f32 %v3741_v6 }
 0xa63   :  { %v3126_v7 = vpop.eup %3125 }
 0xa64   :  { %v3128_v8 = vpop.eup %3127  ;;  %715 = vrot.lane.b32.xlu1 %v3126_v7, %s3502_s21 }
 0xa65   :  { %717 = vrot.lane.b32.xlu0 %v3128_v8, %s3502_s21 }
 0xad6   :  { %v716_v9 = vpop.permute.xlu1 %715 }
 0xad7   :  { %v718_v10 = vpop.permute.xlu0 %717  ;;  %v3747_v11 = vmul.f32 %v3122_v53, %v716_v9  ;;  %v820_v53 = vrot.slane %v3741_v6, 7 }
 0xad8   :  { %v3749_v12 = vmul.f32 %v3124_v55, %v718_v10 }
 0xad9   :  { %v741_v13 = vpack.c.bf16 %v3747_v11, %v3747_v11 }
 0xada   :  { %v742_v14 = vpack.c.bf16 %v3749_v12, %v3749_v12 }
 0xadb   :  { %v745_v15 = vunpack.c.l.b16 %v741_v13 }
 0xadc   :  { %v746_v16 = vunpack.c.l.b16 %v742_v14 }
 0xadd   :  { %v747_v17 = vrot.slane %v745_v15, 3 }
 0xade   :  { %v748_v18 = vrot.slane %v746_v16, 2 }
 0xae0   :  { %v749_v19 = vsel %vm348_vm2, %v748_v18, %v747_v17 }
 0xae1   :  { %v750_v24 = vpack.c.b16 %v749_v19, %v749_v19 }
 0xae3   :  { %751 = vrot.lane.b32.xlu1 %v750_v24, %s3490_s20 }
 0xb55   :  { %v752_v25 = vpop.permute.xlu1 %751 }
 0xb56   :  { %2912 = vmatmul.mubr.msk.bf16.vlgmr.msra.gmra.mxu0 %vm225_vm3, %v752_v25 }
 0xb57   :  { %2924 = vmatpush3.bf16.msra.mxu0 %v3605_v4  ;;  %2927 = vmatprep.mubr.msk.bf16.mxu0 %vm3500_vm0, %v3499_v0 }
 0xb58   :  { %2925 = vmatprep.subr.bf16.mxu0 %v3499_v0 }
 0xb5b   :  { %2926 = vmatpush3.bf16.msra.mxu0 %v3609_v5 }
 0xb5c   :  { %2939 = vmatprep.subr.bf16.mxu0 %v3499_v0 }
 0xc16   :  { %v790_v26 = vpop.f32.mrf.mxu0 }
 0xc17   :  { %v797_v27 = vrot.slane %v790_v26, 4  ;;  %v798_v28 = vrot.slane %v790_v26, 5 }
 0xc18   :  { %v2913_v29 = vpop.f32.mrf.mxu0 }
 0xc19   :  { %v801_v30 = vadd.f32 %v797_v27, %v3634_v20  ;;  %v802_v31 = vadd.f32 %v798_v28, %v3636_v21 }
 0xc1a   :  { %v793_v32 = vpop.f32.mrf.mxu0 }
 0xc1b   :  { %3129 = vtanh.f32 %v801_v30  ;;  %v2750_v38 = vmul.f32 -1.442695, %v801_v30  ;;  %v2751_v39 = vmul.f32 -1.442695, %v802_v31 }
 0xc1c   :  { %3131 = vtanh.f32 %v802_v31  ;;  %v2914_v34 = vpop.f32.mrf.mxu0 }
 0xc1d   :  { %3133 = vpow2.f32 %v2750_v38 }
 0xc1e   :  { %3135 = vpow2.f32 %v2751_v39 }
 0xc28   :  { %v3130_v36 = vpop.eup %3129 }
 0xc29   :  { %v3132_v37 = vpop.eup %3131  ;;  %827 = vrot.lane.b32.xlu0 %v3130_v36, %s3502_s21 }
 0xc2a   :  { %829 = vrot.lane.b32.xlu1 %v3132_v37, %s3502_s21  ;;  %v3134_v40 = vpop.eup %3133 }
 0xc2b   :  { %v3136_v41 = vpop.eup %3135  ;;  %v809_v42 = vadd.f32 1.0, %v3134_v40 }
 0xc2c   :  { %v810_v43 = vadd.f32 1.0, %v3136_v41 }
 0xc2d   :  { %3137 = vrcp.f32 %v809_v42 }
 0xc2e   :  { %3139 = vrcp.f32 %v810_v43 }
 0xc3a   :  { %v3138_v44 = vpop.eup %3137 }
 0xc3b   :  { %v3140_v46 = vpop.eup %3139  ;;  %v823_v54 = vmul.f32 %v3138_v44, %v819_v51 }
 0xc3c   :  { %v824_v55 = vmul.f32 %v3140_v46, %v820_v53 }
 0xc9b   :  { %v828_v45 = vpop.permute.xlu0 %827 }
 0xc9c   :  { %v830_v47 = vpop.permute.xlu1 %829  ;;  %v833_v49 = vmul.f32 %v3138_v44, %v828_v45 }
 0xc9d   :  { %v834_v50 = vmul.f32 %v3140_v46, %v830_v47 }
 0xc9e   :  { %837 = vrot.lane.b32.xlu0 %v833_v49, %s3502_s21 }
 0xc9f   :  { %839 = vrot.lane.b32.xlu1 %v834_v50, %s3502_s21 }
 0xd10   :  { %v838_v56 = vpop.permute.xlu0 %837 }
 0xd11   :  { %v840_v57 = vpop.permute.xlu1 %839  ;;  %v3772_v58 = vadd.f32 %v838_v56, %v823_v54 }
 0xd12   :  { %v3774_v59 = vadd.f32 %v840_v57, %v824_v55 }
 0xd13   :  { %3141 = vtanh.f32 %v3772_v58  ;;  %v953_v43 = vrot.slane %v3772_v58, 7 }
 0xd14   :  { %3143 = vtanh.f32 %v3774_v59 }
 0xd20   :  { %v3142_v60 = vpop.eup %3141 }
 0xd21   :  { %v3144_v61 = vpop.eup %3143  ;;  %849 = vrot.lane.b32.xlu0 %v3142_v60, %s3502_s21 }
 0xd22   :  { %851 = vrot.lane.b32.xlu1 %v3144_v61, %s3502_s21 }
 0xd93   :  { %v850_v62 = vpop.permute.xlu0 %849 }
 0xd94   :  { %v852_v63 = vpop.permute.xlu1 %851  ;;  %v3780_v2 = vmul.f32 %v3138_v44, %v850_v62  ;;  %v954_v44 = vrot.slane %v3774_v59, 7 }
 0xd95   :  { %v3782_v3 = vmul.f32 %v3140_v46, %v852_v63 }
 0xd96   :  { %v875_v6 = vpack.c.bf16 %v3780_v2, %v3780_v2 }
 0xd97   :  { %v876_v7 = vpack.c.bf16 %v3782_v3, %v3782_v3 }
 0xd98   :  { %v879_v8 = vunpack.c.l.b16 %v875_v6 }
 0xd99   :  { %v880_v9 = vunpack.c.l.b16 %v876_v7 }
 0xd9a   :  { %v881_v10 = vrot.slane %v879_v8, 4 }
 0xd9b   :  { %v882_v13 = vrot.slane %v880_v9, 3 }
 0xd9d   :  { %v883_v14 = vsel %vm348_vm2, %v882_v13, %v881_v10 }
 0xd9e   :  { %v884_v15 = vpack.c.b16 %v883_v14, %v883_v14 }
 0xda0   :  { %885 = vrot.lane.b32.xlu0 %v884_v15, %s3490_s20 }
 0xe12   :  { %v886_v16 = vpop.permute.xlu0 %885 }
 0xe13   :  { %2920 = vmatmul.mubr.msk.bf16.vlgmr.msra.gmra.mxu1 %vm225_vm3, %v886_v16 }
 0xe14   :  { %2932 = vmatpush3.bf16.msra.mxu1 %v3605_v4  ;;  %2935 = vmatprep.mubr.msk.bf16.mxu1 %vm3500_vm0, %v3499_v0 }
 0xe15   :  { %2933 = vmatprep.subr.bf16.mxu1 %v3499_v0 }
 0xe18   :  { %2934 = vmatpush3.bf16.msra.mxu1 %v3609_v5 }
 0xe19   :  { %2951 = vmatprep.subr.bf16.mxu1 %v3499_v0 }
 0xed3   :  { %v924_v17 = vpop.f32.mrf.mxu1 }
 0xed4   :  { %v931_v18 = vrot.slane %v924_v17, 3  ;;  %v932_v19 = vrot.slane %v924_v17, 4 }
 0xed5   :  { %v2921_v24 = vpop.f32.mrf.mxu1 }
 0xed6   :  { %v935_v25 = vadd.f32 %v931_v18, %v3634_v20  ;;  %v936_v26 = vadd.f32 %v932_v19, %v3636_v21 }
 0xed7   :  { %v927_v27 = vpop.f32.mrf.mxu1 }
 0xed8   :  { %3145 = vtanh.f32 %v935_v25  ;;  %v2753_v5 = vmul.f32 -1.442695, %v935_v25  ;;  %v2754_v30 = vmul.f32 -1.442695, %v936_v26 }
 0xed9   :  { %3147 = vtanh.f32 %v936_v26  ;;  %v2922_v4 = vpop.f32.mrf.mxu1 }
 0xeda   :  { %3149 = vpow2.f32 %v2753_v5 }
 0xedb   :  { %3151 = vpow2.f32 %v2754_v30 }
 0xee5   :  { %v3146_v28 = vpop.eup %3145 }
 0xee6   :  { %v3148_v29 = vpop.eup %3147  ;;  %961 = vrot.lane.b32.xlu1 %v3146_v28, %s3502_s21 }
 0xee7   :  { %963 = vrot.lane.b32.xlu0 %v3148_v29, %s3502_s21  ;;  %v3150_v31 = vpop.eup %3149 }
 0xee8   :  { %v3152_v32 = vpop.eup %3151  ;;  %v943_v34 = vadd.f32 1.0, %v3150_v31 }
 0xee9   :  { %v944_v36 = vadd.f32 1.0, %v3152_v32 }
 0xeea   :  { %3153 = vrcp.f32 %v943_v34 }
 0xeeb   :  { %3155 = vrcp.f32 %v944_v36 }
 0xef7   :  { %v3154_v37 = vpop.eup %3153 }
 0xef8   :  { %v3156_v39 = vpop.eup %3155  ;;  %v957_v45 = vmul.f32 %v3154_v37, %v953_v43 }
 0xef9   :  { %v958_v46 = vmul.f32 %v3156_v39, %v954_v44 }
 0xf58   :  { %v962_v38 = vpop.permute.xlu1 %961 }
 0xf59   :  { %v964_v40 = vpop.permute.xlu0 %963  ;;  %v967_v41 = vmul.f32 %v3154_v37, %v962_v38 }
 0xf5a   :  { %v968_v42 = vmul.f32 %v3156_v39, %v964_v40 }
 0xf5b   :  { %971 = vrot.lane.b32.xlu1 %v967_v41, %s3502_s21 }
 0xf5c   :  { %973 = vrot.lane.b32.xlu0 %v968_v42, %s3502_s21 }
 0xfcd   :  { %v972_v47 = vpop.permute.xlu1 %971 }
 0xfce   :  { %v974_v49 = vpop.permute.xlu0 %973  ;;  %v977_v50 = vadd.f32 %v972_v47, %v957_v45 }
 0xfcf   :  { %v978_v51 = vadd.f32 %v974_v49, %v958_v46 }
 0xfd0   :  { %3157 = vtanh.f32 %v977_v50  ;;  %v1087_v38 = vrot.slane %v977_v50, 7 }
 0xfd1   :  { %3159 = vtanh.f32 %v978_v51 }
 0xfdd   :  { %v3158_v53 = vpop.eup %3157 }
 0xfde   :  { %v3160_v54 = vpop.eup %3159  ;;  %983 = vrot.lane.b32.xlu1 %v3158_v53, %s3502_s21 }
 0xfdf   :  { %985 = vrot.lane.b32.xlu0 %v3160_v54, %s3502_s21 }
0x1050   :  { %v984_v55 = vpop.permute.xlu1 %983 }
0x1051   :  { %v986_v56 = vpop.permute.xlu0 %985  ;;  %v3807_v57 = vmul.f32 %v3154_v37, %v984_v55 }
0x1052   :  { %v3809_v58 = vmul.f32 %v3156_v39, %v986_v56  ;;  %v1088_v39 = vrot.slane %v978_v51, 7 }
0x1053   :  { %v1009_v59 = vpack.c.bf16 %v3807_v57, %v3807_v57 }
0x1054   :  { %v1010_v60 = vpack.c.bf16 %v3809_v58, %v3809_v58 }
0x1055   :  { %v1013_v61 = vunpack.c.l.b16 %v1009_v59 }
0x1056   :  { %v1014_v62 = vunpack.c.l.b16 %v1010_v60 }
0x1057   :  { %v1015_v63 = vrot.slane %v1013_v61, 5 }
0x1058   :  { %v1016_v6 = vrot.slane %v1014_v62, 4 }
0x105a   :  { %v1017_v7 = vsel %vm348_vm2, %v1016_v6, %v1015_v63 }
0x105b   :  { %v1018_v8 = vpack.c.b16 %v1017_v7, %v1017_v7 }
0x105d   :  { %1019 = vrot.lane.b32.xlu1 %v1018_v8, %s3490_s20 }
0x10cf   :  { %v1020_v9 = vpop.permute.xlu1 %1019 }
0x10d0   :  { %2928 = vmatmul.mubr.msk.bf16.vlgmr.msra.gmra.mxu0 %vm225_vm3, %v1020_v9 }
0x10d1   :  { %2947 = vmatprep.mubr.msk.bf16.mxu0 %vm3500_vm0, %v3499_v0 }
0x1190   :  { %v1058_v10 = vpop.f32.mrf.mxu0 }
0x1191   :  { %v1065_v13 = vrot.slane %v1058_v10, 2  ;;  %v1066_v14 = vrot.slane %v1058_v10, 3 }
0x1192   :  { %v2929_v15 = vpop.f32.mrf.mxu0 }
0x1193   :  { %v1069_v16 = vadd.f32 %v1065_v13, %v3634_v20  ;;  %v1070_v17 = vadd.f32 %v1066_v14, %v3636_v21 }
0x1194   :  { %v1061_v18 = vpop.f32.mrf.mxu0 }
0x1195   :  { %3161 = vtanh.f32 %v1069_v16  ;;  %v2756_v26 = vmul.f32 -1.442695, %v1069_v16  ;;  %v2757_v27 = vmul.f32 -1.442695, %v1070_v17 }
0x1196   :  { %3163 = vtanh.f32 %v1070_v17  ;;  %v2930_v19 = vpop.f32.mrf.mxu0 }
0x1197   :  { %3165 = vpow2.f32 %v2756_v26 }
0x1198   :  { %3167 = vpow2.f32 %v2757_v27 }
0x11a2   :  { %v3162_v24 = vpop.eup %3161 }
0x11a3   :  { %v3164_v25 = vpop.eup %3163  ;;  %1095 = vrot.lane.b32.xlu0 %v3162_v24, %s3502_s21 }
0x11a4   :  { %1097 = vrot.lane.b32.xlu1 %v3164_v25, %s3502_s21  ;;  %v3166_v4 = vpop.eup %3165 }
0x11a5   :  { %v3168_v28 = vpop.eup %3167  ;;  %v1077_v29 = vadd.f32 1.0, %v3166_v4 }
0x11a6   :  { %v1078_v5 = vadd.f32 1.0, %v3168_v28 }
0x11a7   :  { %3169 = vrcp.f32 %v1077_v29 }
0x11a8   :  { %3171 = vrcp.f32 %v1078_v5 }
0x11b4   :  { %v3170_v30 = vpop.eup %3169 }
0x11b5   :  { %v3172_v32 = vpop.eup %3171  ;;  %v1091_v40 = vmul.f32 %v3170_v30, %v1087_v38 }
0x11b6   :  { %v1092_v41 = vmul.f32 %v3172_v32, %v1088_v39 }
0x1215   :  { %v1096_v31 = vpop.permute.xlu0 %1095 }
0x1216   :  { %v1098_v34 = vpop.permute.xlu1 %1097  ;;  %v1101_v36 = vmul.f32 %v3170_v30, %v1096_v31 }
0x1217   :  { %v1102_v37 = vmul.f32 %v3172_v32, %v1098_v34 }
0x1218   :  { %1105 = vrot.lane.b32.xlu0 %v1101_v36, %s3502_s21 }
0x1219   :  { %1107 = vrot.lane.b32.xlu1 %v1102_v37, %s3502_s21 }
0x128a   :  { %v1106_v42 = vpop.permute.xlu0 %1105 }
0x128b   :  { %v1108_v43 = vpop.permute.xlu1 %1107  ;;  %v1111_v44 = vadd.f32 %v1106_v42, %v1091_v40 }
0x128c   :  { %v1112_v45 = vadd.f32 %v1108_v43, %v1092_v41 }
0x128d   :  { %3173 = vtanh.f32 %v1111_v44  ;;  %v1221_v31 = vrot.slane %v1111_v44, 7 }
0x128e   :  { %3175 = vtanh.f32 %v1112_v45 }
0x129a   :  { %v3174_v46 = vpop.eup %3173 }
0x129b   :  { %v3176_v47 = vpop.eup %3175  ;;  %1117 = vrot.lane.b32.xlu0 %v3174_v46, %s3502_s21 }
0x129c   :  { %1119 = vrot.lane.b32.xlu1 %v3176_v47, %s3502_s21 }
0x130d   :  { %v1118_v49 = vpop.permute.xlu0 %1117 }
0x130e   :  { %v1120_v53 = vpop.permute.xlu1 %1119  ;;  %v3828_v54 = vmul.f32 %v3170_v30, %v1118_v49 }
0x130f   :  { %v3830_v50 = vmul.f32 %v3172_v32, %v1120_v53  ;;  %v1222_v32 = vrot.slane %v1112_v45, 7 }
0x1310   :  { %v1143_v51 = vpack.c.bf16 %v3828_v54, %v3828_v54 }
0x1311   :  { %v1144_v55 = vpack.c.bf16 %v3830_v50, %v3830_v50 }
0x1312   :  { %v1147_v56 = vunpack.c.l.b16 %v1143_v51 }
0x1313   :  { %v1148_v59 = vunpack.c.l.b16 %v1144_v55  ;;  %v3942_v55 = vld [vmem:[#allocation13] sm:$0xff]  }
0x1314   :  { %v1149_v60 = vrot.slane %v1147_v56, 6  ;;  %v3060_v56 = vld [vmem:[#allocation11] sm:$0xff]  }
0x1315   :  { %v1150_v61 = vrot.slane %v1148_v59, 5 }
0x1317   :  { %v1151_v62 = vsel %vm348_vm2, %v1150_v61, %v1149_v60 }
0x1318   :  { %v1152_v63 = vpack.c.b16 %v1151_v62, %v1151_v62 }
0x131a   :  { %1153 = vrot.lane.b32.xlu0 %v1152_v63, %s3490_s20 }
0x138c   :  { %v1154_v6 = vpop.permute.xlu0 %1153 }
0x138d   :  { %2936 = vmatmul.mubr.msk.bf16.vlgmr.msra.gmra.mxu1 %vm225_vm3, %v1154_v6 }
0x138e   :  { %2955 = vmatprep.mubr.msk.bf16.mxu1 %vm3500_vm0, %v3499_v0 }
0x144d   :  { %v1192_v7 = vpop.f32.mrf.mxu1 }
0x144e   :  { %v1199_v8 = vrot.slane %v1192_v7, 1  ;;  %v1200_v9 = vrot.slane %v1192_v7, 2 }
0x144f   :  { %v2937_v10 = vpop.f32.mrf.mxu1 }
0x1450   :  { %v1203_v13 = vadd.f32 %v1199_v8, %v3634_v20  ;;  %v1204_v14 = vadd.f32 %v1200_v9, %v3636_v21 }
0x1451   :  { %v1195_v15 = vpop.f32.mrf.mxu1 }
0x1452   :  { %3177 = vtanh.f32 %v1203_v13  ;;  %v2759_v19 = vmul.f32 -1.442695, %v1203_v13  ;;  %v2760_v24 = vmul.f32 -1.442695, %v1204_v14 }
0x1453   :  { %3179 = vtanh.f32 %v1204_v14  ;;  %v2938_v16 = vpop.f32.mrf.mxu1 }
0x1454   :  { %3181 = vpow2.f32 %v2759_v19  ;;  %v2762_v19 = vld [vmem:[%s4295_s6] ss:$0 sm:$0xff] }
0x1455   :  { %3183 = vpow2.f32 %v2760_v24 }
0x145f   :  { %v3178_v17 = vpop.eup %3177 }
0x1460   :  { %v3180_v18 = vpop.eup %3179  ;;  %1229 = vrot.lane.b32.xlu1 %v3178_v17, %s3502_s21 }
0x1461   :  { %1231 = vrot.lane.b32.xlu0 %v3180_v18, %s3502_s21  ;;  %v3182_v25 = vpop.eup %3181 }
0x1462   :  { %v3184_v26 = vpop.eup %3183  ;;  %v1211_v27 = vadd.f32 1.0, %v3182_v25 }
0x1463   :  { %v1212_v20 = vadd.f32 1.0, %v3184_v26 }
0x1464   :  { %3185 = vrcp.f32 %v1211_v27 }
0x1465   :  { %3187 = vrcp.f32 %v1212_v20 }
0x1471   :  { %v3186_v21 = vpop.eup %3185 }
0x1472   :  { %v3188_v28 = vpop.eup %3187  ;;  %v1225_v34 = vmul.f32 %v3186_v21, %v1221_v31 }
0x1473   :  { %v1226_v36 = vmul.f32 %v3188_v28, %v1222_v32 }
0x14d2   :  { %v1230_v4 = vpop.permute.xlu1 %1229 }
0x14d3   :  { %v1232_v29 = vpop.permute.xlu0 %1231  ;;  %v1235_v5 = vmul.f32 %v3186_v21, %v1230_v4 }
0x14d4   :  { %v1236_v30 = vmul.f32 %v3188_v28, %v1232_v29 }
0x14d5   :  { %1239 = vrot.lane.b32.xlu1 %v1235_v5, %s3502_s21 }
0x14d6   :  { %1241 = vrot.lane.b32.xlu0 %v1236_v30, %s3502_s21 }
0x1547   :  { %v1240_v37 = vpop.permute.xlu1 %1239 }
0x1548   :  { %v1242_v38 = vpop.permute.xlu0 %1241  ;;  %v1245_v39 = vadd.f32 %v1240_v37, %v1225_v34 }
0x1549   :  { %v1246_v40 = vadd.f32 %v1242_v38, %v1226_v36 }
0x154a   :  { %3189 = vtanh.f32 %v1245_v39 }
0x154b   :  { %3191 = vtanh.f32 %v1246_v40 }
0x1557   :  { %v3190_v41 = vpop.eup %3189 }
0x1558   :  { %v3192_v42 = vpop.eup %3191  ;;  %1251 = vrot.lane.b32.xlu1 %v3190_v41, %s3502_s21 }
0x1559   :  { %1253 = vrot.lane.b32.xlu0 %v3192_v42, %s3502_s21 }
0x155c   :  { %325 = vrot.lane.b32.xlu1 %v3656_v52, %s3490_s20 }
0x155d   :  { %327 = vrot.lane.b32.xlu0 %v3652_v48, %s3490_s20 }
0x1560   :  { %458 = vrot.lane.b32.xlu1 %v3684_v35, %s3490_s20  ;;  %v3055_v35 = vld [vmem:[#allocation11 + $0x18] sm:$0xff]  }
0x1561   :  { %460 = vrot.lane.b32.xlu0 %v3682_v33, %s3490_s20  ;;  %2940 = vmatpush3.bf16.msra.mxu0 %v3055_v35 }
0x1562   :  { %2941 = vmatprep.subr.bf16.mxu0 %v3499_v0 }
0x1564   :  { %591 = vrot.lane.b32.xlu1 %v3714_v22, %s3490_s20  ;;  %v3877_v22 = vld [vmem:[#allocation13 + $0x8] sm:$0xff]  }
0x1565   :  { %593 = vrot.lane.b32.xlu0 %v3716_v23, %s3490_s20  ;;  %2952 = vmatpush3.bf16.msra.mxu1 %v3877_v22 }
0x1566   :  { %2953 = vmatprep.subr.bf16.mxu1 %v3499_v0 }
0x1568   :  { %725 = vrot.lane.b32.xlu1 %v3747_v11, %s3490_s20  ;;  %v3056_v11 = vld [vmem:[#allocation11 + $0x10] sm:$0xff]  }
0x1569   :  { %727 = vrot.lane.b32.xlu0 %v3749_v12, %s3490_s20  ;;  %2942 = vmatpush3.bf16.msra.mxu0 %v3056_v11 }
0x156a   :  { %2943 = vmatprep.subr.bf16.mxu0 %v3499_v0  ;;  %2954 = vmatpush3.bf16.msra.mxu1 %v3942_v55 }
0x156b   :  { %2959 = vmatprep.subr.bf16.mxu1 %v3499_v0 }
0x156c   :  { %859 = vrot.lane.b32.xlu1 %v3780_v2, %s3490_s20 }
0x156d   :  { %861 = vrot.lane.b32.xlu0 %v3782_v3, %s3490_s20  ;;  %v3058_v3 = vld [vmem:[#allocation11 + $0x8] sm:$0xff]   ;;  %2956 = vmatmul.mubr.bf16.vlgmr.msra.gmra.mxu1 %v3501_v1 }
0x156e   :  { %2944 = vmatpush3.bf16.msra.mxu0 %v3058_v3  ;;  %2960 = vmatpush3.bf16.msra.mxu1 %v3877_v22 }
0x156f   :  { %2945 = vmatprep.subr.bf16.mxu0 %v3499_v0  ;;  %2963 = vmatprep.mubr.msk.bf16.mxu1 %vm3500_vm0, %v3499_v0 }
0x1570   :  { %993 = vrot.lane.b32.xlu1 %v3807_v57, %s3490_s20  ;;  %2961 = vmatprep.subr.bf16.mxu1 %v3499_v0 }
0x1571   :  { %995 = vrot.lane.b32.xlu0 %v3809_v58, %s3490_s20 }
0x1572   :  { %2946 = vmatpush3.bf16.msra.mxu0 %v3060_v56  ;;  %2962 = vmatpush3.bf16.msra.mxu1 %v3942_v55 }
0x1573   :  { %2967 = vmatprep.subr.bf16.mxu0 %v3499_v0  ;;  %2975 = vmatprep.subr.bf16.mxu1 %v3499_v0 }
0x1574   :  { %1127 = vrot.lane.b32.xlu1 %v3828_v54, %s3490_s20 }
0x1575   :  { %1129 = vrot.lane.b32.xlu0 %v3830_v50, %s3490_s20 }
0x15ca   :  { %v1252_v48 = vpop.permute.xlu1 %1251 }
0x15cb   :  { %v1254_v52 = vpop.permute.xlu0 %1253  ;;  %v1257_v33 = vmul.f32 %v3186_v21, %v1252_v48 }
0x15cc   :  { %v1258_v23 = vmul.f32 %v3188_v28, %v1254_v52 }
0x15cd   :  { %1261 = vrot.lane.b32.xlu1 %v1257_v33, %s3490_s20 }
0x15ce   :  { %1263 = vrot.lane.b32.xlu0 %v1258_v23, %s3490_s20  ;;  %v326_v12 = vpop.permute.xlu1 %325 }
0x15cf   :  { %v328_v2 = vpop.permute.xlu0 %327  ;;  %332 = vst.msk [vmem:[#allocation2] sm:$0x1] %vm331_vm4, %v326_v12  ;;  %337 = vst.msk [vmem:[#allocation3 + $0x7] sm:$0x1] %vm331_vm4, %v326_v12 }
0x15d0   :  { %335 = vst.msk [vmem:[#allocation2 + $0x7] sm:$0x1] %vm334_vm5, %v326_v12  ;;  %339 = vst.msk [vmem:[#allocation3] sm:$0x1] %vm334_vm5, %v326_v12 }
0x15d1   :  { %333 = vst.msk [vmem:[#allocation2 + $0x8] sm:$0x1] %vm331_vm4, %v328_v2  ;;  %338 = vst.msk [vmem:[#allocation3 + $0xf] sm:$0x1] %vm331_vm4, %v328_v2 }
0x15d2   :  { %336 = vst.msk [vmem:[#allocation2 + $0xf] sm:$0x1] %vm334_vm5, %v328_v2  ;;  %340 = vst.msk [vmem:[#allocation3 + $0x8] sm:$0x1] %vm334_vm5, %v328_v2  ;;  %v459_v57 = vpop.permute.xlu1 %458 }
0x15d3   :  { %v461_v58 = vpop.permute.xlu0 %460  ;;  %465 = vst.msk [vmem:[#allocation2] sm:$0x2] %vm464_vm6, %v459_v57  ;;  %470 = vst.msk [vmem:[#allocation3 + $0x5] sm:$0x2] %vm464_vm6, %v459_v57 }
0x15d4   :  { %468 = vst.msk [vmem:[#allocation2 + $0x5] sm:$0x2] %vm467_vm7, %v459_v57  ;;  %472 = vst.msk [vmem:[#allocation3] sm:$0x2] %vm467_vm7, %v459_v57 }
0x15d5   :  { %466 = vst.msk [vmem:[#allocation2 + $0x8] sm:$0x2] %vm464_vm6, %v461_v58  ;;  %471 = vst.msk [vmem:[#allocation3 + $0xd] sm:$0x2] %vm464_vm6, %v461_v58 }
0x15d6   :  { %469 = vst.msk [vmem:[#allocation2 + $0xd] sm:$0x2] %vm467_vm7, %v461_v58  ;;  %473 = vst.msk [vmem:[#allocation3 + $0x8] sm:$0x2] %vm467_vm7, %v461_v58  ;;  %v592_v43 = vpop.permute.xlu1 %591 }
0x15d7   :  { %v594_v44 = vpop.permute.xlu0 %593  ;;  %598 = vst.msk [vmem:[#allocation2] sm:$0x4] %vm597_vm8, %v592_v43  ;;  %603 = vst.msk [vmem:[#allocation3 + $0x3] sm:$0x4] %vm597_vm8, %v592_v43 }
0x15d8   :  { %601 = vst.msk [vmem:[#allocation2 + $0x3] sm:$0x4] %vm600_vm9, %v592_v43  ;;  %605 = vst.msk [vmem:[#allocation3] sm:$0x4] %vm600_vm9, %v592_v43 }
0x15d9   :  { %599 = vst.msk [vmem:[#allocation2 + $0x8] sm:$0x4] %vm597_vm8, %v594_v44  ;;  %604 = vst.msk [vmem:[#allocation3 + $0xb] sm:$0x4] %vm597_vm8, %v594_v44 }
0x15da   :  { %602 = vst.msk [vmem:[#allocation2 + $0xb] sm:$0x4] %vm600_vm9, %v594_v44  ;;  %606 = vst.msk [vmem:[#allocation3 + $0x8] sm:$0x4] %vm600_vm9, %v594_v44  ;;  %v726_v45 = vpop.permute.xlu1 %725 }
0x15db   :  { %v728_v46 = vpop.permute.xlu0 %727  ;;  %732 = vst.msk [vmem:[#allocation2] sm:$0x8] %vm731_vm10, %v726_v45  ;;  %737 = vst.msk [vmem:[#allocation3 + $0x1] sm:$0x8] %vm731_vm10, %v726_v45 }
0x15dc   :  { %735 = vst.msk [vmem:[#allocation2 + $0x1] sm:$0x8] %vm734_vm11, %v726_v45  ;;  %739 = vst.msk [vmem:[#allocation3] sm:$0x8] %vm734_vm11, %v726_v45 }
0x15dd   :  { %733 = vst.msk [vmem:[#allocation2 + $0x8] sm:$0x8] %vm731_vm10, %v728_v46  ;;  %738 = vst.msk [vmem:[#allocation3 + $0x9] sm:$0x8] %vm731_vm10, %v728_v46 }
0x15de   :  { %736 = vst.msk [vmem:[#allocation2 + $0x9] sm:$0x8] %vm734_vm11, %v728_v46  ;;  %740 = vst.msk [vmem:[#allocation3 + $0x8] sm:$0x8] %vm734_vm11, %v728_v46  ;;  %v860_v47 = vpop.permute.xlu1 %859 }
0x15df   :  { %v862_v49 = vpop.permute.xlu0 %861  ;;  %866 = vst.msk [vmem:[#allocation2] sm:$0x10] %vm4302_vm12, %v860_v47  ;;  %871 = vst.msk [vmem:[#allocation3 - $0x1] sm:$0x10] %vm4302_vm12, %v860_v47 }
0x15e0   :  { %869 = vst.msk [vmem:[#allocation2 - $0x1] sm:$0x10] %vm4301_vm13, %v860_v47  ;;  %873 = vst.msk [vmem:[#allocation3] sm:$0x10] %vm4301_vm13, %v860_v47 }
0x15e1   :  { %867 = vst.msk [vmem:[#allocation2 + $0x8] sm:$0x10] %vm4302_vm12, %v862_v49  ;;  %872 = vst.msk [vmem:[#allocation3 + $0x7] sm:$0x10] %vm4302_vm12, %v862_v49  ;;  %vm1136_vm12 = vcmask 260230  }
0x15e2   :  { %870 = vst.msk [vmem:[#allocation2 + $0x7] sm:$0x10] %vm4301_vm13, %v862_v49  ;;  %874 = vst.msk [vmem:[#allocation3 + $0x8] sm:$0x10] %vm4301_vm13, %v862_v49  ;;  %v994_v53 = vpop.permute.xlu1 %993  ;;  %vm1133_vm13 = vcmask 129030  }
0x15e3   :  { %v996_v54 = vpop.permute.xlu0 %995  ;;  %1000 = vst.msk [vmem:[#allocation2] sm:$0x20] %vm4304_vm14, %v994_v53  ;;  %1005 = vst.msk [vmem:[#allocation3 - $0x3] sm:$0x20] %vm4304_vm14, %v994_v53 }
0x15e4   :  { %1003 = vst.msk [vmem:[#allocation2 - $0x3] sm:$0x20] %vm4303_vm15, %v994_v53  ;;  %1007 = vst.msk [vmem:[#allocation3] sm:$0x20] %vm4303_vm15, %v994_v53 }
0x15e5   :  { %1001 = vst.msk [vmem:[#allocation2 + $0x8] sm:$0x20] %vm4304_vm14, %v996_v54  ;;  %1006 = vst.msk [vmem:[#allocation3 + $0x5] sm:$0x20] %vm4304_vm14, %v996_v54  ;;  %vm1270_vm14 = vcmask 261255  }
0x15e6   :  { %1004 = vst.msk [vmem:[#allocation2 + $0x5] sm:$0x20] %vm4303_vm15, %v996_v54  ;;  %1008 = vst.msk [vmem:[#allocation3 + $0x8] sm:$0x20] %vm4303_vm15, %v996_v54  ;;  %v1128_v50 = vpop.permute.xlu1 %1127  ;;  %vm1267_vm15 = vcmask 130055  }
0x15e7   :  { %v1130_v51 = vpop.permute.xlu0 %1129  ;;  %1134 = vst.msk [vmem:[#allocation2] sm:$0x40] %vm1133_vm13, %v1128_v50  ;;  %1139 = vst.msk [vmem:[#allocation3 - $0x5] sm:$0x40] %vm1133_vm13, %v1128_v50 }
0x15e8   :  { %1137 = vst.msk [vmem:[#allocation2 - $0x5] sm:$0x40] %vm1136_vm12, %v1128_v50  ;;  %1141 = vst.msk [vmem:[#allocation3] sm:$0x40] %vm1136_vm12, %v1128_v50 }
0x15e9   :  { %1135 = vst.msk [vmem:[#allocation2 + $0x8] sm:$0x40] %vm1133_vm13, %v1130_v51  ;;  %1140 = vst.msk [vmem:[#allocation3 + $0x3] sm:$0x40] %vm1133_vm13, %v1130_v51 }
0x15ea   :  { %1138 = vst.msk [vmem:[#allocation2 + $0x3] sm:$0x40] %vm1136_vm12, %v1130_v51  ;;  %1142 = vst.msk [vmem:[#allocation3 + $0x8] sm:$0x40] %vm1136_vm12, %v1130_v51 }
0x162d   :  { %v1539_v15 = vpop.f32.mrf.mxu1 }
0x162e   :  { %v1546_v27 = vrot.slane %v1539_v15, 1 }
0x162f   :  { %v2957_v16 = vpop.f32.mrf.mxu1 }
0x1631   :  { %v1542_v17 = vpop.f32.mrf.mxu1 }
0x1633   :  { %v2958_v18 = vpop.f32.mrf.mxu1 }
0x163f   :  { %v1262_v59 = vpop.permute.xlu1 %1261 }
0x1640   :  { %v1264_v60 = vpop.permute.xlu0 %1263  ;;  %1268 = vst.msk [vmem:[#allocation2] sm:$0x80] %vm1267_vm15, %v1262_v59  ;;  %1273 = vst.msk [vmem:[#allocation3 - $0x7] sm:$0x80] %vm1267_vm15, %v1262_v59 }
0x1641   :  { %1271 = vst.msk [vmem:[#allocation2 - $0x7] sm:$0x80] %vm1270_vm14, %v1262_v59  ;;  %1275 = vst.msk [vmem:[#allocation3] sm:$0x80] %vm1270_vm14, %v1262_v59 }
0x1642   :  { %1269 = vst.msk [vmem:[#allocation2 + $0x8] sm:$0x80] %vm1267_vm15, %v1264_v60  ;;  %1274 = vst.msk [vmem:[#allocation3 + $0x1] sm:$0x80] %vm1267_vm15, %v1264_v60 }
0x1643   :  { %1272 = vst.msk [vmem:[#allocation2 + $0x1] sm:$0x80] %vm1270_vm14, %v1264_v60  ;;  %1276 = vst.msk [vmem:[#allocation3 + $0x8] sm:$0x80] %vm1270_vm14, %v1264_v60 }
0x1648   :  { %v1393_v61 = vld [vmem:[#allocation3] sm:$0xff]  ;;  %v1277_v9 = vld [vmem:[#allocation2] sm:$0xff] }
0x164a   :  { %v1394_v62 = vld [vmem:[#allocation3 + $0x8] sm:$0xff]  ;;  %v1278_v8 = vld [vmem:[#allocation2 + $0x8] sm:$0xff] }
0x164b   :  { %v3042_v63 = vpack.i.bf16 %v1394_v62, %v1393_v61 }
0x164d   :  { %3043 = vrot.lane.b32.xlu1 %v3042_v63, %s3502_s21 }
0x16bf   :  { %v3044_v6 = vpop.permute.xlu1 %3043 }
0x16c0   :  { %v3046_v1 = vunpack.i.h.bf16 %v3044_v6  ;;  %v3045_v7 = vunpack.i.l.bf16 %v3044_v6 }
0x16c2   :  { %v1404_v10 = vsel %vm225_vm3, %v1278_v8, %v3046_v1  ;;  %v1403_v13 = vsel %vm225_vm3, %v1277_v9, %v3045_v7 }
0x16c3   :  { %v1405_v14 = vpack.c.bf16 %v1404_v10, %v1403_v13 }
0x16c5   :  { %2948 = vmatmul.mubr.msk.bf16.vlgmr.msra.gmra.mxu0 %vm164_vm1, %v1405_v14 }
0x16c6   :  { %2968 = vmatpush3.bf16.msra.mxu0 %v3877_v22  ;;  %2971 = vmatprep.mubr.msk.bf16.mxu0 %vm3500_vm0, %v3499_v0 }
0x16c7   :  { %2969 = vmatprep.subr.bf16.mxu0 %v3499_v0 }
0x16ca   :  { %2970 = vmatpush3.bf16.msra.mxu0 %v3942_v55 }
0x16cb   :  { %2983 = vmatprep.subr.bf16.mxu0 %v3499_v0 }
0x1785   :  { %v1482_v24 = vpop.f32.mrf.mxu0 }
0x1786   :  { %v3975_v25 = vadd.f32 %v2762_v19, %v1482_v24 }
0x1787   :  { %v2949_v26 = vpop.f32.mrf.mxu0 }
0x1788   :  { %v1549_v20 = vadd.f32 %v1539_v15, %v3975_v25 }
0x1789   :  { %v1485_v21 = vpop.f32.mrf.mxu0 }
0x178a   :  { %v3978_v4 = vadd.f32 %v2762_v19, %v1485_v21  ;;  %3193 = vtanh.f32 %v1549_v20  ;;  %v2770_v31 = vmul.f32 -1.442695, %v1549_v20 }
0x178b   :  { %v2950_v28 = vpop.f32.mrf.mxu0 }
0x178c   :  { %v1550_v29 = vadd.f32 %v1546_v27, %v3978_v4 }
0x178e   :  { %3195 = vtanh.f32 %v1550_v29  ;;  %v2771_v32 = vmul.f32 -1.442695, %v1550_v29 }
0x178f   :  { %3197 = vpow2.f32 %v2770_v31 }
0x1790   :  { %3199 = vpow2.f32 %v2771_v32 }
0x1797   :  { %v3194_v5 = vpop.eup %3193 }
0x1798   :  { %1569 = vrot.lane.b32.xlu1 %v3194_v5, %s3502_s21 }
0x179b   :  { %v3196_v30 = vpop.eup %3195 }
0x179c   :  { %1571 = vrot.lane.b32.xlu0 %v3196_v30, %s3502_s21  ;;  %v3198_v34 = vpop.eup %3197 }
0x179d   :  { %v1557_v36 = vadd.f32 1.0, %v3198_v34  ;;  %v3200_v37 = vpop.eup %3199 }
0x179e   :  { %v1558_v38 = vadd.f32 1.0, %v3200_v37 }
0x179f   :  { %3201 = vrcp.f32 %v1557_v36 }
0x17a0   :  { %3203 = vrcp.f32 %v1558_v38 }
0x17ac   :  { %v3202_v39 = vpop.eup %3201 }
0x17ad   :  { %v3204_v42 = vpop.eup %3203  ;;  %v1565_v33 = vmul.f32 0.0, %v3202_v39 }
0x17ae   :  { %v1566_v11 = vmul.f32 0.0, %v3204_v42 }
0x180a   :  { %v1570_v40 = vpop.permute.xlu1 %1569 }
0x180b   :  { %v1575_v41 = vmul.f32 %v3202_v39, %v1570_v40 }
0x180d   :  { %1579 = vrot.lane.b32.xlu1 %v1575_v41, %s3502_s21 }
0x180e   :  { %v1572_v48 = vpop.permute.xlu0 %1571 }
0x180f   :  { %v1576_v52 = vmul.f32 %v3204_v42, %v1572_v48 }
0x1811   :  { %1581 = vrot.lane.b32.xlu0 %v1576_v52, %s3502_s21 }
0x187f   :  { %v1580_v35 = vpop.permute.xlu1 %1579 }
0x1880   :  { %v3985_v23 = vadd.f32 %v1580_v35, %v1565_v33 }
0x1882   :  { %3205 = vtanh.f32 %v3985_v23  ;;  %v1687_v28 = vrot.slane %v3985_v23, 7 }
0x1883   :  { %v1582_v12 = vpop.permute.xlu0 %1581 }
0x1884   :  { %v1586_v2 = vadd.f32 %v1582_v12, %v1566_v11 }
0x1886   :  { %3207 = vtanh.f32 %v1586_v2  ;;  %v1688_v20 = vrot.slane %v1586_v2, 7 }
0x188f   :  { %v3206_v3 = vpop.eup %3205 }
0x1890   :  { %1591 = vrot.lane.b32.xlu1 %v3206_v3, %s3502_s21 }
0x1893   :  { %v3208_v57 = vpop.eup %3207 }
0x1894   :  { %1593 = vrot.lane.b32.xlu0 %v3208_v57, %s3502_s21 }
0x1902   :  { %v1592_v58 = vpop.permute.xlu1 %1591 }
0x1903   :  { %v3990_v43 = vmul.f32 %v3202_v39, %v1592_v58 }
0x1905   :  { %v1611_v46 = vpack.c.bf16 %v3990_v43, %v3990_v43 }
0x1906   :  { %v1594_v44 = vpop.permute.xlu0 %1593 }
0x1907   :  { %v3992_v45 = vmul.f32 %v3204_v42, %v1594_v44  ;;  %v1615_v53 = vunpack.c.l.b16 %v1611_v46 }
0x1909   :  { %v1612_v47 = vpack.c.bf16 %v3992_v45, %v3992_v45 }
0x190b   :  { %v1616_v49 = vunpack.c.l.b16 %v1612_v47 }
0x190d   :  { %v1617_v54 = vrot.slane %v1616_v49, 7 }
0x190f   :  { %v1618_v50 = vsel %vm348_vm2, %v1617_v54, %v1615_v53 }
0x1910   :  { %v1619_v51 = vpack.c.b16 %v1618_v50, %v1618_v50 }
0x1912   :  { %1620 = vrot.lane.b32.xlu0 %v1619_v51, %s3490_s20 }
0x1984   :  { %v1621_v56 = vpop.permute.xlu0 %1620 }
0x1985   :  { %2964 = vmatmul.mubr.msk.bf16.vlgmr.msra.gmra.mxu1 %vm225_vm3, %v1621_v56 }
0x1986   :  { %2976 = vmatpush3.bf16.msra.mxu1 %v3877_v22  ;;  %2979 = vmatprep.mubr.msk.bf16.mxu1 %vm3500_vm0, %v3499_v0 }
0x1987   :  { %2977 = vmatprep.subr.bf16.mxu1 %v3499_v0 }
0x198a   :  { %2978 = vmatpush3.bf16.msra.mxu1 %v3942_v55 }
0x198b   :  { %2991 = vmatprep.subr.bf16.mxu1 %v3499_v0 }
0x1a45   :  { %v1659_v59 = vpop.f32.mrf.mxu1 }
0x1a46   :  { %v1666_v60 = vrot.slane %v1659_v59, 7  ;;  %v1670_v61 = vadd.f32 %v1659_v59, %v3978_v4 }
0x1a47   :  { %v2965_v62 = vpop.f32.mrf.mxu1 }
0x1a48   :  { %v1669_v63 = vadd.f32 %v1666_v60, %v3975_v25  ;;  %3209 = vtanh.f32 %v1670_v61  ;;  %v2774_v9 = vmul.f32 -1.442695, %v1670_v61 }
0x1a49   :  { %v1662_v6 = vpop.f32.mrf.mxu1 }
0x1a4a   :  { %3211 = vtanh.f32 %v1669_v63  ;;  %v2773_v10 = vmul.f32 -1.442695, %v1669_v63 }
0x1a4b   :  { %v2966_v1 = vpop.f32.mrf.mxu1  ;;  %3213 = vpow2.f32 %v2774_v9 }
0x1a4c   :  { %3215 = vpow2.f32 %v2773_v10 }
0x1a55   :  { %v3210_v7 = vpop.eup %3209 }
0x1a56   :  { %1697 = vrot.lane.b32.xlu0 %v3210_v7, %s3502_s21 }
0x1a57   :  { %v3212_v8 = vpop.eup %3211 }
0x1a58   :  { %1695 = vrot.lane.b32.xlu1 %v3212_v8, %s3502_s21  ;;  %v3214_v13 = vpop.eup %3213 }
0x1a59   :  { %v3216_v14 = vpop.eup %3215  ;;  %v1678_v15 = vadd.f32 1.0, %v3214_v13 }
0x1a5a   :  { %v1677_v16 = vadd.f32 1.0, %v3216_v14 }
0x1a5b   :  { %3217 = vrcp.f32 %v1678_v15 }
0x1a5c   :  { %3219 = vrcp.f32 %v1677_v16 }
0x1a68   :  { %v3218_v17 = vpop.eup %3217 }
0x1a69   :  { %v3220_v24 = vpop.eup %3219  ;;  %v1692_v21 = vmul.f32 %v3218_v17, %v1688_v20 }
0x1a6a   :  { %v1691_v30 = vmul.f32 %v3220_v24, %v1687_v28 }
0x1ac8   :  { %v1698_v18 = vpop.permute.xlu0 %1697 }
0x1ac9   :  { %v1702_v19 = vmul.f32 %v3218_v17, %v1698_v18 }
0x1aca   :  { %v1696_v26 = vpop.permute.xlu1 %1695 }
0x1acb   :  { %1707 = vrot.lane.b32.xlu0 %v1702_v19, %s3502_s21  ;;  %v1701_v27 = vmul.f32 %v3220_v24, %v1696_v26 }
0x1acd   :  { %1705 = vrot.lane.b32.xlu1 %v1701_v27, %s3502_s21 }
0x1b3d   :  { %v1708_v29 = vpop.permute.xlu0 %1707 }
0x1b3e   :  { %v4014_v5 = vadd.f32 %v1708_v29, %v1692_v21 }
0x1b3f   :  { %v1706_v31 = vpop.permute.xlu1 %1705 }
0x1b40   :  { %3221 = vtanh.f32 %v4014_v5  ;;  %v1711_v32 = vadd.f32 %v1706_v31, %v1691_v30  ;;  %v1815_v9 = vrot.slane %v4014_v5, 7 }
0x1b42   :  { %3223 = vtanh.f32 %v1711_v32  ;;  %v1814_v8 = vrot.slane %v1711_v32, 7 }
0x1b4d   :  { %v3222_v34 = vpop.eup %3221 }
0x1b4e   :  { %1719 = vrot.lane.b32.xlu0 %v3222_v34, %s3502_s21 }
0x1b4f   :  { %v3224_v36 = vpop.eup %3223 }
0x1b50   :  { %1717 = vrot.lane.b32.xlu1 %v3224_v36, %s3502_s21 }
0x1bc0   :  { %v1720_v37 = vpop.permute.xlu0 %1719 }
0x1bc1   :  { %v4019_v38 = vmul.f32 %v3218_v17, %v1720_v37 }
0x1bc2   :  { %v1718_v39 = vpop.permute.xlu1 %1717 }
0x1bc3   :  { %v4021_v40 = vmul.f32 %v3220_v24, %v1718_v39  ;;  %v1738_v41 = vpack.c.bf16 %v4019_v38, %v4019_v38 }
0x1bc5   :  { %v1737_v42 = vpack.c.bf16 %v4021_v40, %v4021_v40  ;;  %v1742_v52 = vunpack.c.l.b16 %v1738_v41 }
0x1bc7   :  { %v1741_v48 = vunpack.c.l.b16 %v1737_v42 }
0x1bc9   :  { %v1743_v33 = vrot.slane %v1741_v48, 1 }
0x1bcb   :  { %v1744_v35 = vsel %vm348_vm2, %v1742_v52, %v1743_v33 }
0x1bcc   :  { %v1745_v23 = vpack.c.b16 %v1744_v35, %v1744_v35 }
0x1bce   :  { %1746 = vrot.lane.b32.xlu1 %v1745_v23, %s3490_s20 }
0x1c40   :  { %v1747_v11 = vpop.permute.xlu1 %1746 }
0x1c41   :  { %2972 = vmatmul.mubr.msk.bf16.vlgmr.msra.gmra.mxu0 %vm225_vm3, %v1747_v11 }
0x1c42   :  { %2984 = vmatpush3.bf16.msra.mxu0 %v3877_v22  ;;  %2987 = vmatprep.mubr.msk.bf16.mxu0 %vm3500_vm0, %v3499_v0 }
0x1c43   :  { %2985 = vmatprep.subr.bf16.mxu0 %v3499_v0 }
0x1c46   :  { %2986 = vmatpush3.bf16.msra.mxu0 %v3942_v55 }
0x1c47   :  { %2999 = vmatprep.subr.bf16.mxu0 %v3499_v0 }
0x1d01   :  { %v1785_v12 = vpop.f32.mrf.mxu0 }
0x1d02   :  { %v1792_v2 = vrot.slane %v1785_v12, 6  ;;  %v1793_v3 = vrot.slane %v1785_v12, 7 }
0x1d03   :  { %v2973_v57 = vpop.f32.mrf.mxu0 }
0x1d04   :  { %v1796_v58 = vadd.f32 %v1792_v2, %v3975_v25  ;;  %v1797_v44 = vadd.f32 %v1793_v3, %v3978_v4 }
0x1d05   :  { %v1788_v46 = vpop.f32.mrf.mxu0 }
0x1d06   :  { %3225 = vtanh.f32 %v1796_v58  ;;  %v2776_v54 = vmul.f32 -1.442695, %v1796_v58  ;;  %v2777_v50 = vmul.f32 -1.442695, %v1797_v44 }
0x1d07   :  { %3227 = vtanh.f32 %v1797_v44  ;;  %v2974_v47 = vpop.f32.mrf.mxu0 }
0x1d08   :  { %3229 = vpow2.f32 %v2776_v54 }
0x1d09   :  { %3231 = vpow2.f32 %v2777_v50 }
0x1d13   :  { %v3226_v49 = vpop.eup %3225 }
0x1d14   :  { %v3228_v53 = vpop.eup %3227  ;;  %1822 = vrot.lane.b32.xlu0 %v3226_v49, %s3502_s21 }
0x1d15   :  { %1824 = vrot.lane.b32.xlu1 %v3228_v53, %s3502_s21  ;;  %v3230_v51 = vpop.eup %3229 }
0x1d16   :  { %v3232_v56 = vpop.eup %3231  ;;  %v1804_v59 = vadd.f32 1.0, %v3230_v51 }
0x1d17   :  { %v1805_v60 = vadd.f32 1.0, %v3232_v56 }
0x1d18   :  { %3233 = vrcp.f32 %v1804_v59 }
0x1d19   :  { %3235 = vrcp.f32 %v1805_v60 }
0x1d25   :  { %v3234_v61 = vpop.eup %3233 }
0x1d26   :  { %v3236_v63 = vpop.eup %3235  ;;  %v1818_v10 = vmul.f32 %v3234_v61, %v1814_v8 }
0x1d27   :  { %v1819_v13 = vmul.f32 %v3236_v63, %v1815_v9 }
0x1d86   :  { %v1823_v62 = vpop.permute.xlu0 %1822 }
0x1d87   :  { %v1825_v6 = vpop.permute.xlu1 %1824  ;;  %v1828_v1 = vmul.f32 %v3234_v61, %v1823_v62 }
0x1d88   :  { %v1829_v7 = vmul.f32 %v3236_v63, %v1825_v6 }
0x1d89   :  { %1832 = vrot.lane.b32.xlu0 %v1828_v1, %s3502_s21 }
0x1d8a   :  { %1834 = vrot.lane.b32.xlu1 %v1829_v7, %s3502_s21 }
0x1dfb   :  { %v1833_v14 = vpop.permute.xlu0 %1832 }
0x1dfc   :  { %v1835_v15 = vpop.permute.xlu1 %1834  ;;  %v4043_v16 = vadd.f32 %v1833_v14, %v1818_v10 }
0x1dfd   :  { %v4045_v17 = vadd.f32 %v1835_v15, %v1819_v13 }
0x1dfe   :  { %3237 = vtanh.f32 %v4043_v16  ;;  %v1942_v51 = vrot.slane %v4043_v16, 7 }
0x1dff   :  { %3239 = vtanh.f32 %v4045_v17  ;;  %v1943_v56 = vrot.slane %v4045_v17, 7 }
0x1e0b   :  { %v3238_v18 = vpop.eup %3237 }
0x1e0c   :  { %v3240_v19 = vpop.eup %3239  ;;  %1844 = vrot.lane.b32.xlu0 %v3238_v18, %s3502_s21 }
0x1e0d   :  { %1846 = vrot.lane.b32.xlu1 %v3240_v19, %s3502_s21 }
0x1e7e   :  { %v1845_v24 = vpop.permute.xlu0 %1844 }
0x1e7f   :  { %v1847_v26 = vpop.permute.xlu1 %1846  ;;  %v4051_v27 = vmul.f32 %v3234_v61, %v1845_v24 }
0x1e80   :  { %v4053_v20 = vmul.f32 %v3236_v63, %v1847_v26 }
0x1e81   :  { %v1864_v21 = vpack.c.bf16 %v4051_v27, %v4051_v27 }
0x1e82   :  { %v1865_v28 = vpack.c.bf16 %v4053_v20, %v4053_v20 }
0x1e83   :  { %v1868_v29 = vunpack.c.l.b16 %v1864_v21 }
0x1e84   :  { %v1869_v5 = vunpack.c.l.b16 %v1865_v28 }
0x1e85   :  { %v1870_v30 = vrot.slane %v1868_v29, 2 }
0x1e86   :  { %v1871_v31 = vrot.slane %v1869_v5, 1 }
0x1e88   :  { %v1872_v32 = vsel %vm348_vm2, %v1871_v31, %v1870_v30 }
0x1e89   :  { %v1873_v34 = vpack.c.b16 %v1872_v32, %v1872_v32 }
0x1e8b   :  { %1874 = vrot.lane.b32.xlu0 %v1873_v34, %s3490_s20 }
0x1efd   :  { %v1875_v36 = vpop.permute.xlu0 %1874 }
0x1efe   :  { %2980 = vmatmul.mubr.msk.bf16.vlgmr.msra.gmra.mxu1 %vm225_vm3, %v1875_v36 }
0x1eff   :  { %2992 = vmatpush3.bf16.msra.mxu1 %v3877_v22  ;;  %2995 = vmatprep.mubr.msk.bf16.mxu1 %vm3500_vm0, %v3499_v0 }
0x1f00   :  { %2993 = vmatprep.subr.bf16.mxu1 %v3499_v0 }
0x1f03   :  { %2994 = vmatpush3.bf16.msra.mxu1 %v3942_v55 }
0x1f04   :  { %3007 = vmatprep.subr.bf16.mxu1 %v3499_v0 }
0x1fbe   :  { %v1913_v37 = vpop.f32.mrf.mxu1 }
0x1fbf   :  { %v1920_v39 = vrot.slane %v1913_v37, 5  ;;  %v1921_v41 = vrot.slane %v1913_v37, 6 }
0x1fc0   :  { %v2981_v42 = vpop.f32.mrf.mxu1 }
0x1fc1   :  { %v1924_v48 = vadd.f32 %v1920_v39, %v3975_v25  ;;  %v1925_v52 = vadd.f32 %v1921_v41, %v3978_v4 }
0x1fc2   :  { %v1916_v33 = vpop.f32.mrf.mxu1 }
0x1fc3   :  { %3241 = vtanh.f32 %v1924_v48  ;;  %v2779_v12 = vmul.f32 -1.442695, %v1924_v48  ;;  %v2780_v2 = vmul.f32 -1.442695, %v1925_v52 }
0x1fc4   :  { %3243 = vtanh.f32 %v1925_v52  ;;  %v2982_v35 = vpop.f32.mrf.mxu1 }
0x1fc5   :  { %3245 = vpow2.f32 %v2779_v12 }
0x1fc6   :  { %3247 = vpow2.f32 %v2780_v2 }
0x1fd0   :  { %v3242_v23 = vpop.eup %3241 }
0x1fd1   :  { %v3244_v11 = vpop.eup %3243  ;;  %1950 = vrot.lane.b32.xlu1 %v3242_v23, %s3502_s21 }
0x1fd2   :  { %1952 = vrot.lane.b32.xlu0 %v3244_v11, %s3502_s21  ;;  %v3246_v3 = vpop.eup %3245 }
0x1fd3   :  { %v3248_v57 = vpop.eup %3247  ;;  %v1932_v58 = vadd.f32 1.0, %v3246_v3 }
0x1fd4   :  { %v1933_v44 = vadd.f32 1.0, %v3248_v57 }
0x1fd5   :  { %3249 = vrcp.f32 %v1932_v58 }
0x1fd6   :  { %3251 = vrcp.f32 %v1933_v44 }
0x1fe2   :  { %v3250_v46 = vpop.eup %3249 }
0x1fe3   :  { %v3252_v49 = vpop.eup %3251  ;;  %v1946_v59 = vmul.f32 %v3250_v46, %v1942_v51 }
0x1fe4   :  { %v1947_v60 = vmul.f32 %v3252_v49, %v1943_v56 }
0x2043   :  { %v1951_v47 = vpop.permute.xlu1 %1950 }
0x2044   :  { %v1953_v53 = vpop.permute.xlu0 %1952  ;;  %v1956_v54 = vmul.f32 %v3250_v46, %v1951_v47 }
0x2045   :  { %v1957_v50 = vmul.f32 %v3252_v49, %v1953_v53 }
0x2046   :  { %1960 = vrot.lane.b32.xlu1 %v1956_v54, %s3502_s21 }
0x2047   :  { %1962 = vrot.lane.b32.xlu0 %v1957_v50, %s3502_s21 }
0x20b8   :  { %v1961_v61 = vpop.permute.xlu1 %1960 }
0x20b9   :  { %v1963_v62 = vpop.permute.xlu0 %1962  ;;  %v4076_v63 = vadd.f32 %v1961_v61, %v1946_v59 }
0x20ba   :  { %v4078_v6 = vadd.f32 %v1963_v62, %v1947_v60 }
0x20bb   :  { %3253 = vtanh.f32 %v4076_v63  ;;  %v2070_v58 = vrot.slane %v4076_v63, 7 }
0x20bc   :  { %3255 = vtanh.f32 %v4078_v6  ;;  %v2071_v44 = vrot.slane %v4078_v6, 7 }
0x20c8   :  { %v3254_v1 = vpop.eup %3253 }
0x20c9   :  { %v3256_v7 = vpop.eup %3255  ;;  %1972 = vrot.lane.b32.xlu1 %v3254_v1, %s3502_s21 }
0x20ca   :  { %1974 = vrot.lane.b32.xlu0 %v3256_v7, %s3502_s21 }
0x213b   :  { %v1973_v8 = vpop.permute.xlu1 %1972 }
0x213c   :  { %v1975_v9 = vpop.permute.xlu0 %1974  ;;  %v4084_v10 = vmul.f32 %v3250_v46, %v1973_v8 }
0x213d   :  { %v4086_v13 = vmul.f32 %v3252_v49, %v1975_v9 }
0x213e   :  { %v1992_v14 = vpack.c.bf16 %v4084_v10, %v4084_v10 }
0x213f   :  { %v1993_v15 = vpack.c.bf16 %v4086_v13, %v4086_v13 }
0x2140   :  { %v1996_v16 = vunpack.c.l.b16 %v1992_v14 }
0x2141   :  { %v1997_v17 = vunpack.c.l.b16 %v1993_v15 }
0x2142   :  { %v1998_v18 = vrot.slane %v1996_v16, 3 }
0x2143   :  { %v1999_v19 = vrot.slane %v1997_v17, 2 }
0x2145   :  { %v2000_v24 = vsel %vm348_vm2, %v1999_v19, %v1998_v18 }
0x2146   :  { %v2001_v26 = vpack.c.b16 %v2000_v24, %v2000_v24 }
0x2148   :  { %2002 = vrot.lane.b32.xlu1 %v2001_v26, %s3490_s20 }
0x21ba   :  { %v2003_v21 = vpop.permute.xlu1 %2002 }
0x21bb   :  { %2988 = vmatmul.mubr.msk.bf16.vlgmr.msra.gmra.mxu0 %vm225_vm3, %v2003_v21 }
0x21bc   :  { %3000 = vmatpush3.bf16.msra.mxu0 %v3877_v22  ;;  %3003 = vmatprep.mubr.msk.bf16.mxu0 %vm3500_vm0, %v3499_v0 }
0x21bd   :  { %3001 = vmatprep.subr.bf16.mxu0 %v3499_v0 }
0x21c0   :  { %3002 = vmatpush3.bf16.msra.mxu0 %v3942_v55 }
0x21c1   :  { %3015 = vmatprep.subr.bf16.mxu0 %v3499_v0 }
0x227b   :  { %v2041_v28 = vpop.f32.mrf.mxu0 }
0x227c   :  { %v2048_v29 = vrot.slane %v2041_v28, 4  ;;  %v2049_v5 = vrot.slane %v2041_v28, 5 }
0x227d   :  { %v2989_v30 = vpop.f32.mrf.mxu0 }
0x227e   :  { %v2052_v31 = vadd.f32 %v2048_v29, %v3975_v25  ;;  %v2053_v32 = vadd.f32 %v2049_v5, %v3978_v4 }
0x227f   :  { %v2044_v34 = vpop.f32.mrf.mxu0 }
0x2280   :  { %3257 = vtanh.f32 %v2052_v31  ;;  %v2782_v41 = vmul.f32 -1.442695, %v2052_v31  ;;  %v2783_v42 = vmul.f32 -1.442695, %v2053_v32 }
0x2281   :  { %3259 = vtanh.f32 %v2053_v32  ;;  %v2990_v36 = vpop.f32.mrf.mxu0 }
0x2282   :  { %3261 = vpow2.f32 %v2782_v41 }
0x2283   :  { %3263 = vpow2.f32 %v2783_v42 }
0x228d   :  { %v3258_v37 = vpop.eup %3257 }
0x228e   :  { %v3260_v39 = vpop.eup %3259  ;;  %2078 = vrot.lane.b32.xlu0 %v3258_v37, %s3502_s21 }
0x228f   :  { %2080 = vrot.lane.b32.xlu1 %v3260_v39, %s3502_s21  ;;  %v3262_v48 = vpop.eup %3261 }
0x2290   :  { %v3264_v52 = vpop.eup %3263  ;;  %v2060_v33 = vadd.f32 1.0, %v3262_v48 }
0x2291   :  { %v2061_v35 = vadd.f32 1.0, %v3264_v52 }
0x2292   :  { %3265 = vrcp.f32 %v2060_v33 }
0x2293   :  { %3267 = vrcp.f32 %v2061_v35 }
0x229f   :  { %v3266_v23 = vpop.eup %3265 }
0x22a0   :  { %v3268_v12 = vpop.eup %3267  ;;  %v2074_v46 = vmul.f32 %v3266_v23, %v2070_v58 }
0x22a1   :  { %v2075_v47 = vmul.f32 %v3268_v12, %v2071_v44 }
0x2300   :  { %v2079_v11 = vpop.permute.xlu0 %2078 }
0x2301   :  { %v2081_v2 = vpop.permute.xlu1 %2080  ;;  %v2084_v3 = vmul.f32 %v3266_v23, %v2079_v11 }
0x2302   :  { %v2085_v57 = vmul.f32 %v3268_v12, %v2081_v2 }
0x2303   :  { %2088 = vrot.lane.b32.xlu0 %v2084_v3, %s3502_s21 }
0x2304   :  { %2090 = vrot.lane.b32.xlu1 %v2085_v57, %s3502_s21 }
0x2375   :  { %v2089_v49 = vpop.permute.xlu0 %2088 }
0x2376   :  { %v2091_v53 = vpop.permute.xlu1 %2090  ;;  %v2094_v54 = vadd.f32 %v2089_v49, %v2074_v46 }
0x2377   :  { %v2095_v50 = vadd.f32 %v2091_v53, %v2075_v47 }
0x2378   :  { %3269 = vtanh.f32 %v2094_v54  ;;  %v2198_v33 = vrot.slane %v2094_v54, 7 }
0x2379   :  { %3271 = vtanh.f32 %v2095_v50  ;;  %v2199_v35 = vrot.slane %v2095_v50, 7 }
0x2385   :  { %v3270_v51 = vpop.eup %3269 }
0x2386   :  { %v3272_v56 = vpop.eup %3271  ;;  %2100 = vrot.lane.b32.xlu0 %v3270_v51, %s3502_s21 }
0x2387   :  { %2102 = vrot.lane.b32.xlu1 %v3272_v56, %s3502_s21 }
0x23f8   :  { %v2101_v59 = vpop.permute.xlu0 %2100 }
0x23f9   :  { %v2103_v60 = vpop.permute.xlu1 %2102  ;;  %v4111_v61 = vmul.f32 %v3266_v23, %v2101_v59 }
0x23fa   :  { %v4113_v62 = vmul.f32 %v3268_v12, %v2103_v60 }
0x23fb   :  { %v2120_v63 = vpack.c.bf16 %v4111_v61, %v4111_v61 }
0x23fc   :  { %v2121_v6 = vpack.c.bf16 %v4113_v62, %v4113_v62 }
0x23fd   :  { %v2124_v1 = vunpack.c.l.b16 %v2120_v63 }
0x23fe   :  { %v2125_v7 = vunpack.c.l.b16 %v2121_v6 }
0x23ff   :  { %v2126_v8 = vrot.slane %v2124_v1, 4 }
0x2400   :  { %v2127_v9 = vrot.slane %v2125_v7, 3 }
0x2402   :  { %v2128_v14 = vsel %vm348_vm2, %v2127_v9, %v2126_v8 }
0x2403   :  { %v2129_v15 = vpack.c.b16 %v2128_v14, %v2128_v14 }
0x2405   :  { %2130 = vrot.lane.b32.xlu0 %v2129_v15, %s3490_s20 }
0x2477   :  { %v2131_v16 = vpop.permute.xlu0 %2130 }
0x2478   :  { %2996 = vmatmul.mubr.msk.bf16.vlgmr.msra.gmra.mxu1 %vm225_vm3, %v2131_v16 }
0x2479   :  { %3008 = vmatpush3.bf16.msra.mxu1 %v3877_v22  ;;  %3011 = vmatprep.mubr.msk.bf16.mxu1 %vm3500_vm0, %v3499_v0 }
0x247a   :  { %3009 = vmatprep.subr.bf16.mxu1 %v3499_v0 }
0x247d   :  { %3010 = vmatpush3.bf16.msra.mxu1 %v3942_v55 }
0x2538   :  { %v2169_v17 = vpop.f32.mrf.mxu1 }
0x2539   :  { %v2176_v18 = vrot.slane %v2169_v17, 3  ;;  %v2177_v19 = vrot.slane %v2169_v17, 4 }
0x253a   :  { %v2997_v24 = vpop.f32.mrf.mxu1 }
0x253b   :  { %v2180_v26 = vadd.f32 %v2176_v18, %v3975_v25  ;;  %v2181_v21 = vadd.f32 %v2177_v19, %v3978_v4 }
0x253c   :  { %v2172_v28 = vpop.f32.mrf.mxu1 }
0x253d   :  { %3273 = vtanh.f32 %v2180_v26  ;;  %v2785_v30 = vmul.f32 -1.442695, %v2180_v26  ;;  %v2786_v55 = vmul.f32 -1.442695, %v2181_v21 }
0x253e   :  { %3275 = vtanh.f32 %v2181_v21  ;;  %v2998_v29 = vpop.f32.mrf.mxu1 }
0x253f   :  { %3277 = vpow2.f32 %v2785_v30 }
0x2540   :  { %3279 = vpow2.f32 %v2786_v55 }
0x254a   :  { %v3274_v22 = vpop.eup %3273 }
0x254b   :  { %v3276_v5 = vpop.eup %3275  ;;  %2206 = vrot.lane.b32.xlu1 %v3274_v22, %s3502_s21 }
0x254c   :  { %2208 = vrot.lane.b32.xlu0 %v3276_v5, %s3502_s21  ;;  %v3278_v31 = vpop.eup %3277 }
0x254d   :  { %v3280_v32 = vpop.eup %3279  ;;  %v2188_v34 = vadd.f32 1.0, %v3278_v31 }
0x254e   :  { %v2189_v36 = vadd.f32 1.0, %v3280_v32 }
0x254f   :  { %3281 = vrcp.f32 %v2188_v34 }
0x2550   :  { %3283 = vrcp.f32 %v2189_v36 }
0x255c   :  { %v3282_v37 = vpop.eup %3281 }
0x255d   :  { %v3284_v41 = vpop.eup %3283  ;;  %v2202_v23 = vmul.f32 %v3282_v37, %v2198_v33 }
0x255e   :  { %v2203_v11 = vmul.f32 %v3284_v41, %v2199_v35 }
0x25bd   :  { %v2207_v39 = vpop.permute.xlu1 %2206 }
0x25be   :  { %v2209_v42 = vpop.permute.xlu0 %2208  ;;  %v2212_v48 = vmul.f32 %v3282_v37, %v2207_v39 }
0x25bf   :  { %v2213_v52 = vmul.f32 %v3284_v41, %v2209_v42 }
0x25c0   :  { %2216 = vrot.lane.b32.xlu1 %v2212_v48, %s3502_s21 }
0x25c1   :  { %2218 = vrot.lane.b32.xlu0 %v2213_v52, %s3502_s21 }
0x2632   :  { %v2217_v12 = vpop.permute.xlu1 %2216 }
0x2633   :  { %v2219_v2 = vpop.permute.xlu0 %2218  ;;  %v2222_v3 = vadd.f32 %v2217_v12, %v2202_v23 }
0x2634   :  { %v2223_v57 = vadd.f32 %v2219_v2, %v2203_v11 }
0x2635   :  { %3285 = vtanh.f32 %v2222_v3 }
0x2636   :  { %3287 = vtanh.f32 %v2223_v57  ;;  %v2327_v39 = vrot.slane %v2223_v57, 7 }
0x2642   :  { %v3286_v58 = vpop.eup %3285 }
0x2643   :  { %v3288_v44 = vpop.eup %3287  ;;  %2228 = vrot.lane.b32.xlu1 %v3286_v58, %s3502_s21 }
0x2644   :  { %2230 = vrot.lane.b32.xlu0 %v3288_v44, %s3502_s21 }
0x26b5   :  { %v2229_v46 = vpop.permute.xlu1 %2228 }
0x26b6   :  { %v2231_v47 = vpop.permute.xlu0 %2230  ;;  %v4135_v49 = vmul.f32 %v3282_v37, %v2229_v46  ;;  %v2326_v37 = vrot.slane %v2222_v3, 7 }
0x26b7   :  { %v4137_v53 = vmul.f32 %v3284_v41, %v2231_v47 }
0x26b8   :  { %v2248_v54 = vpack.c.bf16 %v4135_v49, %v4135_v49 }
0x26b9   :  { %v2249_v50 = vpack.c.bf16 %v4137_v53, %v4137_v53 }
0x26ba   :  { %v2252_v51 = vunpack.c.l.b16 %v2248_v54 }
0x26bb   :  { %v2253_v56 = vunpack.c.l.b16 %v2249_v50 }
0x26bc   :  { %v2254_v59 = vrot.slane %v2252_v51, 5 }
0x26bd   :  { %v2255_v60 = vrot.slane %v2253_v56, 4 }
0x26bf   :  { %v2256_v63 = vsel %vm348_vm2, %v2255_v60, %v2254_v59 }
0x26c0   :  { %v2257_v6 = vpack.c.b16 %v2256_v63, %v2256_v63 }
0x26c2   :  { %2258 = vrot.lane.b32.xlu1 %v2257_v6, %s3490_s20 }
0x2734   :  { %v2259_v1 = vpop.permute.xlu1 %2258 }
0x2735   :  { %3004 = vmatmul.mubr.msk.bf16.vlgmr.msra.gmra.mxu0 %vm225_vm3, %v2259_v1 }
0x2736   :  { %3023 = vmatprep.mubr.msk.bf16.mxu0 %vm3500_vm0, %v3499_v0  ;;  %vm4305_vm0 = vcmask 126980  }
0x27f5   :  { %v2297_v7 = vpop.f32.mrf.mxu0 }
0x27f6   :  { %v2304_v8 = vrot.slane %v2297_v7, 2  ;;  %v2305_v9 = vrot.slane %v2297_v7, 3 }
0x27f7   :  { %v3005_v14 = vpop.f32.mrf.mxu0 }
0x27f8   :  { %v2308_v15 = vadd.f32 %v2304_v8, %v3975_v25  ;;  %v2309_v16 = vadd.f32 %v2305_v9, %v3978_v4 }
0x27f9   :  { %v2300_v17 = vpop.f32.mrf.mxu0 }
0x27fa   :  { %3289 = vtanh.f32 %v2308_v15  ;;  %v2788_v26 = vmul.f32 -1.442695, %v2308_v15  ;;  %v2789_v21 = vmul.f32 -1.442695, %v2309_v16 }
0x27fb   :  { %3291 = vtanh.f32 %v2309_v16  ;;  %v3006_v18 = vpop.f32.mrf.mxu0 }
0x27fc   :  { %3293 = vpow2.f32 %v2788_v26 }
0x27fd   :  { %3295 = vpow2.f32 %v2789_v21 }
0x2807   :  { %v3290_v19 = vpop.eup %3289 }
0x2808   :  { %v3292_v24 = vpop.eup %3291  ;;  %2334 = vrot.lane.b32.xlu0 %v3290_v19, %s3502_s21 }
0x2809   :  { %2336 = vrot.lane.b32.xlu1 %v3292_v24, %s3502_s21  ;;  %v3294_v28 = vpop.eup %3293 }
0x280a   :  { %v3296_v29 = vpop.eup %3295  ;;  %v2316_v22 = vadd.f32 1.0, %v3294_v28 }
0x280b   :  { %v2317_v5 = vadd.f32 1.0, %v3296_v29 }
0x280c   :  { %3297 = vrcp.f32 %v2316_v22 }
0x280d   :  { %3299 = vrcp.f32 %v2317_v5 }
0x2819   :  { %v3298_v30 = vpop.eup %3297 }
0x281a   :  { %v3300_v31 = vpop.eup %3299  ;;  %v2330_v41 = vmul.f32 %v3298_v30, %v2326_v37 }
0x281b   :  { %v2331_v42 = vmul.f32 %v3300_v31, %v2327_v39 }
0x287a   :  { %v2335_v55 = vpop.permute.xlu0 %2334 }
0x287b   :  { %v2337_v32 = vpop.permute.xlu1 %2336  ;;  %v2340_v34 = vmul.f32 %v3298_v30, %v2335_v55 }
0x287c   :  { %v2341_v36 = vmul.f32 %v3300_v31, %v2337_v32 }
0x287d   :  { %2344 = vrot.lane.b32.xlu0 %v2340_v34, %s3502_s21 }
0x287e   :  { %2346 = vrot.lane.b32.xlu1 %v2341_v36, %s3502_s21 }
0x28ef   :  { %v2345_v48 = vpop.permute.xlu0 %2344 }
0x28f0   :  { %v2347_v52 = vpop.permute.xlu1 %2346  ;;  %v2350_v33 = vadd.f32 %v2345_v48, %v2330_v41 }
0x28f1   :  { %v2351_v35 = vadd.f32 %v2347_v52, %v2331_v42 }
0x28f2   :  { %3301 = vtanh.f32 %v2350_v33 }
0x28f3   :  { %3303 = vtanh.f32 %v2351_v35  ;;  %v2455_v55 = vrot.slane %v2351_v35, 7 }
0x28ff   :  { %v3302_v23 = vpop.eup %3301 }
0x2900   :  { %v3304_v11 = vpop.eup %3303  ;;  %2356 = vrot.lane.b32.xlu0 %v3302_v23, %s3502_s21 }
0x2901   :  { %2358 = vrot.lane.b32.xlu1 %v3304_v11, %s3502_s21 }
0x2972   :  { %v2357_v12 = vpop.permute.xlu0 %2356 }
0x2973   :  { %v2359_v2 = vpop.permute.xlu1 %2358  ;;  %v4156_v58 = vmul.f32 %v3298_v30, %v2357_v12  ;;  %v2454_v30 = vrot.slane %v2350_v33, 7 }
0x2974   :  { %v4158_v3 = vmul.f32 %v3300_v31, %v2359_v2 }
0x2975   :  { %v2376_v57 = vpack.c.bf16 %v4156_v58, %v4156_v58 }
0x2976   :  { %v2377_v44 = vpack.c.bf16 %v4158_v3, %v4158_v3 }
0x2977   :  { %v2380_v46 = vunpack.c.l.b16 %v2376_v57  ;;  %v2761_v57 = vld [vmem:[%s4296_s7] ss:$0 sm:$0xff] }
0x2978   :  { %v2381_v47 = vunpack.c.l.b16 %v2377_v44 }
0x2979   :  { %v2382_v54 = vrot.slane %v2380_v46, 6 }
0x297a   :  { %v2383_v50 = vrot.slane %v2381_v47, 5 }
0x297c   :  { %v2384_v51 = vsel %vm348_vm2, %v2383_v50, %v2382_v54  ;;  %v4250_v50 = vld [vmem:[#allocation2 + $0x8] sm:$0xff] }
0x297d   :  { %v2385_v56 = vpack.c.b16 %v2384_v51, %v2384_v51  ;;  %v1287_v51 = vmul.f32 %v4250_v50, %v2761_v57 }
0x297f   :  { %2386 = vrot.lane.b32.xlu0 %v2385_v56, %s3490_s20 }
0x29f1   :  { %v2387_v59 = vpop.permute.xlu0 %2386 }
0x29f2   :  { %3012 = vmatmul.mubr.msk.bf16.vlgmr.msra.gmra.mxu1 %vm225_vm3, %v2387_v59  ;;  %v4254_v59 = vld [vmem:[#allocation2] sm:$0xff] }
0x2ab2   :  { %v2425_v60 = vpop.f32.mrf.mxu1 }
0x2ab3   :  { %v2432_v63 = vrot.slane %v2425_v60, 1  ;;  %v2433_v6 = vrot.slane %v2425_v60, 2  ;;  %v1286_v60 = vmul.f32 %v4254_v59, %v2761_v57 }
0x2ab4   :  { %v3013_v1 = vpop.f32.mrf.mxu1 }
0x2ab5   :  { %v2436_v7 = vadd.f32 %v2432_v63, %v3975_v25  ;;  %v2437_v8 = vadd.f32 %v2433_v6, %v3978_v4  ;;  %v1291_v63 = vsel %vm225_vm3, %v1287_v51, 0.0  ;;  %v1288_v6 = vsel %vm225_vm3, %v1286_v60, 0.0 }
0x2ab6   :  { %v2428_v9 = vpop.f32.mrf.mxu1  ;;  %v1298_v1 = vlaneseq }
0x2ab7   :  { %3305 = vtanh.f32 %v2436_v7  ;;  %v2791_v17 = vmul.f32 -1.442695, %v2436_v7  ;;  %v2792_v18 = vmul.f32 -1.442695, %v2437_v8 }
0x2ab8   :  { %3307 = vtanh.f32 %v2437_v8  ;;  %v3014_v14 = vpop.f32.mrf.mxu1  ;;  %v1299_v7 = vand.u32 127, %v1298_v1  ;;  %v1301_v8 = vshrl.u32 %v1298_v1, 7 }
0x2ab9   :  { %3309 = vpow2.f32 %v2791_v17 }
0x2aba   :  { %3311 = vpow2.f32 %v2792_v18  ;;  %v1302_v9 = vsub.s32 %v1299_v7, %v1301_v8 }
0x2ac4   :  { %v3306_v15 = vpop.eup %3305 }
0x2ac5   :  { %v3308_v16 = vpop.eup %3307  ;;  %2462 = vrot.lane.b32.xlu1 %v3306_v15, %s3502_s21 }
0x2ac6   :  { %2464 = vrot.lane.b32.xlu0 %v3308_v16, %s3502_s21  ;;  %v3310_v19 = vpop.eup %3309 }
0x2ac7   :  { %v3312_v24 = vpop.eup %3311  ;;  %v2444_v26 = vadd.f32 1.0, %v3310_v19 }
0x2ac8   :  { %v2445_v25 = vadd.f32 1.0, %v3312_v24 }
0x2ac9   :  { %3313 = vrcp.f32 %v2444_v26 }
0x2aca   :  { %3315 = vrcp.f32 %v2445_v25 }
0x2ad6   :  { %v3314_v4 = vpop.eup %3313 }
0x2ad7   :  { %v3316_v28 = vpop.eup %3315  ;;  %v2458_v31 = vmul.f32 %v3314_v4, %v2454_v30 }
0x2ad8   :  { %v2459_v32 = vmul.f32 %v3316_v28, %v2455_v55  ;;  %v1317_v55 = vsub.s32 0, %v1301_v8 }
0x2b37   :  { %v2463_v21 = vpop.permute.xlu1 %2462 }
0x2b38   :  { %v2465_v29 = vpop.permute.xlu0 %2464  ;;  %v2468_v22 = vmul.f32 %v3314_v4, %v2463_v21 }
0x2b39   :  { %v2469_v5 = vmul.f32 %v3316_v28, %v2465_v29 }
0x2b3a   :  { %2472 = vrot.lane.b32.xlu1 %v2468_v22, %s3502_s21 }
0x2b3b   :  { %2474 = vrot.lane.b32.xlu0 %v2469_v5, %s3502_s21 }
0x2bac   :  { %v2473_v34 = vpop.permute.xlu1 %2472 }
0x2bad   :  { %v2475_v36 = vpop.permute.xlu0 %2474  ;;  %v2478_v37 = vadd.f32 %v2473_v34, %v2458_v31  ;;  %v1321_v31 = vsub.s32 1, %v1301_v8 }
0x2bae   :  { %v2479_v39 = vadd.f32 %v2475_v36, %v2459_v32 }
0x2baf   :  { %3317 = vtanh.f32 %v2478_v37 }
0x2bb0   :  { %3319 = vtanh.f32 %v2479_v39 }
0x2bbc   :  { %v3318_v41 = vpop.eup %3317 }
0x2bbd   :  { %v3320_v42 = vpop.eup %3319  ;;  %2484 = vrot.lane.b32.xlu1 %v3318_v41, %s3502_s21 }
0x2bbe   :  { %2486 = vrot.lane.b32.xlu0 %v3320_v42, %s3502_s21 }
0x2bc1   :  { %1601 = vrot.lane.b32.xlu1 %v3990_v43, %s3490_s20 }
0x2bc2   :  { %1603 = vrot.lane.b32.xlu0 %v3992_v45, %s3490_s20 }
0x2bc5   :  { %1727 = vrot.lane.b32.xlu1 %v4021_v40, %s3490_s20 }
0x2bc6   :  { %1729 = vrot.lane.b32.xlu0 %v4019_v38, %s3490_s20 }
0x2bc9   :  { %1854 = vrot.lane.b32.xlu1 %v4051_v27, %s3490_s20 }
0x2bca   :  { %1856 = vrot.lane.b32.xlu0 %v4053_v20, %s3490_s20 }
0x2bcd   :  { %1982 = vrot.lane.b32.xlu1 %v4084_v10, %s3490_s20 }
0x2bce   :  { %1984 = vrot.lane.b32.xlu0 %v4086_v13, %s3490_s20 }
0x2bd1   :  { %2110 = vrot.lane.b32.xlu1 %v4111_v61, %s3490_s20 }
0x2bd2   :  { %2112 = vrot.lane.b32.xlu0 %v4113_v62, %s3490_s20 }
0x2bd5   :  { %2238 = vrot.lane.b32.xlu1 %v4135_v49, %s3490_s20 }
0x2bd6   :  { %2240 = vrot.lane.b32.xlu0 %v4137_v53, %s3490_s20 }
0x2bd9   :  { %2366 = vrot.lane.b32.xlu1 %v4156_v58, %s3490_s20  ;;  %v2793_v58 = vld [vmem:[%s4297_s8] ss:$0 sm:$0xff] }
0x2bda   :  { %2368 = vrot.lane.b32.xlu0 %v4158_v3, %s3490_s20 }
0x2c2f   :  { %v2485_v43 = vpop.permute.xlu1 %2484 }
0x2c30   :  { %v2487_v45 = vpop.permute.xlu0 %2486  ;;  %v2490_v38 = vmul.f32 %v3314_v4, %v2485_v43 }
0x2c31   :  { %v2491_v40 = vmul.f32 %v3316_v28, %v2487_v45 }
0x2c32   :  { %2494 = vrot.lane.b32.xlu1 %v2490_v38, %s3490_s20 }
0x2c33   :  { %2496 = vrot.lane.b32.xlu0 %v2491_v40, %s3490_s20  ;;  %v1602_v27 = vpop.permute.xlu1 %1601 }
0x2c34   :  { %v1604_v20 = vpop.permute.xlu0 %1603  ;;  %1607 = vst.msk [vmem:[#allocation4] sm:$0x1] %vm331_vm4, %v1602_v27 }
0x2c35   :  { %1609 = vst.msk [vmem:[#allocation4 + $0x7] sm:$0x1] %vm334_vm5, %v1602_v27  ;;  %1610 = vst.msk [vmem:[#allocation4 + $0xf] sm:$0x1] %vm334_vm5, %v1604_v20 }
0x2c36   :  { %1608 = vst.msk [vmem:[#allocation4 + $0x8] sm:$0x1] %vm331_vm4, %v1604_v20  ;;  %vm4306_vm4 = vcmask 258180   ;;  %vm4307_vm5 = vmmov %vm4305_vm0 }
0x2c37   :  { %v1728_v10 = vpop.permute.xlu1 %1727 }
0x2c38   :  { %v1730_v13 = vpop.permute.xlu0 %1729  ;;  %1733 = vst.msk [vmem:[#allocation4] sm:$0x2] %vm464_vm6, %v1728_v10 }
0x2c39   :  { %1735 = vst.msk [vmem:[#allocation4 + $0x5] sm:$0x2] %vm467_vm7, %v1728_v10  ;;  %1736 = vst.msk [vmem:[#allocation4 + $0xd] sm:$0x2] %vm467_vm7, %v1730_v13  ;;  %vm4309_vm7 = vcmask 128005  }
0x2c3a   :  { %1734 = vst.msk [vmem:[#allocation4 + $0x8] sm:$0x2] %vm464_vm6, %v1730_v13  ;;  %vm4308_vm6 = vmmov %vm4306_vm4 }
0x2c3b   :  { %v1855_v61 = vpop.permute.xlu1 %1854 }
0x2c3c   :  { %v1857_v62 = vpop.permute.xlu0 %1856  ;;  %1860 = vst.msk [vmem:[#allocation4] sm:$0x4] %vm597_vm8, %v1855_v61 }
0x2c3d   :  { %1862 = vst.msk [vmem:[#allocation4 + $0x3] sm:$0x4] %vm600_vm9, %v1855_v61  ;;  %1863 = vst.msk [vmem:[#allocation4 + $0xb] sm:$0x4] %vm600_vm9, %v1857_v62 }
0x2c3e   :  { %1861 = vst.msk [vmem:[#allocation4 + $0x8] sm:$0x4] %vm597_vm8, %v1857_v62  ;;  %vm4310_vm8 = vcmask 259205   ;;  %vm4311_vm9 = vmmov %vm4309_vm7 }
0x2c3f   :  { %v1983_v49 = vpop.permute.xlu1 %1982 }
0x2c40   :  { %v1985_v53 = vpop.permute.xlu0 %1984  ;;  %1988 = vst.msk [vmem:[#allocation4] sm:$0x8] %vm731_vm10, %v1983_v49 }
0x2c41   :  { %1990 = vst.msk [vmem:[#allocation4 + $0x1] sm:$0x8] %vm734_vm11, %v1983_v49  ;;  %1991 = vst.msk [vmem:[#allocation4 + $0x9] sm:$0x8] %vm734_vm11, %v1985_v53  ;;  %vm1310_vm11 = vcmask 58368  }
0x2c42   :  { %1989 = vst.msk [vmem:[#allocation4 + $0x8] sm:$0x8] %vm731_vm10, %v1985_v53  ;;  %vm4312_vm10 = vmmov %vm4310_vm8 }
0x2c43   :  { %v2111_v48 = vpop.permute.xlu1 %2110 }
0x2c44   :  { %v2113_v52 = vpop.permute.xlu0 %2112  ;;  %2116 = vst.msk [vmem:[#allocation4] sm:$0x10] %vm4305_vm0, %v2111_v48 }
0x2c45   :  { %2118 = vst.msk [vmem:[#allocation4 - $0x1] sm:$0x10] %vm4306_vm4, %v2111_v48 }
0x2c46   :  { %2117 = vst.msk [vmem:[#allocation4 + $0x8] sm:$0x10] %vm4307_vm5, %v2113_v52 }
0x2c47   :  { %2119 = vst.msk [vmem:[#allocation4 + $0x7] sm:$0x10] %vm4308_vm6, %v2113_v52  ;;  %v2239_v33 = vpop.permute.xlu1 %2238 }
0x2c48   :  { %v2241_v35 = vpop.permute.xlu0 %2240  ;;  %2244 = vst.msk [vmem:[#allocation4] sm:$0x20] %vm4309_vm7, %v2239_v33 }
0x2c49   :  { %2246 = vst.msk [vmem:[#allocation4 - $0x3] sm:$0x20] %vm4310_vm8, %v2239_v33 }
0x2c4a   :  { %2245 = vst.msk [vmem:[#allocation4 + $0x8] sm:$0x20] %vm4311_vm9, %v2241_v35 }
0x2c4b   :  { %2247 = vst.msk [vmem:[#allocation4 + $0x5] sm:$0x20] %vm4312_vm10, %v2241_v35  ;;  %v2367_v23 = vpop.permute.xlu1 %2366 }
0x2c4c   :  { %v2369_v11 = vpop.permute.xlu0 %2368  ;;  %2372 = vst.msk [vmem:[#allocation4] sm:$0x40] %vm1133_vm13, %v2367_v23 }
0x2c4d   :  { %2374 = vst.msk [vmem:[#allocation4 - $0x5] sm:$0x40] %vm1136_vm12, %v2367_v23  ;;  %2375 = vst.msk [vmem:[#allocation4 + $0x3] sm:$0x40] %vm1136_vm12, %v2369_v11 }
0x2c4e   :  { %2373 = vst.msk [vmem:[#allocation4 + $0x8] sm:$0x40] %vm1133_vm13, %v2369_v11 }
0x2ca4   :  { %v2495_v12 = vpop.permute.xlu1 %2494 }
0x2ca5   :  { %v2497_v2 = vpop.permute.xlu0 %2496  ;;  %2500 = vst.msk [vmem:[#allocation4] sm:$0x80] %vm1267_vm15, %v2495_v12 }
0x2ca6   :  { %2502 = vst.msk [vmem:[#allocation4 - $0x7] sm:$0x80] %vm1270_vm14, %v2495_v12  ;;  %2503 = vst.msk [vmem:[#allocation4 + $0x1] sm:$0x80] %vm1270_vm14, %v2497_v2 }
0x2ca7   :  { %2501 = vst.msk [vmem:[#allocation4 + $0x8] sm:$0x80] %vm1267_vm15, %v2497_v2 }
0x2cad   :  { %v4240_v3 = vld [vmem:[#allocation4] sm:$0xff] }
0x2cae   :  { %v4245_v44 = vld [vmem:[#allocation4 + $0x8] sm:$0xff]  ;;  %v2513_v46 = vmul.f32 %v2793_v58, %v4240_v3 }
0x2caf   :  { %v2514_v47 = vmul.f32 %v2793_v58, %v4245_v44 }
0x2cb0   :  { %v2515_v54 = vsel %vm225_vm3, %v2513_v46, 0.0 }
0x2cb1   :  { %v2518_v56 = vsel %vm225_vm3, %v2514_v47, 0.0  ;;  %2516 = vadd.xlane.f32.xlu1 %v2515_v54 }
0x2cb2   :  { %2519 = vadd.xlane.f32.xlu0 %v2518_v56 }
0x2cb5   :  { %1292 = vadd.xlane.f32.xlu1 %v1291_v63 }
0x2cb6   :  { %1289 = vadd.xlane.f32.xlu0 %v1288_v6 }
0x2d3a   :  { %v2517_v14 = vpop.xlane.xlu1 %2516 }
0x2d3b   :  { %v2520_v15 = vpop.xlane.xlu0 %2519  ;;  %v2521_v16 = vmax.f32 %v2517_v14, 0.0 }
0x2d3c   :  { %v2522_v17 = vmax.f32 %v2520_v15, 0.0 }
0x2d3d   :  { %v2528_v18 = vrot.slane %v2521_v16, %v1302_v9 }
0x2d3e   :  { %v2532_v19 = vrot.slane %v2522_v17, %v1302_v9  ;;  %v1293_v24 = vpop.xlane.xlu1 %1292 }
0x2d3f   :  { %v1290_v26 = vpop.xlane.xlu0 %1289  ;;  %v1295_v25 = vmax.f32 %v1293_v24, 0.0 }
0x2d40   :  { %v1294_v4 = vmax.f32 %v1290_v26, 0.0  ;;  %v2533_v21 = vsel %vm348_vm2, %v2532_v19, %v2528_v18  ;;  %v3062_v18 = vld [vmem:[#allocation14 + $0x10] sm:$0xff]   ;;  %v3063_v19 = vld [vmem:[#allocation14 + $0x8] sm:$0xff]  }
0x2d41   :  { %v1307_v28 = vrot.slane %v1295_v25, %v1302_v9  ;;  %v2535_v29 = vsel %vm1310_vm11, %v2533_v21, -inf }
0x2d42   :  { %v1303_v22 = vrot.slane %v1294_v4, %v1302_v9  ;;  %2536 = vmax.xlane.f32.xlu0 %v2535_v29 }
0x2d44   :  { %v1308_v5 = vsel %vm348_vm2, %v1307_v28, %v1303_v22  ;;  %v3064_v28 = vld [vmem:[#allocation14] sm:$0xff]  }
0x2d45   :  { %v1311_v30 = vsel %vm1310_vm11, %v1308_v5, -inf }
0x2d46   :  { %1312 = vmax.xlane.f32.xlu1 %v1311_v30 }
0x2dcb   :  { %v2537_v32 = vpop.xlane.xlu0 %2536 }
0x2dcc   :  { %v2542_v34 = vrot.slane %v2537_v32, %v1317_v55  ;;  %v2546_v36 = vrot.slane %v2537_v32, %v1321_v31 }
0x2dce   :  { %v2549_v37 = vsub.f32 %v2521_v16, %v2542_v34  ;;  %v2550_v39 = vsub.f32 %v2522_v17, %v2546_v36  ;;  %v3061_v17 = vld [vmem:[#allocation14 + $0x18] sm:$0xff]  }
0x2dcf   :  { %v1313_v41 = vpop.xlane.xlu1 %1312  ;;  %3016 = vmatpush3.bf16.msra.mxu0 %v3061_v17 }
0x2dd0   :  { %v2551_v42 = vmul.f32 1.442695, %v2549_v37  ;;  %v2553_v43 = vmul.f32 1.442695, %v2550_v39  ;;  %v1318_v45 = vrot.slane %v1313_v41, %v1317_v55  ;;  %v1322_v38 = vrot.slane %v1313_v41, %v1321_v31  ;;  %3017 = vmatprep.subr.bf16.mxu0 %v3499_v0 }
0x2dd2   :  { %3321 = vpow2.f32 %v2551_v42  ;;  %v1325_v40 = vsub.f32 %v1294_v4, %v1318_v45  ;;  %v1326_v27 = vsub.f32 %v1295_v25, %v1322_v38 }
0x2dd3   :  { %3323 = vpow2.f32 %v2553_v43  ;;  %3018 = vmatpush3.bf16.msra.mxu0 %v3062_v18 }
0x2dd4   :  { %v1327_v20 = vmul.f32 1.442695, %v1325_v40  ;;  %v1329_v10 = vmul.f32 1.442695, %v1326_v27  ;;  %3019 = vmatprep.subr.bf16.mxu0 %v3499_v0 }
0x2dd6   :  { %3325 = vpow2.f32 %v1327_v20 }
0x2dd7   :  { %3327 = vpow2.f32 %v1329_v10  ;;  %3020 = vmatpush3.bf16.msra.mxu0 %v3063_v19 }
0x2dd8   :  { %3021 = vmatprep.subr.bf16.mxu0 %v3499_v0 }
0x2ddb   :  { %3022 = vmatpush3.bf16.msra.mxu0 %v3064_v28 }
0x2ddf   :  { %v3322_v13 = vpop.eup %3321 }
0x2de0   :  { %v3324_v61 = vpop.eup %3323  ;;  %2558 = vperm.xlu0 %3047, %v3322_v13  }
0x2de1   :  { %2561 = vperm.xlu1 %3048, %v3324_v61  }
0x2de3   :  { %v3326_v62 = vpop.eup %3325 }
0x2de4   :  { %v3328_v49 = vpop.eup %3327 }
0x2de5   :  { %1334 = vperm.xlu1 %3048, %v3326_v62  }
0x2de9   :  { %1337 = vperm.xlu1 %3048, %v3328_v49  }
0x2e5b   :  { %v2559_v53 = vpop.permute.xlu0 %2558 }
0x2e5c   :  { %v2566_v48 = vrot.slane %v2559_v53, %v1302_v9  ;;  %v2562_v52 = vpop.permute.xlu1 %2561 }
0x2e5d   :  { %v2570_v33 = vrot.slane %v2562_v52, %v1302_v9 }
0x2e5f   :  { %v2571_v35 = vsel %vm348_vm2, %v2570_v33, %v2566_v48 }
0x2e60   :  { %v1335_v23 = vpop.permute.xlu1 %1334  ;;  %v2573_v11 = vsel %vm1310_vm11, %v2571_v35, 0.0 }
0x2e61   :  { %2574 = vadd.xlane.f32.xlu1 %v2573_v11  ;;  %v1342_v2 = vrot.slane %v1335_v23, %v1302_v9 }
0x2e64   :  { %v1338_v12 = vpop.permute.xlu1 %1337 }
0x2e65   :  { %v1346_v58 = vrot.slane %v1338_v12, %v1302_v9  ;;  %v2794_v12 = vld [vmem:[%s4299_s10] ss:$0 sm:$0xff] }
0x2e67   :  { %v1347_v57 = vsel %vm348_vm2, %v1346_v58, %v1342_v2 }
0x2e68   :  { %v1349_v46 = vsel %vm1310_vm11, %v1347_v57, 0.0 }
0x2e69   :  { %1350 = vadd.xlane.f32.xlu0 %v1349_v46 }
0x2eea   :  { %v2575_v47 = vpop.xlane.xlu1 %2574 }
0x2eeb   :  { %v2580_v54 = vrot.slane %v2575_v47, %v1317_v55  ;;  %v2584_v51 = vrot.slane %v2575_v47, %v1321_v31 }
0x2eed   :  { %3329 = vrcp.f32 %v2580_v54 }
0x2eee   :  { %3331 = vrcp.f32 %v2584_v51 }
0x2ef2   :  { %v1351_v56 = vpop.xlane.xlu0 %1350 }
0x2ef3   :  { %v1356_v60 = vrot.slane %v1351_v56, %v1317_v55  ;;  %v1360_v63 = vrot.slane %v1351_v56, %v1321_v31 }
0x2ef5   :  { %3333 = vrcp.f32 %v1356_v60 }
0x2ef6   :  { %3335 = vrcp.f32 %v1360_v63 }
0x2efa   :  { %v3330_v6 = vpop.eup %3329 }
0x2efb   :  { %v3332_v1 = vpop.eup %3331  ;;  %v2588_v7 = vmul.f32 %v3330_v6, %v3322_v13 }
0x2efc   :  { %v2590_v8 = vmul.f32 %v3332_v1, %v3324_v61 }
0x2efd   :  { %2593 = vperm.xlu1 %3048, %v2588_v7  }
0x2efe   :  { %2598 = vperm.xlu0 %3047, %v2590_v8  }
0x2f02   :  { %v3334_v9 = vpop.eup %3333 }
0x2f03   :  { %v1364_v14 = vmul.f32 %v3334_v9, %v3326_v62  ;;  %v3336_v15 = vpop.eup %3335 }
0x2f04   :  { %v1366_v16 = vmul.f32 %v3336_v15, %v3328_v49 }
0x2f05   :  { %1369 = vperm.xlu1 %3048, %v1364_v14  }
0x2f09   :  { %1374 = vperm.xlu1 %3048, %v1366_v16  }
0x2f78   :  { %v2594_v24 = vpop.permute.xlu1 %2593 }
0x2f79   :  { %v2599_v26 = vpop.permute.xlu0 %2598  ;;  %v2601_v25 = vmul.f32 %v2594_v24, %v4240_v3 }
0x2f7a   :  { %v2602_v4 = vmul.f32 %v2599_v26, %v4245_v44 }
0x2f7b   :  { %v2603_v21 = vsel %vm225_vm3, %v2601_v25, 0.0 }
0x2f7c   :  { %v2610_v29 = vsel %vm225_vm3, %v2602_v4, 0.0  ;;  %v2604_v22 = vrot.slane %v2603_v21, 4 }
0x2f7d   :  { %v2611_v5 = vrot.slane %v2610_v29, 4 }
0x2f7e   :  { %v2605_v30 = vadd.f32 %v2604_v22, %v2603_v21 }
0x2f7f   :  { %v2612_v55 = vadd.f32 %v2611_v5, %v2610_v29 }
0x2f80   :  { %v2606_v31 = vrot.slane %v2605_v30, 2  ;;  %v1370_v41 = vpop.permute.xlu1 %1369 }
0x2f81   :  { %v2613_v32 = vrot.slane %v2612_v55, 2  ;;  %v1377_v45 = vmul.f32 %v4254_v59, %v1370_v41 }
0x2f82   :  { %v2607_v34 = vadd.f32 %v2606_v31, %v2605_v30 }
0x2f83   :  { %v2614_v0 = vadd.f32 %v2613_v32, %v2612_v55  ;;  %v1379_v40 = vsel %vm225_vm3, %v1377_v45, 0.0 }
0x2f84   :  { %v2608_v36 = vrot.slane %v2607_v34, 1  ;;  %v1375_v42 = vpop.permute.xlu1 %1374  ;;  %v1380_v20 = vrot.slane %v1379_v40, 4 }
0x2f85   :  { %v2615_v37 = vrot.slane %v2614_v0, 1  ;;  %v1378_v43 = vmul.f32 %v4250_v50, %v1375_v42 }
0x2f86   :  { %v2609_v39 = vadd.f32 %v2608_v36, %v2607_v34  ;;  %v1381_v13 = vadd.f32 %v1380_v20, %v1379_v40 }
0x2f87   :  { %v2616_v3 = vadd.f32 %v2615_v37, %v2614_v0  ;;  %v1386_v38 = vsel %vm225_vm3, %v1378_v43, 0.0 }
0x2f88   :  { %v1387_v27 = vrot.slane %v1386_v38, 4  ;;  %v1382_v62 = vrot.slane %v1381_v13, 2 }
0x2f89   :  { %v2623_v44 = vsel %vm348_vm2, %v2616_v3, %v2609_v39 }
0x2f8a   :  { %2624 = vrot.lane.b32.xlu1 %v2623_v44, %s3502_s21  ;;  %v1388_v10 = vadd.f32 %v1387_v27, %v1386_v38  ;;  %v1383_v53 = vadd.f32 %v1382_v62, %v1381_v13 }
0x2f8c   :  { %v1389_v61 = vrot.slane %v1388_v10, 2  ;;  %v1384_v52 = vrot.slane %v1383_v53, 1 }
0x2f8e   :  { %v1390_v49 = vadd.f32 %v1389_v61, %v1388_v10  ;;  %v1385_v35 = vadd.f32 %v1384_v52, %v1383_v53 }
0x2f90   :  { %v1391_v48 = vrot.slane %v1390_v49, 1 }
0x2f92   :  { %v1392_v33 = vadd.f32 %v1391_v48, %v1390_v49 }
0x2f94   :  { %v2619_v50 = vsel %vm348_vm2, %v1392_v33, %v1385_v35 }
0x2ffc   :  { %v2625_v23 = vpop.permute.xlu1 %2624 }
0x2ffd   :  { %v2627_v59 = vsel %vm225_vm3, %v2619_v50, %v2625_v23 }
0x2ffe   :  { %v2628_v11 = vpack.c.bf16 %v2627_v59, %v2627_v59 }
0x3000   :  { %3024 = vmatmul.mubr.msk.bf16.vlgmr.msra.gmra.mxu0 %vm164_vm1, %v2628_v11 }
0x30c0   :  { %v2705_v2 = vpop.f32.mrf.mxu0 }
0x30c1   :  { %v2706_v58 = vadd.f32 %v2794_v12, %v2705_v2 }
0x30c2   :  { %v3025_v57 = vpop.f32.mrf.mxu0 }
0x30c3   :  { %2711 = vst [vmem:[#allocation16] sm:$0x3] %v2706_v58 }
0x30c4   :  { %v2708_v46 = vpop.f32.mrf.mxu0 }
0x30c5   :  { %3470 = shalt.err (!%p3467_p6)
}
0x30c6   :  { %2721 = dma.vmem_to_hbm [thread:$0]  %s2719_s14, 32, %s4300_s11, [#allocation7]   ;;  %v3026_v47 = vpop.f32.mrf.mxu0 }
0x30c7   :  { %3487 = dma.done.wait [#allocation7], 32  }
0x30c8   :  { %3488 = vsyncadd [#allocation7], 4294967264 }
0x30c9   :  { %2725 = vsyncpa [#allocation6], 1 }
0x30ca   :  { %2726 = vsyncpa [#allocation9], 1 }
0x30cb   :  { %2727 = vsyncpa [#allocation12], 1 }
0x30cc   :  { %2728 = vsyncpa [#allocation15], 1 }
0x30cd   :  { %2729 = vsyncpa [#allocation7], 1 }

</bundles_post_ra>
